<compile_context>
chip_gen: v6e
topology: v6e:2x2x1
jax: 0.10.0
libtpu: 0.0.40
codegen_flags: <defaults>
</compile_context>

<pallas_src>
import math
import functools

import jax
import jax.numpy as jnp
from jax import lax
from jax.experimental import pallas as pl
from jax.experimental.pallas import tpu as pltpu


def _nasrnn_kernel(x_ref, wih_ref, whh_ref, out_ref, ih_ref, *, T, B, H):
    # --- preamble: hoisted input projection for all timesteps --------------
    # (T*B, I) @ (I, 8H) -> (T*B, 8H), kept in VMEM scratch for the recurrence.
    ih_ref[...] = jnp.dot(x_ref[...], wih_ref[...],
                          preferred_element_type=jnp.float32)

    # --- serial recurrence over time ----------------------------------------
    def step(t, carry):
        state_c, state_m = carry

        row = pl.multiple_of(t * B, B)
        ih = ih_ref[pl.ds(row, B), :]                        # (B, 8H)
        hh = jnp.dot(state_m, whh_ref[...],                  # (B, 8H), one MXU op
                     preferred_element_type=jnp.float32)
        g = ih + hh

        # Static, 128-lane-aligned gate slices of the fused result.
        g0 = g[:, 0 * H:1 * H]
        g1 = g[:, 1 * H:2 * H]
        g2 = g[:, 2 * H:3 * H]
        g3 = g[:, 3 * H:4 * H]
        g4 = g[:, 4 * H:5 * H]
        g5 = g[:, 5 * H:6 * H]
        g6 = g[:, 6 * H:7 * H]
        g7 = g[:, 7 * H:8 * H]

        l1_0 = jax.nn.sigmoid(g0)
        l1_1 = jax.nn.relu(g1)
        l1_2 = jax.nn.sigmoid(g2)
        l1_3 = jax.nn.relu(g3)
        l1_4 = jnp.tanh(g4)
        l1_5 = jax.nn.sigmoid(g5)
        l1_6 = jnp.tanh(g6)
        l1_7 = jax.nn.sigmoid(g7)

        l2_0 = jnp.tanh(l1_0 * l1_1)
        l2_1 = jnp.tanh(l1_2 + l1_3)
        l2_2 = jnp.tanh(l1_4 * l1_5)
        l2_3 = jax.nn.sigmoid(l1_6 + l1_7)

        l2_0_v2 = jnp.tanh(l2_0 + state_c)
        new_c = l2_0_v2 * l2_1
        l3_1 = jnp.tanh(l2_2 + l2_3)
        new_m = jnp.tanh(new_c * l3_1)
        return new_c, new_m

    zero = jnp.zeros((B, H), jnp.float32)
    state_c, state_m = lax.fori_loop(0, T, step, (zero, zero), unroll=True)

    out_ref[...] = state_c + state_m


def nasrnn_forward(inputs, weight_ih, weight_hh):
    """inputs: (T, B, I) f32; weight_ih: (8, I, H); weight_hh: (8, H, H) -> (B, H)."""
    T, B, I = inputs.shape
    G, _, H = weight_ih.shape

    # Layout plumbing in the wrapper (one-time weight prep, plain XLA ops):
    #   x:  (T, B, I)  -> (T*B, I)   contiguous row-major flatten
    #   W:  (8, K, H)  -> (K, 8H)    lane block g <-> gate g
    x_flat = inputs.reshape(T * B, I)
    wih_fused = jnp.transpose(weight_ih, (1, 0, 2)).reshape(I, G * H)
    whh_fused = jnp.transpose(weight_hh, (1, 0, 2)).reshape(H, G * H)

    kernel = functools.partial(_nasrnn_kernel, T=T, B=B, H=H)

    return pl.pallas_call(
        kernel,
        out_shape=jax.ShapeDtypeStruct((B, H), jnp.float32),
        in_specs=[
            pl.BlockSpec(memory_space=pltpu.MemorySpace.VMEM),  # x, fully resident
            pl.BlockSpec(memory_space=pltpu.MemorySpace.VMEM),  # fused W_ih
            pl.BlockSpec(memory_space=pltpu.MemorySpace.VMEM),  # fused W_hh
        ],
        out_specs=pl.BlockSpec(memory_space=pltpu.MemorySpace.VMEM),
        scratch_shapes=[
            pltpu.VMEM((T * B, G * H), jnp.float32),  # hoisted ih for all steps
        ],
        compiler_params=pltpu.CompilerParams(
            vmem_limit_bytes=32 * 1024 * 1024,
        ),
    )(x_flat, wih_fused, whh_fused)


def nasrnn_reference(inputs, weight_ih, weight_hh):
    """Pure-JAX reference identical to the PyTorch forward."""
    T, B, I = inputs.shape
    H = weight_ih.shape[-1]
    state_c = jnp.zeros((B, H), jnp.float32)
    state_m = jnp.zeros((B, H), jnp.float32)
    for i in range(T):
        inp = inputs[i]
        ih = jnp.einsum("bi,gih->gbh", inp, weight_ih)
        hh = jnp.einsum("bh,ghk->gbk", state_m, weight_hh)
        l1_0 = jax.nn.sigmoid(ih[0] + hh[0])
        l1_1 = jax.nn.relu(ih[1] + hh[1])
        l1_2 = jax.nn.sigmoid(ih[2] + hh[2])
        l1_3 = jax.nn.relu(ih[3] + hh[3])
        l1_4 = jnp.tanh(ih[4] + hh[4])
        l1_5 = jax.nn.sigmoid(ih[5] + hh[5])
        l1_6 = jnp.tanh(ih[6] + hh[6])
        l1_7 = jax.nn.sigmoid(ih[7] + hh[7])
        l2_0 = jnp.tanh(l1_0 * l1_1)
        l2_1 = jnp.tanh(l1_2 + l1_3)
        l2_2 = jnp.tanh(l1_4 * l1_5)
        l2_3 = jax.nn.sigmoid(l1_6 + l1_7)
        l2_0_v2 = jnp.tanh(l2_0 + state_c)
        state_c = l2_0_v2 * l2_1
        l3_1 = jnp.tanh(l2_2 + l2_3)
        state_m = jnp.tanh(state_c * l3_1)
    return state_c + state_m


def _xavier_uniform(key, shape):
    # PyTorch xavier_uniform_ on a (G, fan_in_dim, fan_out_dim) tensor:
    # fan_in = shape[1]*rf, fan_out = shape[0]*rf with rf = prod(shape[2:]).
    rf = math.prod(shape[2:]) if len(shape) > 2 else 1
    fan_in, fan_out = shape[1] * rf, shape[0] * rf
    bound = math.sqrt(6.0 / (fan_in + fan_out))
    return jax.random.uniform(key, shape, jnp.float32, minval=-bound, maxval=bound)


if __name__ == "__main__":
    seq_len, batch, input_size, hidden = 8, 8, 32, 128

    key = jax.random.PRNGKey(0)
    k_x, k_ih, k_hh = jax.random.split(key, 3)
    inputs = jax.random.normal(k_x, (seq_len, batch, input_size), jnp.float32)
    weight_ih = _xavier_uniform(k_ih, (8, input_size, hidden))
    weight_hh = _xavier_uniform(k_hh, (8, hidden, hidden))

    out = jax.block_until_ready(nasrnn_forward(inputs, weight_ih, weight_hh))
    ref = jax.block_until_ready(nasrnn_reference(inputs, weight_ih, weight_hh))

    assert out.shape == (batch, hidden)
    assert jnp.allclose(out, ref, atol=1e-4, rtol=1e-4), "mismatch vs reference"
    print("KERNEL_OK")
</pallas_src>

<mosaic_0001>
module attributes {stable_mosaic.version = 11 : i64} {
  func.func @_nasrnn_kernel(%arg0: memref<64x32xf32, #tpu.memory_space<vmem>>, %arg1: memref<32x1024xf32, #tpu.memory_space<vmem>>, %arg2: memref<128x1024xf32, #tpu.memory_space<vmem>>, %arg3: memref<8x128xf32, #tpu.memory_space<vmem>>, %arg4: memref<64x1024xf32, #tpu.memory_space<vmem>>) attributes {dimension_semantics = [], scalar_prefetch = 0 : i64, scratch_operands = 1 : i64, tpu.core_type = #tpu.core_type<tc>} {
    %c0 = arith.constant 0 : index
    %c0_0 = arith.constant 0 : index
    %0 = vector.load %arg0[%c0, %c0_0] : memref<64x32xf32, #tpu.memory_space<vmem>>, vector<64x32xf32>
    %c0_1 = arith.constant 0 : index
    %c0_2 = arith.constant 0 : index
    %1 = vector.load %arg1[%c0_1, %c0_2] : memref<32x1024xf32, #tpu.memory_space<vmem>>, vector<32x1024xf32>
    %cst = arith.constant dense<0.000000e+00> : vector<64x1024xf32>
    %2 = tpu.matmul %0, %1, %cst {dimension_numbers = #tpu.dot_dimension_numbers<[1], [0], [0], [1], [0, 0, 1, 1], [], []>} : vector<64x32xf32>, vector<32x1024xf32>, vector<64x1024xf32> -> vector<64x1024xf32>
    %c0_3 = arith.constant 0 : index
    %c0_4 = arith.constant 0 : index
    %3 = vector.load %arg4[%c0_3, %c0_4] : memref<64x1024xf32, #tpu.memory_space<vmem>>, vector<64x1024xf32>
    tpu.vector_store %arg4[%c0_3, %c0_4], %2 {strides = array<i32>} : memref<64x1024xf32, #tpu.memory_space<vmem>>, vector<64x1024xf32>,
    %cst_5 = arith.constant 0.000000e+00 : f32
    %4 = vector.broadcast %cst_5 : f32 to vector<8x128xf32>
    %c0_i32 = arith.constant 0 : i32
    %c8_i32 = arith.constant 8 : i32
    %5 = arith.muli %c0_i32, %c8_i32 : i32
    %6 = tpu.assume_multiple %5, 8 : i32
    %7 = arith.index_cast %6 : i32 to index
    %c0_6 = arith.constant 0 : index
    %8 = vector.load %arg4[%7, %c0_6] : memref<64x1024xf32, #tpu.memory_space<vmem>>, vector<8x1024xf32>
    %c0_7 = arith.constant 0 : index
    %c0_8 = arith.constant 0 : index
    %9 = vector.load %arg2[%c0_7, %c0_8] : memref<128x1024xf32, #tpu.memory_space<vmem>>, vector<128x1024xf32>
    %cst_9 = arith.constant dense<0.000000e+00> : vector<8x1024xf32>
    %10 = tpu.matmul %4, %9, %cst_9 {dimension_numbers = #tpu.dot_dimension_numbers<[1], [0], [0], [1], [0, 0, 1, 1], [], []>} : vector<8x128xf32>, vector<128x1024xf32>, vector<8x1024xf32> -> vector<8x1024xf32>
    %11 = arith.addf %8, %10 : vector<8x1024xf32>
    %12 = vector.extract_strided_slice %11 {offsets = [0, 0], sizes = [8, 128], strides = [1, 1]} : vector<8x1024xf32> to vector<8x128xf32>
    %13 = vector.extract_strided_slice %11 {offsets = [0, 128], sizes = [8, 128], strides = [1, 1]} : vector<8x1024xf32> to vector<8x128xf32>
    %14 = vector.extract_strided_slice %11 {offsets = [0, 256], sizes = [8, 128], strides = [1, 1]} : vector<8x1024xf32> to vector<8x128xf32>
    %15 = vector.extract_strided_slice %11 {offsets = [0, 384], sizes = [8, 128], strides = [1, 1]} : vector<8x1024xf32> to vector<8x128xf32>
    %16 = vector.extract_strided_slice %11 {offsets = [0, 512], sizes = [8, 128], strides = [1, 1]} : vector<8x1024xf32> to vector<8x128xf32>
    %17 = vector.extract_strided_slice %11 {offsets = [0, 640], sizes = [8, 128], strides = [1, 1]} : vector<8x1024xf32> to vector<8x128xf32>
    %18 = vector.extract_strided_slice %11 {offsets = [0, 768], sizes = [8, 128], strides = [1, 1]} : vector<8x1024xf32> to vector<8x128xf32>
    %19 = vector.extract_strided_slice %11 {offsets = [0, 896], sizes = [8, 128], strides = [1, 1]} : vector<8x1024xf32> to vector<8x128xf32>
    %20 = arith.negf %12 : vector<8x128xf32>
    %21 = math.exp %20 : vector<8x128xf32>
    %cst_10 = arith.constant 1.000000e+00 : f32
    %22 = vector.broadcast %cst_10 : f32 to vector<8x128xf32>
    %23 = arith.addf %22, %21 : vector<8x128xf32>
    %24 = arith.divf %22, %23 : vector<8x128xf32>
    %cst_11 = arith.constant 0.000000e+00 : f32
    %25 = vector.broadcast %cst_11 : f32 to vector<8x128xf32>
    %26 = arith.maximumf %13, %25 : vector<8x128xf32>
    %27 = arith.negf %14 : vector<8x128xf32>
    %28 = math.exp %27 : vector<8x128xf32>
    %cst_12 = arith.constant 1.000000e+00 : f32
    %29 = vector.broadcast %cst_12 : f32 to vector<8x128xf32>
    %30 = arith.addf %29, %28 : vector<8x128xf32>
    %31 = arith.divf %29, %30 : vector<8x128xf32>
    %cst_13 = arith.constant 0.000000e+00 : f32
    %32 = vector.broadcast %cst_13 : f32 to vector<8x128xf32>
    %33 = arith.maximumf %15, %32 : vector<8x128xf32>
    %34 = math.tanh %16 : vector<8x128xf32>
    %35 = arith.negf %17 : vector<8x128xf32>
    %36 = math.exp %35 : vector<8x128xf32>
    %cst_14 = arith.constant 1.000000e+00 : f32
    %37 = vector.broadcast %cst_14 : f32 to vector<8x128xf32>
    %38 = arith.addf %37, %36 : vector<8x128xf32>
    %39 = arith.divf %37, %38 : vector<8x128xf32>
    %40 = math.tanh %18 : vector<8x128xf32>
    %41 = arith.negf %19 : vector<8x128xf32>
    %42 = math.exp %41 : vector<8x128xf32>
    %cst_15 = arith.constant 1.000000e+00 : f32
    %43 = vector.broadcast %cst_15 : f32 to vector<8x128xf32>
    %44 = arith.addf %43, %42 : vector<8x128xf32>
    %45 = arith.divf %43, %44 : vector<8x128xf32>
    %46 = arith.mulf %24, %26 : vector<8x128xf32>
    %47 = math.tanh %46 : vector<8x128xf32>
    %48 = arith.addf %31, %33 : vector<8x128xf32>
    %49 = math.tanh %48 : vector<8x128xf32>
    %50 = arith.mulf %34, %39 : vector<8x128xf32>
    %51 = math.tanh %50 : vector<8x128xf32>
    %52 = arith.addf %40, %45 : vector<8x128xf32>
    %53 = arith.negf %52 : vector<8x128xf32>
    %54 = math.exp %53 : vector<8x128xf32>
    %cst_16 = arith.constant 1.000000e+00 : f32
    %55 = vector.broadcast %cst_16 : f32 to vector<8x128xf32>
    %56 = arith.addf %55, %54 : vector<8x128xf32>
    %57 = arith.divf %55, %56 : vector<8x128xf32>
    %58 = arith.addf %47, %4 : vector<8x128xf32>
    %59 = math.tanh %58 : vector<8x128xf32>
    %60 = arith.mulf %59, %49 : vector<8x128xf32>
    %61 = arith.addf %51, %57 : vector<8x128xf32>
    %62 = math.tanh %61 : vector<8x128xf32>
    %63 = arith.mulf %60, %62 : vector<8x128xf32>
    %64 = math.tanh %63 : vector<8x128xf32>
    %c1_i32 = arith.constant 1 : i32
    %c8_i32_17 = arith.constant 8 : i32
    %65 = arith.muli %c1_i32, %c8_i32_17 : i32
    %66 = tpu.assume_multiple %65, 8 : i32
    %67 = arith.index_cast %66 : i32 to index
    %c0_18 = arith.constant 0 : index
    %68 = vector.load %arg4[%67, %c0_18] : memref<64x1024xf32, #tpu.memory_space<vmem>>, vector<8x1024xf32>
    %c0_19 = arith.constant 0 : index
    %c0_20 = arith.constant 0 : index
    %69 = vector.load %arg2[%c0_19, %c0_20] : memref<128x1024xf32, #tpu.memory_space<vmem>>, vector<128x1024xf32>
    %cst_21 = arith.constant dense<0.000000e+00> : vector<8x1024xf32>
    %70 = tpu.matmul %64, %69, %cst_21 {dimension_numbers = #tpu.dot_dimension_numbers<[1], [0], [0], [1], [0, 0, 1, 1], [], []>} : vector<8x128xf32>, vector<128x1024xf32>, vector<8x1024xf32> -> vector<8x1024xf32>
    %71 = arith.addf %68, %70 : vector<8x1024xf32>
    %72 = vector.extract_strided_slice %71 {offsets = [0, 0], sizes = [8, 128], strides = [1, 1]} : vector<8x1024xf32> to vector<8x128xf32>
    %73 = vector.extract_strided_slice %71 {offsets = [0, 128], sizes = [8, 128], strides = [1, 1]} : vector<8x1024xf32> to vector<8x128xf32>
    %74 = vector.extract_strided_slice %71 {offsets = [0, 256], sizes = [8, 128], strides = [1, 1]} : vector<8x1024xf32> to vector<8x128xf32>
    %75 = vector.extract_strided_slice %71 {offsets = [0, 384], sizes = [8, 128], strides = [1, 1]} : vector<8x1024xf32> to vector<8x128xf32>
    %76 = vector.extract_strided_slice %71 {offsets = [0, 512], sizes = [8, 128], strides = [1, 1]} : vector<8x1024xf32> to vector<8x128xf32>
    %77 = vector.extract_strided_slice %71 {offsets = [0, 640], sizes = [8, 128], strides = [1, 1]} : vector<8x1024xf32> to vector<8x128xf32>
    %78 = vector.extract_strided_slice %71 {offsets = [0, 768], sizes = [8, 128], strides = [1, 1]} : vector<8x1024xf32> to vector<8x128xf32>
    %79 = vector.extract_strided_slice %71 {offsets = [0, 896], sizes = [8, 128], strides = [1, 1]} : vector<8x1024xf32> to vector<8x128xf32>
    %80 = arith.negf %72 : vector<8x128xf32>
    %81 = math.exp %80 : vector<8x128xf32>
    %cst_22 = arith.constant 1.000000e+00 : f32
    %82 = vector.broadcast %cst_22 : f32 to vector<8x128xf32>
    %83 = arith.addf %82, %81 : vector<8x128xf32>
    %84 = arith.divf %82, %83 : vector<8x128xf32>
    %cst_23 = arith.constant 0.000000e+00 : f32
    %85 = vector.broadcast %cst_23 : f32 to vector<8x128xf32>
    %86 = arith.maximumf %73, %85 : vector<8x128xf32>
    %87 = arith.negf %74 : vector<8x128xf32>
    %88 = math.exp %87 : vector<8x128xf32>
    %cst_24 = arith.constant 1.000000e+00 : f32
    %89 = vector.broadcast %cst_24 : f32 to vector<8x128xf32>
    %90 = arith.addf %89, %88 : vector<8x128xf32>
    %91 = arith.divf %89, %90 : vector<8x128xf32>
    %cst_25 = arith.constant 0.000000e+00 : f32
    %92 = vector.broadcast %cst_25 : f32 to vector<8x128xf32>
    %93 = arith.maximumf %75, %92 : vector<8x128xf32>
    %94 = math.tanh %76 : vector<8x128xf32>
    %95 = arith.negf %77 : vector<8x128xf32>
    %96 = math.exp %95 : vector<8x128xf32>
    %cst_26 = arith.constant 1.000000e+00 : f32
    %97 = vector.broadcast %cst_26 : f32 to vector<8x128xf32>
    %98 = arith.addf %97, %96 : vector<8x128xf32>
    %99 = arith.divf %97, %98 : vector<8x128xf32>
    %100 = math.tanh %78 : vector<8x128xf32>
    %101 = arith.negf %79 : vector<8x128xf32>
    %102 = math.exp %101 : vector<8x128xf32>
    %cst_27 = arith.constant 1.000000e+00 : f32
    %103 = vector.broadcast %cst_27 : f32 to vector<8x128xf32>
    %104 = arith.addf %103, %102 : vector<8x128xf32>
    %105 = arith.divf %103, %104 : vector<8x128xf32>
    %106 = arith.mulf %84, %86 : vector<8x128xf32>
    %107 = math.tanh %106 : vector<8x128xf32>
    %108 = arith.addf %91, %93 : vector<8x128xf32>
    %109 = math.tanh %108 : vector<8x128xf32>
    %110 = arith.mulf %94, %99 : vector<8x128xf32>
    %111 = math.tanh %110 : vector<8x128xf32>
    %112 = arith.addf %100, %105 : vector<8x128xf32>
    %113 = arith.negf %112 : vector<8x128xf32>
    %114 = math.exp %113 : vector<8x128xf32>
    %cst_28 = arith.constant 1.000000e+00 : f32
    %115 = vector.broadcast %cst_28 : f32 to vector<8x128xf32>
    %116 = arith.addf %115, %114 : vector<8x128xf32>
    %117 = arith.divf %115, %116 : vector<8x128xf32>
    %118 = arith.addf %107, %60 : vector<8x128xf32>
    %119 = math.tanh %118 : vector<8x128xf32>
    %120 = arith.mulf %119, %109 : vector<8x128xf32>
    %121 = arith.addf %111, %117 : vector<8x128xf32>
    %122 = math.tanh %121 : vector<8x128xf32>
    %123 = arith.mulf %120, %122 : vector<8x128xf32>
    %124 = math.tanh %123 : vector<8x128xf32>
    %c2_i32 = arith.constant 2 : i32
    %c8_i32_29 = arith.constant 8 : i32
    %125 = arith.muli %c2_i32, %c8_i32_29 : i32
    %126 = tpu.assume_multiple %125, 8 : i32
    %127 = arith.index_cast %126 : i32 to index
    %c0_30 = arith.constant 0 : index
    %128 = vector.load %arg4[%127, %c0_30] : memref<64x1024xf32, #tpu.memory_space<vmem>>, vector<8x1024xf32>
    %c0_31 = arith.constant 0 : index
    %c0_32 = arith.constant 0 : index
    %129 = vector.load %arg2[%c0_31, %c0_32] : memref<128x1024xf32, #tpu.memory_space<vmem>>, vector<128x1024xf32>
    %cst_33 = arith.constant dense<0.000000e+00> : vector<8x1024xf32>
    %130 = tpu.matmul %124, %129, %cst_33 {dimension_numbers = #tpu.dot_dimension_numbers<[1], [0], [0], [1], [0, 0, 1, 1], [], []>} : vector<8x128xf32>, vector<128x1024xf32>, vector<8x1024xf32> -> vector<8x1024xf32>
    %131 = arith.addf %128, %130 : vector<8x1024xf32>
    %132 = vector.extract_strided_slice %131 {offsets = [0, 0], sizes = [8, 128], strides = [1, 1]} : vector<8x1024xf32> to vector<8x128xf32>
    %133 = vector.extract_strided_slice %131 {offsets = [0, 128], sizes = [8, 128], strides = [1, 1]} : vector<8x1024xf32> to vector<8x128xf32>
    %134 = vector.extract_strided_slice %131 {offsets = [0, 256], sizes = [8, 128], strides = [1, 1]} : vector<8x1024xf32> to vector<8x128xf32>
    %135 = vector.extract_strided_slice %131 {offsets = [0, 384], sizes = [8, 128], strides = [1, 1]} : vector<8x1024xf32> to vector<8x128xf32>
    %136 = vector.extract_strided_slice %131 {offsets = [0, 512], sizes = [8, 128], strides = [1, 1]} : vector<8x1024xf32> to vector<8x128xf32>
    %137 = vector.extract_strided_slice %131 {offsets = [0, 640], sizes = [8, 128], strides = [1, 1]} : vector<8x1024xf32> to vector<8x128xf32>
    %138 = vector.extract_strided_slice %131 {offsets = [0, 768], sizes = [8, 128], strides = [1, 1]} : vector<8x1024xf32> to vector<8x128xf32>
    %139 = vector.extract_strided_slice %131 {offsets = [0, 896], sizes = [8, 128], strides = [1, 1]} : vector<8x1024xf32> to vector<8x128xf32>
    %140 = arith.negf %132 : vector<8x128xf32>
    %141 = math.exp %140 : vector<8x128xf32>
    %cst_34 = arith.constant 1.000000e+00 : f32
    %142 = vector.broadcast %cst_34 : f32 to vector<8x128xf32>
    %143 = arith.addf %142, %141 : vector<8x128xf32>
    %144 = arith.divf %142, %143 : vector<8x128xf32>
    %cst_35 = arith.constant 0.000000e+00 : f32
    %145 = vector.broadcast %cst_35 : f32 to vector<8x128xf32>
    %146 = arith.maximumf %133, %145 : vector<8x128xf32>
    %147 = arith.negf %134 : vector<8x128xf32>
    %148 = math.exp %147 : vector<8x128xf32>
    %cst_36 = arith.constant 1.000000e+00 : f32
    %149 = vector.broadcast %cst_36 : f32 to vector<8x128xf32>
    %150 = arith.addf %149, %148 : vector<8x128xf32>
    %151 = arith.divf %149, %150 : vector<8x128xf32>
    %cst_37 = arith.constant 0.000000e+00 : f32
    %152 = vector.broadcast %cst_37 : f32 to vector<8x128xf32>
    %153 = arith.maximumf %135, %152 : vector<8x128xf32>
    %154 = math.tanh %136 : vector<8x128xf32>
    %155 = arith.negf %137 : vector<8x128xf32>
    %156 = math.exp %155 : vector<8x128xf32>
    %cst_38 = arith.constant 1.000000e+00 : f32
    %157 = vector.broadcast %cst_38 : f32 to vector<8x128xf32>
    %158 = arith.addf %157, %156 : vector<8x128xf32>
    %159 = arith.divf %157, %158 : vector<8x128xf32>
    %160 = math.tanh %138 : vector<8x128xf32>
    %161 = arith.negf %139 : vector<8x128xf32>
    %162 = math.exp %161 : vector<8x128xf32>
    %cst_39 = arith.constant 1.000000e+00 : f32
    %163 = vector.broadcast %cst_39 : f32 to vector<8x128xf32>
    %164 = arith.addf %163, %162 : vector<8x128xf32>
    %165 = arith.divf %163, %164 : vector<8x128xf32>
    %166 = arith.mulf %144, %146 : vector<8x128xf32>
    %167 = math.tanh %166 : vector<8x128xf32>
    %168 = arith.addf %151, %153 : vector<8x128xf32>
    %169 = math.tanh %168 : vector<8x128xf32>
    %170 = arith.mulf %154, %159 : vector<8x128xf32>
    %171 = math.tanh %170 : vector<8x128xf32>
    %172 = arith.addf %160, %165 : vector<8x128xf32>
    %173 = arith.negf %172 : vector<8x128xf32>
    %174 = math.exp %173 : vector<8x128xf32>
    %cst_40 = arith.constant 1.000000e+00 : f32
    %175 = vector.broadcast %cst_40 : f32 to vector<8x128xf32>
    %176 = arith.addf %175, %174 : vector<8x128xf32>
    %177 = arith.divf %175, %176 : vector<8x128xf32>
    %178 = arith.addf %167, %120 : vector<8x128xf32>
    %179 = math.tanh %178 : vector<8x128xf32>
    %180 = arith.mulf %179, %169 : vector<8x128xf32>
    %181 = arith.addf %171, %177 : vector<8x128xf32>
    %182 = math.tanh %181 : vector<8x128xf32>
    %183 = arith.mulf %180, %182 : vector<8x128xf32>
    %184 = math.tanh %183 : vector<8x128xf32>
    %c3_i32 = arith.constant 3 : i32
    %c8_i32_41 = arith.constant 8 : i32
    %185 = arith.muli %c3_i32, %c8_i32_41 : i32
    %186 = tpu.assume_multiple %185, 8 : i32
    %187 = arith.index_cast %186 : i32 to index
    %c0_42 = arith.constant 0 : index
    %188 = vector.load %arg4[%187, %c0_42] : memref<64x1024xf32, #tpu.memory_space<vmem>>, vector<8x1024xf32>
    %c0_43 = arith.constant 0 : index
    %c0_44 = arith.constant 0 : index
    %189 = vector.load %arg2[%c0_43, %c0_44] : memref<128x1024xf32, #tpu.memory_space<vmem>>, vector<128x1024xf32>
    %cst_45 = arith.constant dense<0.000000e+00> : vector<8x1024xf32>
    %190 = tpu.matmul %184, %189, %cst_45 {dimension_numbers = #tpu.dot_dimension_numbers<[1], [0], [0], [1], [0, 0, 1, 1], [], []>} : vector<8x128xf32>, vector<128x1024xf32>, vector<8x1024xf32> -> vector<8x1024xf32>
    %191 = arith.addf %188, %190 : vector<8x1024xf32>
    %192 = vector.extract_strided_slice %191 {offsets = [0, 0], sizes = [8, 128], strides = [1, 1]} : vector<8x1024xf32> to vector<8x128xf32>
    %193 = vector.extract_strided_slice %191 {offsets = [0, 128], sizes = [8, 128], strides = [1, 1]} : vector<8x1024xf32> to vector<8x128xf32>
    %194 = vector.extract_strided_slice %191 {offsets = [0, 256], sizes = [8, 128], strides = [1, 1]} : vector<8x1024xf32> to vector<8x128xf32>
    %195 = vector.extract_strided_slice %191 {offsets = [0, 384], sizes = [8, 128], strides = [1, 1]} : vector<8x1024xf32> to vector<8x128xf32>
    %196 = vector.extract_strided_slice %191 {offsets = [0, 512], sizes = [8, 128], strides = [1, 1]} : vector<8x1024xf32> to vector<8x128xf32>
    %197 = vector.extract_strided_slice %191 {offsets = [0, 640], sizes = [8, 128], strides = [1, 1]} : vector<8x1024xf32> to vector<8x128xf32>
    %198 = vector.extract_strided_slice %191 {offsets = [0, 768], sizes = [8, 128], strides = [1, 1]} : vector<8x1024xf32> to vector<8x128xf32>
    %199 = vector.extract_strided_slice %191 {offsets = [0, 896], sizes = [8, 128], strides = [1, 1]} : vector<8x1024xf32> to vector<8x128xf32>
    %200 = arith.negf %192 : vector<8x128xf32>
    %201 = math.exp %200 : vector<8x128xf32>
    %cst_46 = arith.constant 1.000000e+00 : f32
    %202 = vector.broadcast %cst_46 : f32 to vector<8x128xf32>
    %203 = arith.addf %202, %201 : vector<8x128xf32>
    %204 = arith.divf %202, %203 : vector<8x128xf32>
    %cst_47 = arith.constant 0.000000e+00 : f32
    %205 = vector.broadcast %cst_47 : f32 to vector<8x128xf32>
    %206 = arith.maximumf %193, %205 : vector<8x128xf32>
    %207 = arith.negf %194 : vector<8x128xf32>
    %208 = math.exp %207 : vector<8x128xf32>
    %cst_48 = arith.constant 1.000000e+00 : f32
    %209 = vector.broadcast %cst_48 : f32 to vector<8x128xf32>
    %210 = arith.addf %209, %208 : vector<8x128xf32>
    %211 = arith.divf %209, %210 : vector<8x128xf32>
    %cst_49 = arith.constant 0.000000e+00 : f32
    %212 = vector.broadcast %cst_49 : f32 to vector<8x128xf32>
    %213 = arith.maximumf %195, %212 : vector<8x128xf32>
    %214 = math.tanh %196 : vector<8x128xf32>
    %215 = arith.negf %197 : vector<8x128xf32>
    %216 = math.exp %215 : vector<8x128xf32>
    %cst_50 = arith.constant 1.000000e+00 : f32
    %217 = vector.broadcast %cst_50 : f32 to vector<8x128xf32>
    %218 = arith.addf %217, %216 : vector<8x128xf32>
    %219 = arith.divf %217, %218 : vector<8x128xf32>
    %220 = math.tanh %198 : vector<8x128xf32>
    %221 = arith.negf %199 : vector<8x128xf32>
    %222 = math.exp %221 : vector<8x128xf32>
    %cst_51 = arith.constant 1.000000e+00 : f32
    %223 = vector.broadcast %cst_51 : f32 to vector<8x128xf32>
    %224 = arith.addf %223, %222 : vector<8x128xf32>
    %225 = arith.divf %223, %224 : vector<8x128xf32>
    %226 = arith.mulf %204, %206 : vector<8x128xf32>
    %227 = math.tanh %226 : vector<8x128xf32>
    %228 = arith.addf %211, %213 : vector<8x128xf32>
    %229 = math.tanh %228 : vector<8x128xf32>
    %230 = arith.mulf %214, %219 : vector<8x128xf32>
    %231 = math.tanh %230 : vector<8x128xf32>
    %232 = arith.addf %220, %225 : vector<8x128xf32>
    %233 = arith.negf %232 : vector<8x128xf32>
    %234 = math.exp %233 : vector<8x128xf32>
    %cst_52 = arith.constant 1.000000e+00 : f32
    %235 = vector.broadcast %cst_52 : f32 to vector<8x128xf32>
    %236 = arith.addf %235, %234 : vector<8x128xf32>
    %237 = arith.divf %235, %236 : vector<8x128xf32>
    %238 = arith.addf %227, %180 : vector<8x128xf32>
    %239 = math.tanh %238 : vector<8x128xf32>
    %240 = arith.mulf %239, %229 : vector<8x128xf32>
    %241 = arith.addf %231, %237 : vector<8x128xf32>
    %242 = math.tanh %241 : vector<8x128xf32>
    %243 = arith.mulf %240, %242 : vector<8x128xf32>
    %244 = math.tanh %243 : vector<8x128xf32>
    %c4_i32 = arith.constant 4 : i32
    %c8_i32_53 = arith.constant 8 : i32
    %245 = arith.muli %c4_i32, %c8_i32_53 : i32
    %246 = tpu.assume_multiple %245, 8 : i32
    %247 = arith.index_cast %246 : i32 to index
    %c0_54 = arith.constant 0 : index
    %248 = vector.load %arg4[%247, %c0_54] : memref<64x1024xf32, #tpu.memory_space<vmem>>, vector<8x1024xf32>
    %c0_55 = arith.constant 0 : index
    %c0_56 = arith.constant 0 : index
    %249 = vector.load %arg2[%c0_55, %c0_56] : memref<128x1024xf32, #tpu.memory_space<vmem>>, vector<128x1024xf32>
    %cst_57 = arith.constant dense<0.000000e+00> : vector<8x1024xf32>
    %250 = tpu.matmul %244, %249, %cst_57 {dimension_numbers = #tpu.dot_dimension_numbers<[1], [0], [0], [1], [0, 0, 1, 1], [], []>} : vector<8x128xf32>, vector<128x1024xf32>, vector<8x1024xf32> -> vector<8x1024xf32>
    %251 = arith.addf %248, %250 : vector<8x1024xf32>
    %252 = vector.extract_strided_slice %251 {offsets = [0, 0], sizes = [8, 128], strides = [1, 1]} : vector<8x1024xf32> to vector<8x128xf32>
    %253 = vector.extract_strided_slice %251 {offsets = [0, 128], sizes = [8, 128], strides = [1, 1]} : vector<8x1024xf32> to vector<8x128xf32>
    %254 = vector.extract_strided_slice %251 {offsets = [0, 256], sizes = [8, 128], strides = [1, 1]} : vector<8x1024xf32> to vector<8x128xf32>
    %255 = vector.extract_strided_slice %251 {offsets = [0, 384], sizes = [8, 128], strides = [1, 1]} : vector<8x1024xf32> to vector<8x128xf32>
    %256 = vector.extract_strided_slice %251 {offsets = [0, 512], sizes = [8, 128], strides = [1, 1]} : vector<8x1024xf32> to vector<8x128xf32>
    %257 = vector.extract_strided_slice %251 {offsets = [0, 640], sizes = [8, 128], strides = [1, 1]} : vector<8x1024xf32> to vector<8x128xf32>
    %258 = vector.extract_strided_slice %251 {offsets = [0, 768], sizes = [8, 128], strides = [1, 1]} : vector<8x1024xf32> to vector<8x128xf32>
    %259 = vector.extract_strided_slice %251 {offsets = [0, 896], sizes = [8, 128], strides = [1, 1]} : vector<8x1024xf32> to vector<8x128xf32>
    %260 = arith.negf %252 : vector<8x128xf32>
    %261 = math.exp %260 : vector<8x128xf32>
    %cst_58 = arith.constant 1.000000e+00 : f32
    %262 = vector.broadcast %cst_58 : f32 to vector<8x128xf32>
    %263 = arith.addf %262, %261 : vector<8x128xf32>
    %264 = arith.divf %262, %263 : vector<8x128xf32>
    %cst_59 = arith.constant 0.000000e+00 : f32
    %265 = vector.broadcast %cst_59 : f32 to vector<8x128xf32>
    %266 = arith.maximumf %253, %265 : vector<8x128xf32>
    %267 = arith.negf %254 : vector<8x128xf32>
    %268 = math.exp %267 : vector<8x128xf32>
    %cst_60 = arith.constant 1.000000e+00 : f32
    %269 = vector.broadcast %cst_60 : f32 to vector<8x128xf32>
    %270 = arith.addf %269, %268 : vector<8x128xf32>
    %271 = arith.divf %269, %270 : vector<8x128xf32>
    %cst_61 = arith.constant 0.000000e+00 : f32
    %272 = vector.broadcast %cst_61 : f32 to vector<8x128xf32>
    %273 = arith.maximumf %255, %272 : vector<8x128xf32>
    %274 = math.tanh %256 : vector<8x128xf32>
    %275 = arith.negf %257 : vector<8x128xf32>
    %276 = math.exp %275 : vector<8x128xf32>
    %cst_62 = arith.constant 1.000000e+00 : f32
    %277 = vector.broadcast %cst_62 : f32 to vector<8x128xf32>
    %278 = arith.addf %277, %276 : vector<8x128xf32>
    %279 = arith.divf %277, %278 : vector<8x128xf32>
    %280 = math.tanh %258 : vector<8x128xf32>
    %281 = arith.negf %259 : vector<8x128xf32>
    %282 = math.exp %281 : vector<8x128xf32>
    %cst_63 = arith.constant 1.000000e+00 : f32
    %283 = vector.broadcast %cst_63 : f32 to vector<8x128xf32>
    %284 = arith.addf %283, %282 : vector<8x128xf32>
    %285 = arith.divf %283, %284 : vector<8x128xf32>
    %286 = arith.mulf %264, %266 : vector<8x128xf32>
    %287 = math.tanh %286 : vector<8x128xf32>
    %288 = arith.addf %271, %273 : vector<8x128xf32>
    %289 = math.tanh %288 : vector<8x128xf32>
    %290 = arith.mulf %274, %279 : vector<8x128xf32>
    %291 = math.tanh %290 : vector<8x128xf32>
    %292 = arith.addf %280, %285 : vector<8x128xf32>
    %293 = arith.negf %292 : vector<8x128xf32>
    %294 = math.exp %293 : vector<8x128xf32>
    %cst_64 = arith.constant 1.000000e+00 : f32
    %295 = vector.broadcast %cst_64 : f32 to vector<8x128xf32>
    %296 = arith.addf %295, %294 : vector<8x128xf32>
    %297 = arith.divf %295, %296 : vector<8x128xf32>
    %298 = arith.addf %287, %240 : vector<8x128xf32>
    %299 = math.tanh %298 : vector<8x128xf32>
    %300 = arith.mulf %299, %289 : vector<8x128xf32>
    %301 = arith.addf %291, %297 : vector<8x128xf32>
    %302 = math.tanh %301 : vector<8x128xf32>
    %303 = arith.mulf %300, %302 : vector<8x128xf32>
    %304 = math.tanh %303 : vector<8x128xf32>
    %c5_i32 = arith.constant 5 : i32
    %c8_i32_65 = arith.constant 8 : i32
    %305 = arith.muli %c5_i32, %c8_i32_65 : i32
    %306 = tpu.assume_multiple %305, 8 : i32
    %307 = arith.index_cast %306 : i32 to index
    %c0_66 = arith.constant 0 : index
    %308 = vector.load %arg4[%307, %c0_66] : memref<64x1024xf32, #tpu.memory_space<vmem>>, vector<8x1024xf32>
    %c0_67 = arith.constant 0 : index
    %c0_68 = arith.constant 0 : index
    %309 = vector.load %arg2[%c0_67, %c0_68] : memref<128x1024xf32, #tpu.memory_space<vmem>>, vector<128x1024xf32>
    %cst_69 = arith.constant dense<0.000000e+00> : vector<8x1024xf32>
    %310 = tpu.matmul %304, %309, %cst_69 {dimension_numbers = #tpu.dot_dimension_numbers<[1], [0], [0], [1], [0, 0, 1, 1], [], []>} : vector<8x128xf32>, vector<128x1024xf32>, vector<8x1024xf32> -> vector<8x1024xf32>
    %311 = arith.addf %308, %310 : vector<8x1024xf32>
    %312 = vector.extract_strided_slice %311 {offsets = [0, 0], sizes = [8, 128], strides = [1, 1]} : vector<8x1024xf32> to vector<8x128xf32>
    %313 = vector.extract_strided_slice %311 {offsets = [0, 128], sizes = [8, 128], strides = [1, 1]} : vector<8x1024xf32> to vector<8x128xf32>
    %314 = vector.extract_strided_slice %311 {offsets = [0, 256], sizes = [8, 128], strides = [1, 1]} : vector<8x1024xf32> to vector<8x128xf32>
    %315 = vector.extract_strided_slice %311 {offsets = [0, 384], sizes = [8, 128], strides = [1, 1]} : vector<8x1024xf32> to vector<8x128xf32>
    %316 = vector.extract_strided_slice %311 {offsets = [0, 512], sizes = [8, 128], strides = [1, 1]} : vector<8x1024xf32> to vector<8x128xf32>
    %317 = vector.extract_strided_slice %311 {offsets = [0, 640], sizes = [8, 128], strides = [1, 1]} : vector<8x1024xf32> to vector<8x128xf32>
    %318 = vector.extract_strided_slice %311 {offsets = [0, 768], sizes = [8, 128], strides = [1, 1]} : vector<8x1024xf32> to vector<8x128xf32>
    %319 = vector.extract_strided_slice %311 {offsets = [0, 896], sizes = [8, 128], strides = [1, 1]} : vector<8x1024xf32> to vector<8x128xf32>
    %320 = arith.negf %312 : vector<8x128xf32>
    %321 = math.exp %320 : vector<8x128xf32>
    %cst_70 = arith.constant 1.000000e+00 : f32
    %322 = vector.broadcast %cst_70 : f32 to vector<8x128xf32>
    %323 = arith.addf %322, %321 : vector<8x128xf32>
    %324 = arith.divf %322, %323 : vector<8x128xf32>
    %cst_71 = arith.constant 0.000000e+00 : f32
    %325 = vector.broadcast %cst_71 : f32 to vector<8x128xf32>
    %326 = arith.maximumf %313, %325 : vector<8x128xf32>
    %327 = arith.negf %314 : vector<8x128xf32>
    %328 = math.exp %327 : vector<8x128xf32>
    %cst_72 = arith.constant 1.000000e+00 : f32
    %329 = vector.broadcast %cst_72 : f32 to vector<8x128xf32>
    %330 = arith.addf %329, %328 : vector<8x128xf32>
    %331 = arith.divf %329, %330 : vector<8x128xf32>
    %cst_73 = arith.constant 0.000000e+00 : f32
    %332 = vector.broadcast %cst_73 : f32 to vector<8x128xf32>
    %333 = arith.maximumf %315, %332 : vector<8x128xf32>
    %334 = math.tanh %316 : vector<8x128xf32>
    %335 = arith.negf %317 : vector<8x128xf32>
    %336 = math.exp %335 : vector<8x128xf32>
    %cst_74 = arith.constant 1.000000e+00 : f32
    %337 = vector.broadcast %cst_74 : f32 to vector<8x128xf32>
    %338 = arith.addf %337, %336 : vector<8x128xf32>
    %339 = arith.divf %337, %338 : vector<8x128xf32>
    %340 = math.tanh %318 : vector<8x128xf32>
    %341 = arith.negf %319 : vector<8x128xf32>
    %342 = math.exp %341 : vector<8x128xf32>
    %cst_75 = arith.constant 1.000000e+00 : f32
    %343 = vector.broadcast %cst_75 : f32 to vector<8x128xf32>
    %344 = arith.addf %343, %342 : vector<8x128xf32>
    %345 = arith.divf %343, %344 : vector<8x128xf32>
    %346 = arith.mulf %324, %326 : vector<8x128xf32>
    %347 = math.tanh %346 : vector<8x128xf32>
    %348 = arith.addf %331, %333 : vector<8x128xf32>
    %349 = math.tanh %348 : vector<8x128xf32>
    %350 = arith.mulf %334, %339 : vector<8x128xf32>
    %351 = math.tanh %350 : vector<8x128xf32>
    %352 = arith.addf %340, %345 : vector<8x128xf32>
    %353 = arith.negf %352 : vector<8x128xf32>
    %354 = math.exp %353 : vector<8x128xf32>
    %cst_76 = arith.constant 1.000000e+00 : f32
    %355 = vector.broadcast %cst_76 : f32 to vector<8x128xf32>
    %356 = arith.addf %355, %354 : vector<8x128xf32>
    %357 = arith.divf %355, %356 : vector<8x128xf32>
    %358 = arith.addf %347, %300 : vector<8x128xf32>
    %359 = math.tanh %358 : vector<8x128xf32>
    %360 = arith.mulf %359, %349 : vector<8x128xf32>
    %361 = arith.addf %351, %357 : vector<8x128xf32>
    %362 = math.tanh %361 : vector<8x128xf32>
    %363 = arith.mulf %360, %362 : vector<8x128xf32>
    %364 = math.tanh %363 : vector<8x128xf32>
    %c6_i32 = arith.constant 6 : i32
    %c8_i32_77 = arith.constant 8 : i32
    %365 = arith.muli %c6_i32, %c8_i32_77 : i32
    %366 = tpu.assume_multiple %365, 8 : i32
    %367 = arith.index_cast %366 : i32 to index
    %c0_78 = arith.constant 0 : index
    %368 = vector.load %arg4[%367, %c0_78] : memref<64x1024xf32, #tpu.memory_space<vmem>>, vector<8x1024xf32>
    %c0_79 = arith.constant 0 : index
    %c0_80 = arith.constant 0 : index
    %369 = vector.load %arg2[%c0_79, %c0_80] : memref<128x1024xf32, #tpu.memory_space<vmem>>, vector<128x1024xf32>
    %cst_81 = arith.constant dense<0.000000e+00> : vector<8x1024xf32>
    %370 = tpu.matmul %364, %369, %cst_81 {dimension_numbers = #tpu.dot_dimension_numbers<[1], [0], [0], [1], [0, 0, 1, 1], [], []>} : vector<8x128xf32>, vector<128x1024xf32>, vector<8x1024xf32> -> vector<8x1024xf32>
    %371 = arith.addf %368, %370 : vector<8x1024xf32>
    %372 = vector.extract_strided_slice %371 {offsets = [0, 0], sizes = [8, 128], strides = [1, 1]} : vector<8x1024xf32> to vector<8x128xf32>
    %373 = vector.extract_strided_slice %371 {offsets = [0, 128], sizes = [8, 128], strides = [1, 1]} : vector<8x1024xf32> to vector<8x128xf32>
    %374 = vector.extract_strided_slice %371 {offsets = [0, 256], sizes = [8, 128], strides = [1, 1]} : vector<8x1024xf32> to vector<8x128xf32>
    %375 = vector.extract_strided_slice %371 {offsets = [0, 384], sizes = [8, 128], strides = [1, 1]} : vector<8x1024xf32> to vector<8x128xf32>
    %376 = vector.extract_strided_slice %371 {offsets = [0, 512], sizes = [8, 128], strides = [1, 1]} : vector<8x1024xf32> to vector<8x128xf32>
    %377 = vector.extract_strided_slice %371 {offsets = [0, 640], sizes = [8, 128], strides = [1, 1]} : vector<8x1024xf32> to vector<8x128xf32>
    %378 = vector.extract_strided_slice %371 {offsets = [0, 768], sizes = [8, 128], strides = [1, 1]} : vector<8x1024xf32> to vector<8x128xf32>
    %379 = vector.extract_strided_slice %371 {offsets = [0, 896], sizes = [8, 128], strides = [1, 1]} : vector<8x1024xf32> to vector<8x128xf32>
    %380 = arith.negf %372 : vector<8x128xf32>
    %381 = math.exp %380 : vector<8x128xf32>
    %cst_82 = arith.constant 1.000000e+00 : f32
    %382 = vector.broadcast %cst_82 : f32 to vector<8x128xf32>
    %383 = arith.addf %382, %381 : vector<8x128xf32>
    %384 = arith.divf %382, %383 : vector<8x128xf32>
    %cst_83 = arith.constant 0.000000e+00 : f32
    %385 = vector.broadcast %cst_83 : f32 to vector<8x128xf32>
    %386 = arith.maximumf %373, %385 : vector<8x128xf32>
    %387 = arith.negf %374 : vector<8x128xf32>
    %388 = math.exp %387 : vector<8x128xf32>
    %cst_84 = arith.constant 1.000000e+00 : f32
    %389 = vector.broadcast %cst_84 : f32 to vector<8x128xf32>
    %390 = arith.addf %389, %388 : vector<8x128xf32>
    %391 = arith.divf %389, %390 : vector<8x128xf32>
    %cst_85 = arith.constant 0.000000e+00 : f32
    %392 = vector.broadcast %cst_85 : f32 to vector<8x128xf32>
    %393 = arith.maximumf %375, %392 : vector<8x128xf32>
    %394 = math.tanh %376 : vector<8x128xf32>
    %395 = arith.negf %377 : vector<8x128xf32>
    %396 = math.exp %395 : vector<8x128xf32>
    %cst_86 = arith.constant 1.000000e+00 : f32
    %397 = vector.broadcast %cst_86 : f32 to vector<8x128xf32>
    %398 = arith.addf %397, %396 : vector<8x128xf32>
    %399 = arith.divf %397, %398 : vector<8x128xf32>
    %400 = math.tanh %378 : vector<8x128xf32>
    %401 = arith.negf %379 : vector<8x128xf32>
    %402 = math.exp %401 : vector<8x128xf32>
    %cst_87 = arith.constant 1.000000e+00 : f32
    %403 = vector.broadcast %cst_87 : f32 to vector<8x128xf32>
    %404 = arith.addf %403, %402 : vector<8x128xf32>
    %405 = arith.divf %403, %404 : vector<8x128xf32>
    %406 = arith.mulf %384, %386 : vector<8x128xf32>
    %407 = math.tanh %406 : vector<8x128xf32>
    %408 = arith.addf %391, %393 : vector<8x128xf32>
    %409 = math.tanh %408 : vector<8x128xf32>
    %410 = arith.mulf %394, %399 : vector<8x128xf32>
    %411 = math.tanh %410 : vector<8x128xf32>
    %412 = arith.addf %400, %405 : vector<8x128xf32>
    %413 = arith.negf %412 : vector<8x128xf32>
    %414 = math.exp %413 : vector<8x128xf32>
    %cst_88 = arith.constant 1.000000e+00 : f32
    %415 = vector.broadcast %cst_88 : f32 to vector<8x128xf32>
    %416 = arith.addf %415, %414 : vector<8x128xf32>
    %417 = arith.divf %415, %416 : vector<8x128xf32>
    %418 = arith.addf %407, %360 : vector<8x128xf32>
    %419 = math.tanh %418 : vector<8x128xf32>
    %420 = arith.mulf %419, %409 : vector<8x128xf32>
    %421 = arith.addf %411, %417 : vector<8x128xf32>
    %422 = math.tanh %421 : vector<8x128xf32>
    %423 = arith.mulf %420, %422 : vector<8x128xf32>
    %424 = math.tanh %423 : vector<8x128xf32>
    %c7_i32 = arith.constant 7 : i32
    %c8_i32_89 = arith.constant 8 : i32
    %425 = arith.muli %c7_i32, %c8_i32_89 : i32
    %426 = tpu.assume_multiple %425, 8 : i32
    %427 = arith.index_cast %426 : i32 to index
    %c0_90 = arith.constant 0 : index
    %428 = vector.load %arg4[%427, %c0_90] : memref<64x1024xf32, #tpu.memory_space<vmem>>, vector<8x1024xf32>
    %c0_91 = arith.constant 0 : index
    %c0_92 = arith.constant 0 : index
    %429 = vector.load %arg2[%c0_91, %c0_92] : memref<128x1024xf32, #tpu.memory_space<vmem>>, vector<128x1024xf32>
    %cst_93 = arith.constant dense<0.000000e+00> : vector<8x1024xf32>
    %430 = tpu.matmul %424, %429, %cst_93 {dimension_numbers = #tpu.dot_dimension_numbers<[1], [0], [0], [1], [0, 0, 1, 1], [], []>} : vector<8x128xf32>, vector<128x1024xf32>, vector<8x1024xf32> -> vector<8x1024xf32>
    %431 = arith.addf %428, %430 : vector<8x1024xf32>
    %432 = vector.extract_strided_slice %431 {offsets = [0, 0], sizes = [8, 128], strides = [1, 1]} : vector<8x1024xf32> to vector<8x128xf32>
    %433 = vector.extract_strided_slice %431 {offsets = [0, 128], sizes = [8, 128], strides = [1, 1]} : vector<8x1024xf32> to vector<8x128xf32>
    %434 = vector.extract_strided_slice %431 {offsets = [0, 256], sizes = [8, 128], strides = [1, 1]} : vector<8x1024xf32> to vector<8x128xf32>
    %435 = vector.extract_strided_slice %431 {offsets = [0, 384], sizes = [8, 128], strides = [1, 1]} : vector<8x1024xf32> to vector<8x128xf32>
    %436 = vector.extract_strided_slice %431 {offsets = [0, 512], sizes = [8, 128], strides = [1, 1]} : vector<8x1024xf32> to vector<8x128xf32>
    %437 = vector.extract_strided_slice %431 {offsets = [0, 640], sizes = [8, 128], strides = [1, 1]} : vector<8x1024xf32> to vector<8x128xf32>
    %438 = vector.extract_strided_slice %431 {offsets = [0, 768], sizes = [8, 128], strides = [1, 1]} : vector<8x1024xf32> to vector<8x128xf32>
    %439 = vector.extract_strided_slice %431 {offsets = [0, 896], sizes = [8, 128], strides = [1, 1]} : vector<8x1024xf32> to vector<8x128xf32>
    %440 = arith.negf %432 : vector<8x128xf32>
    %441 = math.exp %440 : vector<8x128xf32>
    %cst_94 = arith.constant 1.000000e+00 : f32
    %442 = vector.broadcast %cst_94 : f32 to vector<8x128xf32>
    %443 = arith.addf %442, %441 : vector<8x128xf32>
    %444 = arith.divf %442, %443 : vector<8x128xf32>
    %cst_95 = arith.constant 0.000000e+00 : f32
    %445 = vector.broadcast %cst_95 : f32 to vector<8x128xf32>
    %446 = arith.maximumf %433, %445 : vector<8x128xf32>
    %447 = arith.negf %434 : vector<8x128xf32>
    %448 = math.exp %447 : vector<8x128xf32>
    %cst_96 = arith.constant 1.000000e+00 : f32
    %449 = vector.broadcast %cst_96 : f32 to vector<8x128xf32>
    %450 = arith.addf %449, %448 : vector<8x128xf32>
    %451 = arith.divf %449, %450 : vector<8x128xf32>
    %cst_97 = arith.constant 0.000000e+00 : f32
    %452 = vector.broadcast %cst_97 : f32 to vector<8x128xf32>
    %453 = arith.maximumf %435, %452 : vector<8x128xf32>
    %454 = math.tanh %436 : vector<8x128xf32>
    %455 = arith.negf %437 : vector<8x128xf32>
    %456 = math.exp %455 : vector<8x128xf32>
    %cst_98 = arith.constant 1.000000e+00 : f32
    %457 = vector.broadcast %cst_98 : f32 to vector<8x128xf32>
    %458 = arith.addf %457, %456 : vector<8x128xf32>
    %459 = arith.divf %457, %458 : vector<8x128xf32>
    %460 = math.tanh %438 : vector<8x128xf32>
    %461 = arith.negf %439 : vector<8x128xf32>
    %462 = math.exp %461 : vector<8x128xf32>
    %cst_99 = arith.constant 1.000000e+00 : f32
    %463 = vector.broadcast %cst_99 : f32 to vector<8x128xf32>
    %464 = arith.addf %463, %462 : vector<8x128xf32>
    %465 = arith.divf %463, %464 : vector<8x128xf32>
    %466 = arith.mulf %444, %446 : vector<8x128xf32>
    %467 = math.tanh %466 : vector<8x128xf32>
    %468 = arith.addf %451, %453 : vector<8x128xf32>
    %469 = math.tanh %468 : vector<8x128xf32>
    %470 = arith.mulf %454, %459 : vector<8x128xf32>
    %471 = math.tanh %470 : vector<8x128xf32>
    %472 = arith.addf %460, %465 : vector<8x128xf32>
    %473 = arith.negf %472 : vector<8x128xf32>
    %474 = math.exp %473 : vector<8x128xf32>
    %cst_100 = arith.constant 1.000000e+00 : f32
    %475 = vector.broadcast %cst_100 : f32 to vector<8x128xf32>
    %476 = arith.addf %475, %474 : vector<8x128xf32>
    %477 = arith.divf %475, %476 : vector<8x128xf32>
    %478 = arith.addf %467, %420 : vector<8x128xf32>
    %479 = math.tanh %478 : vector<8x128xf32>
    %480 = arith.mulf %479, %469 : vector<8x128xf32>
    %481 = arith.addf %471, %477 : vector<8x128xf32>
    %482 = math.tanh %481 : vector<8x128xf32>
    %483 = arith.mulf %480, %482 : vector<8x128xf32>
    %484 = math.tanh %483 : vector<8x128xf32>
    %c8_i32_101 = arith.constant 8 : i32
    %485 = arith.addf %480, %484 : vector<8x128xf32>
    %c0_102 = arith.constant 0 : index
    %c0_103 = arith.constant 0 : index
    %486 = vector.load %arg3[%c0_102, %c0_103] : memref<8x128xf32, #tpu.memory_space<vmem>>, vector<8x128xf32>
    tpu.vector_store %arg3[%c0_102, %c0_103], %485 {strides = array<i32>} : memref<8x128xf32, #tpu.memory_space<vmem>>, vector<8x128xf32>,
    return
  }
}

</mosaic_0001>

<bundles_post_ra>
// kernel: tpu_custom_call.1
= control target key start
LH: loop header
LB: loop body
LE: loop exit
PB: predicated region body
PF: predicated region fallthrough
CT: control target
= control target key end

     0   :  { %8 = vsyncpa [#allocation4], 0  ;;  %s6522_s0 = inlined_call_operand.vmem [shape: f32[64,32], index: 0, kind: input, shape index: {}]   ;;  %s6523_s1 = inlined_call_operand.hbm [shape: f32[32,1024], index: 1, kind: input, shape index: {}]   ;;  %s6524_s2 = inlined_call_operand.hbm [shape: f32[128,1024], index: 2, kind: input, shape index: {}]   ;;  %s6525_s3 = inlined_call_operand.hbm [shape: f32[8,128], index: 3, kind: output, shape index: {}]  }
   0x1   :  { %9 = vsyncpa [#allocation7], 0 }
   0x2   :  { %10 = vsyncpa [#allocation5], 0  ;;  %s4273_s12 = smov [#allocation3]  }
   0x3   :  { %s18_s13 = sshll.u32 %s4273_s12, 4  ;;  %s19_s13 = int_to_ptr.vmem [resolvable:$true] %s18_s13 }
   0x4   :  { %s4215_s14 = scalar_lea.vmem %s19_s13, 4096  ;;  %p4220_p1 = scmp.lt.s32.totalorder %s19_s13, %s19_s13 }
   0x5   :  { %p4216_p0 = scmp.ne.s32.totalorder %s19_s13, %s4215_s14  ;;  %p4221_p2 = scmp.lt.s32.totalorder %s4215_s14, %s4215_s14 }
   0x7   :  { %p4222_p3 = por %p4221_p2, %p4220_p1 }
   0x9   :  { %p4223_p4 = pnand %p4222_p3, %p4216_p0 }
   0xb   :  { %4226 = shalt.err (!%p4223_p4)
}
   0xc   :  { %s4274_s15 = smov 1024   ;;  %s4275_s16 = smov 64  }
   0xd   :  { %24 = dma.hbm_to_vmem [thread:$0]  %s6523_s1, 4096, %s19_s13, [#allocation4], %s4274_s15, %s4274_s15, %s4275_s16  }
   0xe   :  { %s4276_s19 = smov [#allocation6]  }
   0xf   :  { %s30_s20 = sshll.u32 %s4276_s19, 4  ;;  %s31_s20 = int_to_ptr.vmem [resolvable:$true] %s30_s20 }
  0x10   :  { %s4235_s21 = scalar_lea.vmem %s31_s20, 16384  ;;  %p4240_p6 = scmp.lt.s32.totalorder %s31_s20, %s31_s20 }
  0x11   :  { %p4236_p5 = scmp.ne.s32.totalorder %s31_s20, %s4235_s21  ;;  %p4241_p7 = scmp.lt.s32.totalorder %s4235_s21, %s4235_s21 }
  0x13   :  { %p4242_p8 = por %p4241_p7, %p4240_p6 }
  0x15   :  { %p4243_p9 = pnand %p4242_p8, %p4236_p5 }
  0x17   :  { %4246 = shalt.err (!%p4243_p9)
}
  0x18   :  { %36 = dma.hbm_to_vmem [thread:$0]  %s6524_s2, 16384, %s31_s20, [#allocation7], %s4274_s15, %s4274_s15, %s4275_s16  }
  0x19   :  { %4267 = dma.done.wait [#allocation4], 4096  }
  0x1a   :  { %4268 = vsyncadd [#allocation4], 4294963200 }
  0x1b   :  { %4269 = dma.done.wait [#allocation7], 16384  }
  0x1c   :  { %4270 = vsyncadd [#allocation7], 4294950912  ;;  %v6528_v0 = vmov 0.0   ;;  %v76_v1 = vld [vmem:[#allocation3 + $0xc8] sm:$0xff]  ;;  %v78_v2 = vld [vmem:[#allocation3 + $0xd8] sm:$0xff]  ;;  %vm83_vm0 = vcmask 261120  }
  0x1d   :  { %172 = vmatprep.mubr.f32.mxu0 %v6528_v0  ;;  %285 = vmatprep.mubr.f32.mxu1 %v6528_v0  ;;  %v75_v3 = vld [vmem:[#allocation3 + $0xc0] sm:$0xff]  ;;  %v77_v4 = vld [vmem:[#allocation3 + $0xd0] sm:$0xff]  ;;  %v68_v5 = vld [vmem:[#allocation3 + $0x88] sm:$0xff] }
  0x1e   :  { %132 = vmatprep.subr.mxu0 %v76_v1  ;;  %245 = vmatprep.subr.mxu1 %v78_v2  ;;  %v70_v6 = vld [vmem:[#allocation3 + $0x98] sm:$0xff]  ;;  %v67_v7 = vld [vmem:[#allocation3 + $0x80] sm:$0xff]  ;;  %v69_v8 = vld [vmem:[#allocation3 + $0x90] sm:$0xff] }
  0x1f   :  { %133 = vmatpush1.msra.mxu0 %v75_v3  ;;  %246 = vmatpush1.msra.mxu1 %v77_v4  ;;  %v60_v9 = vld [vmem:[#allocation3 + $0x48] sm:$0xff]  ;;  %v62_v10 = vld [vmem:[#allocation3 + $0x58] sm:$0xff]  ;;  %v59_v11 = vld [vmem:[#allocation3 + $0x40] sm:$0xff] }
  0x20   :  { %134 = vmatprep.subr.mxu0 %v68_v5  ;;  %247 = vmatprep.subr.mxu1 %v70_v6  ;;  %v61_v12 = vld [vmem:[#allocation3 + $0x50] sm:$0xff]  ;;  %v52_v13 = vld [vmem:[#allocation3 + $0x8] sm:$0xff]  ;;  %v54_v14 = vld [vmem:[#allocation3 + $0x18] sm:$0xff] }
  0x21   :  { %135 = vmatpush1.msra.mxu0 %v67_v7  ;;  %248 = vmatpush1.msra.mxu1 %v69_v8  ;;  %v51_v15 = vld [vmem:[#allocation3] sm:$0xff]  ;;  %v53_v16 = vld [vmem:[#allocation3 + $0x10] sm:$0xff]  ;;  %v82_v18 = vld [vmem:[#allocation3 + $0xf8] sm:$0xff] }
  0x22   :  { %136 = vmatprep.subr.mxu0 %v60_v9  ;;  %249 = vmatprep.subr.mxu1 %v62_v10  ;;  %v4310_v17 = vld [vmem:[%s6522_s0] sm:$0xff]  ;;  %v81_v19 = vld [vmem:[#allocation3 + $0xf0] sm:$0xff]  ;;  %v74_v20 = vld [vmem:[#allocation3 + $0xb8] sm:$0xff] }
  0x23   :  { %137 = vmatpush1.msra.mxu0 %v59_v11  ;;  %250 = vmatpush1.msra.mxu1 %v61_v12  ;;  %v80_v21 = vld [vmem:[#allocation3 + $0xe8] sm:$0xff]  ;;  %v73_v23 = vld [vmem:[#allocation3 + $0xb0] sm:$0xff]  ;;  %v79_v24 = vld [vmem:[#allocation3 + $0xe0] sm:$0xff] }
  0x24   :  { %138 = vmatprep.subr.mxu0 %v52_v13  ;;  %251 = vmatprep.subr.mxu1 %v54_v14  ;;  %v4320_v22 = vld [vmem:[%s6522_s0 + $0x8] sm:$0xff]  ;;  %v66_v25 = vld [vmem:[#allocation3 + $0x78] sm:$0xff]  ;;  %v4332_v27 = vld [vmem:[%s6522_s0 + $0x10] sm:$0xff] }
  0x25   :  { %139 = vmatpush1.msra.mxu0 %v51_v15  ;;  %252 = vmatpush1.msra.mxu1 %v53_v16  ;;  %v72_v26 = vld [vmem:[#allocation3 + $0xa8] sm:$0xff]  ;;  %v65_v28 = vld [vmem:[#allocation3 + $0x70] sm:$0xff]  ;;  %v71_v29 = vld [vmem:[#allocation3 + $0xa0] sm:$0xff] }
  0x26   :  { %3585 = vmatmul.mubr.msk.f32.vlgmr.msra.gmra.mxu0 %vm83_vm0, %v4310_v17  ;;  %3593 = vmatmul.mubr.msk.f32.vlgmr.msra.gmra.mxu1 %vm83_vm0, %v4310_v17  ;;  %v58_v30 = vld [vmem:[#allocation3 + $0x38] sm:$0xff]  ;;  %v64_v31 = vld [vmem:[#allocation3 + $0x68] sm:$0xff]  ;;  %v57_v33 = vld [vmem:[#allocation3 + $0x30] sm:$0xff] }
  0x27   :  { %471 = vmatprep.subr.mxu1 %v82_v18  ;;  %178 = vmatprep.mubr.f32.mxu0 %v6528_v0  ;;  %v4343_v32 = vld [vmem:[%s6522_s0 + $0x18] sm:$0xff]  ;;  %v63_v34 = vld [vmem:[#allocation3 + $0x60] sm:$0xff]  ;;  %v56_v35 = vld [vmem:[#allocation3 + $0x28] sm:$0xff] }
  0x28   :  { %472 = vmatpush1.msra.mxu1 %v81_v19  ;;  %291 = vmatprep.mubr.f32.mxu1 %v6528_v0  ;;  %v4349_v36 = vld [vmem:[#allocation6 + $0x3d8] sm:$0xff]  ;;  %v4356_v37 = vld [vmem:[%s6522_s0 + $0x20] sm:$0xff]  ;;  %v4363_v39 = vld [vmem:[#allocation6 + $0x3c8] sm:$0xff] }
  0x29   :  { %473 = vmatprep.subr.mxu1 %v74_v20  ;;  %358 = vmatprep.subr.mxu0 %v80_v21  ;;  %v55_v38 = vld [vmem:[#allocation3 + $0x20] sm:$0xff]  ;;  %v4370_v40 = vld [vmem:[%s6522_s0 + $0x28] sm:$0xff]  ;;  %v4382_v41 = vld [vmem:[%s6522_s0 + $0x30] sm:$0xff] }
  0x2a   :  { %3586 = vmatmul.mubr.msk.f32.gmra.mxu0 %vm83_vm0, %v4320_v22  ;;  %3594 = vmatmul.mubr.msk.f32.gmra.mxu1 %vm83_vm0, %v4320_v22  ;;  %v4393_v42 = vld [vmem:[%s6522_s0 + $0x38] sm:$0xff]  ;;  %v4401_v43 = vld [vmem:[#allocation6 + $0x3c0] sm:$0xff]  ;;  %v4403_v44 = vld [vmem:[#allocation6 + $0x3d0] sm:$0xff]  ;;  %s4278_s0 = smov [#allocation8]  }
  0x2b   :  { %184 = vmatprep.mubr.f32.mxu0 %v6528_v0  ;;  %297 = vmatprep.mubr.f32.mxu1 %v6528_v0  ;;  %v4405_v45 = vld [vmem:[#allocation6 + $0x388] sm:$0xff]  ;;  %v4407_v46 = vld [vmem:[#allocation6 + $0x398] sm:$0xff]  ;;  %v4413_v47 = vld [vmem:[#allocation6 + $0x380] sm:$0xff]  ;;  %s3568_s11 = sshll.u32 %s4278_s0, 4  ;;  %s3569_s11 = int_to_ptr.vmem [resolvable:$true] %s3568_s11 }
  0x2c   :  { %474 = vmatpush1.msra.mxu1 %v73_v23  ;;  %359 = vmatpush1.msra.mxu0 %v79_v24  ;;  %v4415_v48 = vld [vmem:[#allocation6 + $0x390] sm:$0xff]  ;;  %v4421_v49 = vld [vmem:[#allocation6 + $0x348] sm:$0xff]  ;;  %v4423_v50 = vld [vmem:[#allocation6 + $0x358] sm:$0xff]  ;;  %s4247_s12 = scalar_lea.vmem %s3569_s11, 128  ;;  %p4252_p11 = scmp.lt.s32.totalorder %s3569_s11, %s3569_s11 }
  0x2d   :  { %475 = vmatprep.subr.mxu1 %v66_v25  ;;  %360 = vmatprep.subr.mxu0 %v72_v26  ;;  %v4429_v51 = vld [vmem:[#allocation6 + $0x340] sm:$0xff]  ;;  %v4431_v52 = vld [vmem:[#allocation6 + $0x350] sm:$0xff]  ;;  %v4435_v53 = vld [vmem:[#allocation6 + $0x308] sm:$0xff]  ;;  %p4248_p10 = scmp.ne.s32.totalorder %s3569_s11, %s4247_s12  ;;  %p4253_p12 = scmp.lt.s32.totalorder %s4247_s12, %s4247_s12 }
  0x2e   :  { %3587 = vmatmul.mubr.msk.f32.gmra.mxu0 %vm83_vm0, %v4332_v27  ;;  %3595 = vmatmul.mubr.msk.f32.gmra.mxu1 %vm83_vm0, %v4332_v27  ;;  %v4437_v54 = vld [vmem:[#allocation6 + $0x318] sm:$0xff]  ;;  %v4443_v55 = vld [vmem:[#allocation6 + $0x300] sm:$0xff]  ;;  %v4445_v56 = vld [vmem:[#allocation6 + $0x310] sm:$0xff] }
  0x2f   :  { %190 = vmatprep.mubr.f32.mxu0 %v6528_v0  ;;  %303 = vmatprep.mubr.f32.mxu1 %v6528_v0  ;;  %v4451_v57 = vld [vmem:[#allocation6 + $0x2c8] sm:$0xff]  ;;  %v4453_v58 = vld [vmem:[#allocation6 + $0x2d8] sm:$0xff]  ;;  %v4459_v59 = vld [vmem:[#allocation6 + $0x2c0] sm:$0xff]  ;;  %p4254_p13 = por %p4253_p12, %p4252_p11 }
  0x30   :  { %476 = vmatpush1.msra.mxu1 %v65_v28  ;;  %361 = vmatpush1.msra.mxu0 %v71_v29  ;;  %v4461_v60 = vld [vmem:[#allocation6 + $0x2d0] sm:$0xff]  ;;  %v4465_v61 = vld [vmem:[#allocation6 + $0x288] sm:$0xff]  ;;  %v4467_v62 = vld [vmem:[#allocation6 + $0x298] sm:$0xff] }
  0x31   :  { %477 = vmatprep.subr.mxu1 %v58_v30  ;;  %362 = vmatprep.subr.mxu0 %v64_v31  ;;  %v4473_v63 = vld [vmem:[#allocation6 + $0x280] sm:$0xff]  ;;  %v4475_v1 = vld [vmem:[#allocation6 + $0x290] sm:$0xff]  ;;  %v4481_v2 = vld [vmem:[#allocation6 + $0x248] sm:$0xff]  ;;  %p4255_p0 = pnand %p4254_p13, %p4248_p10 }
  0x32   :  { %3588 = vmatmul.mubr.msk.f32.gmra.mxu0 %vm83_vm0, %v4343_v32  ;;  %3596 = vmatmul.mubr.msk.f32.gmra.mxu1 %vm83_vm0, %v4343_v32  ;;  %v4483_v3 = vld [vmem:[#allocation6 + $0x258] sm:$0xff]  ;;  %v4489_v4 = vld [vmem:[#allocation6 + $0x240] sm:$0xff]  ;;  %v4491_v5 = vld [vmem:[#allocation6 + $0x250] sm:$0xff] }
  0x33   :  { %196 = vmatprep.mubr.f32.mxu0 %v6528_v0  ;;  %309 = vmatprep.mubr.f32.mxu1 %v6528_v0  ;;  %v4495_v6 = vld [vmem:[#allocation6 + $0x208] sm:$0xff]  ;;  %v4497_v7 = vld [vmem:[#allocation6 + $0x218] sm:$0xff]  ;;  %v4503_v8 = vld [vmem:[#allocation6 + $0x200] sm:$0xff] }
  0x34   :  { %478 = vmatpush1.msra.mxu1 %v57_v33  ;;  %363 = vmatpush1.msra.mxu0 %v63_v34  ;;  %v4505_v9 = vld [vmem:[#allocation6 + $0x210] sm:$0xff]  ;;  %v4511_v10 = vld [vmem:[#allocation6 + $0x1c8] sm:$0xff]  ;;  %v4513_v11 = vld [vmem:[#allocation6 + $0x1d8] sm:$0xff] }
  0x35   :  { %364 = vmatprep.subr.mxu0 %v56_v35  ;;  %834 = vmatprep.subr.mxu1 %v4349_v36  ;;  %v4519_v12 = vld [vmem:[#allocation6 + $0x1c0] sm:$0xff]  ;;  %v4521_v13 = vld [vmem:[#allocation6 + $0x1d0] sm:$0xff]  ;;  %v4525_v14 = vld [vmem:[#allocation6 + $0x188] sm:$0xff] }
  0x36   :  { %3589 = vmatmul.mubr.msk.f32.gmra.mxu0 %vm83_vm0, %v4356_v37  ;;  %3597 = vmatmul.mubr.msk.f32.gmra.mxu1 %vm83_vm0, %v4356_v37  ;;  %v4527_v15 = vld [vmem:[#allocation6 + $0x198] sm:$0xff]  ;;  %v4533_v16 = vld [vmem:[#allocation6 + $0x180] sm:$0xff]  ;;  %v4541_v18 = vld [vmem:[#allocation6 + $0x148] sm:$0xff] }
  0x37   :  { %202 = vmatprep.mubr.f32.mxu0 %v6528_v0  ;;  %315 = vmatprep.mubr.f32.mxu1 %v6528_v0  ;;  %v4543_v19 = vld [vmem:[#allocation6 + $0x158] sm:$0xff]  ;;  %v4549_v20 = vld [vmem:[#allocation6 + $0x140] sm:$0xff]  ;;  %v4551_v21 = vld [vmem:[#allocation6 + $0x150] sm:$0xff] }
  0x38   :  { %365 = vmatpush1.msra.mxu0 %v55_v38  ;;  %v4557_v23 = vld [vmem:[#allocation6 + $0x118] sm:$0xff]  ;;  %v4563_v24 = vld [vmem:[#allocation6 + $0x100] sm:$0xff]  ;;  %v4565_v25 = vld [vmem:[#allocation6 + $0x110] sm:$0xff] }
  0x39   :  { %763 = vmatprep.subr.mxu0 %v4363_v39  ;;  %v4571_v26 = vld [vmem:[#allocation6 + $0xc8] sm:$0xff]  ;;  %v4579_v28 = vld [vmem:[#allocation6 + $0xc0] sm:$0xff]  ;;  %v4581_v29 = vld [vmem:[#allocation6 + $0xd0] sm:$0xff] }
  0x3a   :  { %3590 = vmatmul.mubr.msk.f32.gmra.mxu0 %vm83_vm0, %v4370_v40  ;;  %3598 = vmatmul.mubr.msk.f32.gmra.mxu1 %vm83_vm0, %v4370_v40  ;;  %v4585_v30 = vld [vmem:[#allocation6 + $0x88] sm:$0xff]  ;;  %v4587_v31 = vld [vmem:[#allocation6 + $0x98] sm:$0xff]  ;;  %v4595_v33 = vld [vmem:[#allocation6 + $0x90] sm:$0xff] }
  0x3b   :  { %208 = vmatprep.mubr.f32.mxu0 %v6528_v0  ;;  %321 = vmatprep.mubr.f32.mxu1 %v6528_v0  ;;  %6940 = vst [vmem:[#allocation12_spill] sm:$0xff] %v4585_v30  ;;  %6941 = vst [vmem:[#allocation13_spill] sm:$0xff] %v4587_v31  ;;  %v4601_v34 = vld [vmem:[#allocation6 + $0x48] sm:$0xff]  ;;  %v4603_v35 = vld [vmem:[#allocation6 + $0x58] sm:$0xff] }
  0x3c   :  { %6943 = vst [vmem:[#allocation15_spill] sm:$0xff] %v4595_v33  ;;  %6944 = vst [vmem:[#allocation16_spill] sm:$0xff] %v4601_v34  ;;  %v4611_v38 = vld [vmem:[#allocation6 + $0x50] sm:$0xff] }
  0x3d   :  { %6945 = vst [vmem:[#allocation17_spill] sm:$0xff] %v4603_v35  ;;  %6947 = vst [vmem:[#allocation19_spill] sm:$0xff] %v4611_v38 }
  0x3e   :  { %3591 = vmatmul.mubr.msk.f32.gmra.mxu0 %vm83_vm0, %v4382_v41  ;;  %3599 = vmatmul.mubr.msk.f32.gmra.mxu1 %vm83_vm0, %v4382_v41 }
  0x3f   :  { %214 = vmatprep.mubr.f32.mxu0 %v6528_v0  ;;  %327 = vmatprep.mubr.f32.mxu1 %v6528_v0 }
  0x42   :  { %3592 = vmatmul.mubr.msk.f32.gmra.mxu0 %vm83_vm0, %v4393_v42  ;;  %3600 = vmatmul.mubr.msk.f32.gmra.mxu1 %vm83_vm0, %v4393_v42 }
  0x43   :  { %398 = vmatprep.mubr.f32.mxu0 %v6528_v0  ;;  %511 = vmatprep.mubr.f32.mxu1 %v6528_v0 }
  0x46   :  { %3601 = vmatmul.mubr.msk.f32.vlgmr.msra.gmra.mxu0 %vm83_vm0, %v4310_v17  ;;  %3609 = vmatmul.mubr.msk.f32.vlgmr.msra.gmra.mxu1 %vm83_vm0, %v4310_v17  ;;  %v4535_v17 = vld [vmem:[#allocation6 + $0x190] sm:$0xff] }
  0x47   :  { %764 = vmatpush1.msra.mxu0 %v4401_v43  ;;  %835 = vmatpush1.msra.mxu1 %v4403_v44 }
  0x48   :  { %765 = vmatprep.subr.mxu0 %v4405_v45  ;;  %836 = vmatprep.subr.mxu1 %v4407_v46 }
  0x49   :  { %766 = vmatpush1.msra.mxu0 %v4413_v47  ;;  %837 = vmatpush1.msra.mxu1 %v4415_v48 }
  0x4a   :  { %404 = vmatprep.mubr.f32.mxu0 %v6528_v0  ;;  %517 = vmatprep.mubr.f32.mxu1 %v6528_v0 }
  0x4b   :  { %767 = vmatprep.subr.mxu0 %v4421_v49  ;;  %838 = vmatprep.subr.mxu1 %v4423_v50 }
  0x4c   :  { %3602 = vmatmul.mubr.msk.f32.gmra.mxu0 %vm83_vm0, %v4320_v22  ;;  %3610 = vmatmul.mubr.msk.f32.gmra.mxu1 %vm83_vm0, %v4320_v22  ;;  %v4555_v22 = vld [vmem:[#allocation6 + $0x108] sm:$0xff] }
  0x4d   :  { %768 = vmatpush1.msra.mxu0 %v4429_v51  ;;  %839 = vmatpush1.msra.mxu1 %v4431_v52 }
  0x4e   :  { %769 = vmatprep.subr.mxu0 %v4435_v53  ;;  %840 = vmatprep.subr.mxu1 %v4437_v54 }
  0x4f   :  { %770 = vmatpush1.msra.mxu0 %v4443_v55  ;;  %841 = vmatpush1.msra.mxu1 %v4445_v56 }
  0x50   :  { %410 = vmatprep.mubr.f32.mxu0 %v6528_v0  ;;  %523 = vmatprep.mubr.f32.mxu1 %v6528_v0 }
  0x51   :  { %771 = vmatprep.subr.mxu0 %v4451_v57  ;;  %842 = vmatprep.subr.mxu1 %v4453_v58 }
  0x52   :  { %3603 = vmatmul.mubr.msk.f32.gmra.mxu0 %vm83_vm0, %v4332_v27  ;;  %3611 = vmatmul.mubr.msk.f32.gmra.mxu1 %vm83_vm0, %v4332_v27  ;;  %v4573_v27 = vld [vmem:[#allocation6 + $0xd8] sm:$0xff] }
  0x53   :  { %772 = vmatpush1.msra.mxu0 %v4459_v59  ;;  %843 = vmatpush1.msra.mxu1 %v4461_v60 }
  0x54   :  { %773 = vmatprep.subr.mxu0 %v4465_v61  ;;  %844 = vmatprep.subr.mxu1 %v4467_v62 }
  0x55   :  { %774 = vmatpush1.msra.mxu0 %v4473_v63  ;;  %845 = vmatpush1.msra.mxu1 %v4475_v1 }
  0x56   :  { %416 = vmatprep.mubr.f32.mxu0 %v6528_v0  ;;  %529 = vmatprep.mubr.f32.mxu1 %v6528_v0 }
  0x57   :  { %775 = vmatprep.subr.mxu0 %v4481_v2  ;;  %846 = vmatprep.subr.mxu1 %v4483_v3 }
  0x58   :  { %3604 = vmatmul.mubr.msk.f32.gmra.mxu0 %vm83_vm0, %v4343_v32  ;;  %3612 = vmatmul.mubr.msk.f32.gmra.mxu1 %vm83_vm0, %v4343_v32  ;;  %v4593_v32 = vld [vmem:[#allocation6 + $0x80] sm:$0xff] }
  0x59   :  { %776 = vmatpush1.msra.mxu0 %v4489_v4  ;;  %847 = vmatpush1.msra.mxu1 %v4491_v5  ;;  %6942 = vst [vmem:[#allocation14_spill] sm:$0xff] %v4593_v32 }
  0x5a   :  { %777 = vmatprep.subr.mxu0 %v4495_v6  ;;  %848 = vmatprep.subr.mxu1 %v4497_v7 }
  0x5b   :  { %778 = vmatpush1.msra.mxu0 %v4503_v8  ;;  %849 = vmatpush1.msra.mxu1 %v4505_v9 }
  0x5c   :  { %422 = vmatprep.mubr.f32.mxu0 %v6528_v0  ;;  %535 = vmatprep.mubr.f32.mxu1 %v6528_v0 }
  0x5d   :  { %779 = vmatprep.subr.mxu0 %v4511_v10  ;;  %850 = vmatprep.subr.mxu1 %v4513_v11 }
  0x5e   :  { %3605 = vmatmul.mubr.msk.f32.gmra.mxu0 %vm83_vm0, %v4356_v37  ;;  %3613 = vmatmul.mubr.msk.f32.gmra.mxu1 %vm83_vm0, %v4356_v37  ;;  %v4609_v37 = vld [vmem:[#allocation6 + $0x40] sm:$0xff] }
  0x5f   :  { %780 = vmatpush1.msra.mxu0 %v4519_v12  ;;  %851 = vmatpush1.msra.mxu1 %v4521_v13  ;;  %6946 = vst [vmem:[#allocation18_spill] sm:$0xff] %v4609_v37 }
  0x60   :  { %781 = vmatprep.subr.mxu0 %v4525_v14  ;;  %852 = vmatprep.subr.mxu1 %v4527_v15 }
  0x61   :  { %782 = vmatpush1.msra.mxu0 %v4533_v16  ;;  %853 = vmatpush1.msra.mxu1 %v4535_v17 }
  0x62   :  { %428 = vmatprep.mubr.f32.mxu0 %v6528_v0  ;;  %541 = vmatprep.mubr.f32.mxu1 %v6528_v0 }
  0x63   :  { %783 = vmatprep.subr.mxu0 %v4541_v18  ;;  %854 = vmatprep.subr.mxu1 %v4543_v19 }
  0x64   :  { %3606 = vmatmul.mubr.msk.f32.gmra.mxu0 %vm83_vm0, %v4370_v40  ;;  %3614 = vmatmul.mubr.msk.f32.gmra.mxu1 %vm83_vm0, %v4370_v40  ;;  %v4615_v40 = vld [vmem:[#allocation6 + $0x8] sm:$0xff] }
  0x65   :  { %784 = vmatpush1.msra.mxu0 %v4549_v20  ;;  %855 = vmatpush1.msra.mxu1 %v4551_v21  ;;  %6948 = vst [vmem:[#allocation20_spill] sm:$0xff] %v4615_v40 }
  0x66   :  { %785 = vmatprep.subr.mxu0 %v4555_v22  ;;  %856 = vmatprep.subr.mxu1 %v4557_v23 }
  0x67   :  { %786 = vmatpush1.msra.mxu0 %v4563_v24  ;;  %857 = vmatpush1.msra.mxu1 %v4565_v25 }
  0x68   :  { %434 = vmatprep.mubr.f32.mxu0 %v6528_v0  ;;  %547 = vmatprep.mubr.f32.mxu1 %v6528_v0 }
  0x69   :  { %787 = vmatprep.subr.mxu0 %v4571_v26  ;;  %858 = vmatprep.subr.mxu1 %v4573_v27 }
  0x6a   :  { %3607 = vmatmul.mubr.msk.f32.gmra.mxu0 %vm83_vm0, %v4382_v41  ;;  %3615 = vmatmul.mubr.msk.f32.gmra.mxu1 %vm83_vm0, %v4382_v41  ;;  %v4617_v41 = vld [vmem:[#allocation6 + $0x18] sm:$0xff] }
  0x6b   :  { %788 = vmatpush1.msra.mxu0 %v4579_v28  ;;  %859 = vmatpush1.msra.mxu1 %v4581_v29  ;;  %6949 = vst [vmem:[#allocation21_spill] sm:$0xff] %v4617_v41 }
  0x6c   :  { %789 = vmatprep.subr.mxu0 %v4585_v30  ;;  %860 = vmatprep.subr.mxu1 %v4587_v31  ;;  %v4665_v31 = vld [vmem:[#allocation6 + $0x370] sm:$0xff]  ;;  %v4669_v30 = vld [vmem:[#allocation6 + $0x328] sm:$0xff] }
  0x6d   :  { %790 = vmatpush1.msra.mxu0 %v4593_v32  ;;  %861 = vmatpush1.msra.mxu1 %v4595_v33  ;;  %v4623_v33 = vld [vmem:[#allocation6] sm:$0xff]  ;;  %6964 = vst [vmem:[#allocation35_spill] sm:$0xff] %v4665_v31  ;;  %6965 = vst [vmem:[#allocation36_spill] sm:$0xff] %v4669_v30 }
  0x6e   :  { %440 = vmatprep.mubr.f32.mxu0 %v6528_v0  ;;  %553 = vmatprep.mubr.f32.mxu1 %v6528_v0  ;;  %6950 = vst [vmem:[#allocation22_spill] sm:$0xff] %v4623_v33  ;;  %v4625_v0 = vld [vmem:[#allocation6 + $0x10] sm:$0xff]  ;;  %v4639_v32 = vld [vmem:[#allocation6 + $0x3e0] sm:$0xff] }
  0x6f   :  { %791 = vmatprep.subr.mxu0 %v4601_v34  ;;  %862 = vmatprep.subr.mxu1 %v4603_v35  ;;  %6951 = vst [vmem:[#allocation23_spill] sm:$0xff] %v4625_v0  ;;  %v4631_v35 = vld [vmem:[#allocation6 + $0x3e8] sm:$0xff]  ;;  %v4633_v34 = vld [vmem:[#allocation6 + $0x3f8] sm:$0xff]  ;;  %6955 = vst [vmem:[#allocation26_spill] sm:$0xff] %v4639_v32 }
  0x70   :  { %3608 = vmatmul.mubr.msk.f32.gmra.mxu0 %vm83_vm0, %v4393_v42  ;;  %3616 = vmatmul.mubr.msk.f32.gmra.mxu1 %vm83_vm0, %v4393_v42  ;;  %6952 = vst [vmem:[#allocation24_spill] sm:$0xff] %v4631_v35  ;;  %6953 = vst [vmem:[#allocation25_spill] sm:$0xff] %v4633_v34  ;;  %v6954_v42 = vmov 0.0  }
  0x71   :  { %792 = vmatpush1.msra.mxu0 %v4609_v37  ;;  %863 = vmatpush1.msra.mxu1 %v4611_v38  ;;  %v4641_v37 = vld [vmem:[#allocation6 + $0x3f0] sm:$0xff]  ;;  %v4657_v38 = vld [vmem:[#allocation6 + $0x368] sm:$0xff] }
  0x72   :  { %793 = vmatprep.subr.mxu0 %v4615_v40  ;;  %864 = vmatprep.subr.mxu1 %v4617_v41  ;;  %6956 = vst [vmem:[#allocation27_spill] sm:$0xff] %v4641_v37  ;;  %v4645_v41 = vld [vmem:[#allocation6 + $0x3a8] sm:$0xff]  ;;  %v4647_v40 = vld [vmem:[#allocation6 + $0x3b8] sm:$0xff]  ;;  %6961 = vst [vmem:[#allocation32_spill] sm:$0xff] %v4657_v38 }
  0x73   :  { %794 = vmatpush1.msra.mxu0 %v4623_v33  ;;  %865 = vmatpush1.msra.mxu1 %v4625_v0  ;;  %6957 = vst [vmem:[#allocation28_spill] sm:$0xff] %v4645_v41  ;;  %6958 = vst [vmem:[#allocation29_spill] sm:$0xff] %v4647_v40  ;;  %v4651_v0 = vld [vmem:[#allocation6 + $0x3a0] sm:$0xff]  ;;  %v4653_v33 = vld [vmem:[#allocation6 + $0x3b0] sm:$0xff] }
  0x74   :  { %827 = vmatprep.mubr.f32.mxu0 %v6954_v42  ;;  %898 = vmatprep.mubr.f32.mxu1 %v6954_v42  ;;  %6959 = vst [vmem:[#allocation30_spill] sm:$0xff] %v4651_v0  ;;  %6960 = vst [vmem:[#allocation31_spill] sm:$0xff] %v4653_v33 }
  0x75   :  { %905 = vmatprep.subr.mxu0 %v4631_v35  ;;  %976 = vmatprep.subr.mxu1 %v4633_v34  ;;  %v4659_v35 = vld [vmem:[#allocation6 + $0x378] sm:$0xff]  ;;  %v4663_v34 = vld [vmem:[#allocation6 + $0x360] sm:$0xff] }
  0x76   :  { %828 = vmatmul.mubr.f32.vlgmr.msra.gmra.mxu0 %v6954_v42  ;;  %899 = vmatmul.mubr.f32.vlgmr.msra.gmra.mxu1 %v6954_v42  ;;  %6962 = vst [vmem:[#allocation33_spill] sm:$0xff] %v4659_v35  ;;  %6963 = vst [vmem:[#allocation34_spill] sm:$0xff] %v4663_v34 }
  0x77   :  { %906 = vmatpush1.msra.mxu0 %v4639_v32  ;;  %977 = vmatpush1.msra.mxu1 %v4641_v37  ;;  %v4671_v32 = vld [vmem:[#allocation6 + $0x338] sm:$0xff]  ;;  %v4675_v37 = vld [vmem:[#allocation6 + $0x320] sm:$0xff] }
  0x78   :  { %907 = vmatprep.subr.mxu0 %v4645_v41  ;;  %978 = vmatprep.subr.mxu1 %v4647_v40  ;;  %6966 = vst [vmem:[#allocation37_spill] sm:$0xff] %v4671_v32  ;;  %6967 = vst [vmem:[#allocation38_spill] sm:$0xff] %v4675_v37  ;;  %v4677_v41 = vld [vmem:[#allocation6 + $0x330] sm:$0xff]  ;;  %v4681_v40 = vld [vmem:[#allocation6 + $0x2e8] sm:$0xff] }
  0x79   :  { %908 = vmatpush1.msra.mxu0 %v4651_v0  ;;  %979 = vmatpush1.msra.mxu1 %v4653_v33  ;;  %6968 = vst [vmem:[#allocation39_spill] sm:$0xff] %v4677_v41  ;;  %6969 = vst [vmem:[#allocation40_spill] sm:$0xff] %v4681_v40  ;;  %v4683_v0 = vld [vmem:[#allocation6 + $0x2f8] sm:$0xff]  ;;  %v4687_v33 = vld [vmem:[#allocation6 + $0x2e0] sm:$0xff] }
  0x7a   :  { %909 = vmatprep.subr.mxu0 %v4657_v38  ;;  %980 = vmatprep.subr.mxu1 %v4659_v35  ;;  %6970 = vst [vmem:[#allocation41_spill] sm:$0xff] %v4683_v0  ;;  %6971 = vst [vmem:[#allocation42_spill] sm:$0xff] %v4687_v33  ;;  %v4689_v38 = vld [vmem:[#allocation6 + $0x2f0] sm:$0xff]  ;;  %v4693_v35 = vld [vmem:[#allocation6 + $0x2a8] sm:$0xff] }
  0x7b   :  { %910 = vmatpush1.msra.mxu0 %v4663_v34  ;;  %981 = vmatpush1.msra.mxu1 %v4665_v31  ;;  %6972 = vst [vmem:[#allocation43_spill] sm:$0xff] %v4689_v38  ;;  %6973 = vst [vmem:[#allocation44_spill] sm:$0xff] %v4693_v35  ;;  %v4695_v34 = vld [vmem:[#allocation6 + $0x2b8] sm:$0xff]  ;;  %v4699_v31 = vld [vmem:[#allocation6 + $0x2a0] sm:$0xff] }
  0x7c   :  { %911 = vmatprep.subr.mxu0 %v4669_v30  ;;  %982 = vmatprep.subr.mxu1 %v4671_v32  ;;  %6974 = vst [vmem:[#allocation45_spill] sm:$0xff] %v4695_v34  ;;  %6975 = vst [vmem:[#allocation46_spill] sm:$0xff] %v4699_v31  ;;  %v4701_v30 = vld [vmem:[#allocation6 + $0x2b0] sm:$0xff]  ;;  %v4705_v32 = vld [vmem:[#allocation6 + $0x268] sm:$0xff] }
  0x7d   :  { %912 = vmatpush1.msra.mxu0 %v4675_v37  ;;  %983 = vmatpush1.msra.mxu1 %v4677_v41  ;;  %6976 = vst [vmem:[#allocation47_spill] sm:$0xff] %v4701_v30  ;;  %6977 = vst [vmem:[#allocation48_spill] sm:$0xff] %v4705_v32  ;;  %v4707_v37 = vld [vmem:[#allocation6 + $0x278] sm:$0xff]  ;;  %v4711_v41 = vld [vmem:[#allocation6 + $0x260] sm:$0xff] }
  0x7e   :  { %913 = vmatprep.subr.mxu0 %v4681_v40  ;;  %984 = vmatprep.subr.mxu1 %v4683_v0  ;;  %6978 = vst [vmem:[#allocation49_spill] sm:$0xff] %v4707_v37  ;;  %6979 = vst [vmem:[#allocation50_spill] sm:$0xff] %v4711_v41  ;;  %v4713_v40 = vld [vmem:[#allocation6 + $0x270] sm:$0xff]  ;;  %v4717_v0 = vld [vmem:[#allocation6 + $0x228] sm:$0xff] }
  0x7f   :  { %914 = vmatpush1.msra.mxu0 %v4687_v33  ;;  %985 = vmatpush1.msra.mxu1 %v4689_v38  ;;  %6980 = vst [vmem:[#allocation51_spill] sm:$0xff] %v4713_v40  ;;  %6981 = vst [vmem:[#allocation52_spill] sm:$0xff] %v4717_v0  ;;  %v4719_v33 = vld [vmem:[#allocation6 + $0x238] sm:$0xff]  ;;  %v4723_v38 = vld [vmem:[#allocation6 + $0x220] sm:$0xff] }
  0x80   :  { %915 = vmatprep.subr.mxu0 %v4693_v35  ;;  %986 = vmatprep.subr.mxu1 %v4695_v34  ;;  %6982 = vst [vmem:[#allocation53_spill] sm:$0xff] %v4719_v33  ;;  %6983 = vst [vmem:[#allocation54_spill] sm:$0xff] %v4723_v38  ;;  %v4725_v35 = vld [vmem:[#allocation6 + $0x230] sm:$0xff]  ;;  %v4729_v34 = vld [vmem:[#allocation6 + $0x1e8] sm:$0xff] }
  0x81   :  { %916 = vmatpush1.msra.mxu0 %v4699_v31  ;;  %987 = vmatpush1.msra.mxu1 %v4701_v30  ;;  %6984 = vst [vmem:[#allocation55_spill] sm:$0xff] %v4725_v35  ;;  %6985 = vst [vmem:[#allocation56_spill] sm:$0xff] %v4729_v34  ;;  %v4731_v31 = vld [vmem:[#allocation6 + $0x1f8] sm:$0xff]  ;;  %v4735_v30 = vld [vmem:[#allocation6 + $0x1e0] sm:$0xff] }
  0x82   :  { %917 = vmatprep.subr.mxu0 %v4705_v32  ;;  %988 = vmatprep.subr.mxu1 %v4707_v37  ;;  %6986 = vst [vmem:[#allocation57_spill] sm:$0xff] %v4731_v31  ;;  %6987 = vst [vmem:[#allocation58_spill] sm:$0xff] %v4735_v30  ;;  %v4737_v32 = vld [vmem:[#allocation6 + $0x1f0] sm:$0xff]  ;;  %v4741_v37 = vld [vmem:[#allocation6 + $0x1a8] sm:$0xff] }
  0x83   :  { %918 = vmatpush1.msra.mxu0 %v4711_v41  ;;  %989 = vmatpush1.msra.mxu1 %v4713_v40  ;;  %6988 = vst [vmem:[#allocation59_spill] sm:$0xff] %v4737_v32  ;;  %6989 = vst [vmem:[#allocation60_spill] sm:$0xff] %v4741_v37  ;;  %v4743_v41 = vld [vmem:[#allocation6 + $0x1b8] sm:$0xff]  ;;  %v4747_v40 = vld [vmem:[#allocation6 + $0x1a0] sm:$0xff] }
  0x84   :  { %919 = vmatprep.subr.mxu0 %v4717_v0  ;;  %990 = vmatprep.subr.mxu1 %v4719_v33  ;;  %6990 = vst [vmem:[#allocation61_spill] sm:$0xff] %v4743_v41  ;;  %6991 = vst [vmem:[#allocation62_spill] sm:$0xff] %v4747_v40  ;;  %v4749_v0 = vld [vmem:[#allocation6 + $0x1b0] sm:$0xff]  ;;  %v4753_v33 = vld [vmem:[#allocation6 + $0x168] sm:$0xff] }
  0x85   :  { %920 = vmatpush1.msra.mxu0 %v4723_v38  ;;  %991 = vmatpush1.msra.mxu1 %v4725_v35  ;;  %6992 = vst [vmem:[#allocation63_spill] sm:$0xff] %v4749_v0  ;;  %6993 = vst [vmem:[#allocation64_spill] sm:$0xff] %v4753_v33  ;;  %v4755_v38 = vld [vmem:[#allocation6 + $0x178] sm:$0xff]  ;;  %v4759_v35 = vld [vmem:[#allocation6 + $0x160] sm:$0xff] }
  0x86   :  { %921 = vmatprep.subr.mxu0 %v4729_v34  ;;  %992 = vmatprep.subr.mxu1 %v4731_v31  ;;  %6994 = vst [vmem:[#allocation65_spill] sm:$0xff] %v4755_v38  ;;  %6995 = vst [vmem:[#allocation66_spill] sm:$0xff] %v4759_v35  ;;  %v4761_v34 = vld [vmem:[#allocation6 + $0x170] sm:$0xff]  ;;  %v4765_v31 = vld [vmem:[#allocation6 + $0x128] sm:$0xff] }
  0x87   :  { %922 = vmatpush1.msra.mxu0 %v4735_v30  ;;  %993 = vmatpush1.msra.mxu1 %v4737_v32  ;;  %6996 = vst [vmem:[#allocation67_spill] sm:$0xff] %v4761_v34  ;;  %6997 = vst [vmem:[#allocation68_spill] sm:$0xff] %v4765_v31  ;;  %v4767_v30 = vld [vmem:[#allocation6 + $0x138] sm:$0xff]  ;;  %v4771_v32 = vld [vmem:[#allocation6 + $0x120] sm:$0xff] }
  0x88   :  { %923 = vmatprep.subr.mxu0 %v4741_v37  ;;  %994 = vmatprep.subr.mxu1 %v4743_v41  ;;  %6998 = vst [vmem:[#allocation69_spill] sm:$0xff] %v4767_v30  ;;  %6999 = vst [vmem:[#allocation70_spill] sm:$0xff] %v4771_v32  ;;  %v4773_v37 = vld [vmem:[#allocation6 + $0x130] sm:$0xff]  ;;  %v4777_v41 = vld [vmem:[#allocation6 + $0xe8] sm:$0xff] }
  0x89   :  { %924 = vmatpush1.msra.mxu0 %v4747_v40  ;;  %995 = vmatpush1.msra.mxu1 %v4749_v0  ;;  %7000 = vst [vmem:[#allocation71_spill] sm:$0xff] %v4773_v37  ;;  %7001 = vst [vmem:[#allocation72_spill] sm:$0xff] %v4777_v41  ;;  %v4779_v40 = vld [vmem:[#allocation6 + $0xf8] sm:$0xff]  ;;  %v4783_v0 = vld [vmem:[#allocation6 + $0xe0] sm:$0xff] }
  0x8a   :  { %925 = vmatprep.subr.mxu0 %v4753_v33  ;;  %996 = vmatprep.subr.mxu1 %v4755_v38  ;;  %7002 = vst [vmem:[#allocation73_spill] sm:$0xff] %v4779_v40  ;;  %7003 = vst [vmem:[#allocation74_spill] sm:$0xff] %v4783_v0  ;;  %v4785_v33 = vld [vmem:[#allocation6 + $0xf0] sm:$0xff]  ;;  %v4789_v38 = vld [vmem:[#allocation6 + $0xa8] sm:$0xff] }
  0x8b   :  { %926 = vmatpush1.msra.mxu0 %v4759_v35  ;;  %997 = vmatpush1.msra.mxu1 %v4761_v34  ;;  %7004 = vst [vmem:[#allocation75_spill] sm:$0xff] %v4785_v33  ;;  %v4791_v35 = vld [vmem:[#allocation6 + $0xb8] sm:$0xff]  ;;  %v4795_v34 = vld [vmem:[#allocation6 + $0xa0] sm:$0xff] }
  0x8c   :  { %927 = vmatprep.subr.mxu0 %v4765_v31  ;;  %998 = vmatprep.subr.mxu1 %v4767_v30  ;;  %7005 = vst [vmem:[#allocation76_spill] sm:$0xff] %v4791_v35  ;;  %v4797_v31 = vld [vmem:[#allocation6 + $0xb0] sm:$0xff]  ;;  %v4801_v30 = vld [vmem:[#allocation6 + $0x68] sm:$0xff] }
  0x8d   :  { %928 = vmatpush1.msra.mxu0 %v4771_v32  ;;  %999 = vmatpush1.msra.mxu1 %v4773_v37  ;;  %v4803_v32 = vld [vmem:[#allocation6 + $0x78] sm:$0xff]  ;;  %v4807_v37 = vld [vmem:[#allocation6 + $0x60] sm:$0xff] }
  0x8e   :  { %929 = vmatprep.subr.mxu0 %v4777_v41  ;;  %1000 = vmatprep.subr.mxu1 %v4779_v40  ;;  %v4809_v41 = vld [vmem:[#allocation6 + $0x70] sm:$0xff]  ;;  %v4813_v40 = vld [vmem:[#allocation6 + $0x28] sm:$0xff] }
  0x8f   :  { %930 = vmatpush1.msra.mxu0 %v4783_v0  ;;  %1001 = vmatpush1.msra.mxu1 %v4785_v33  ;;  %v4815_v0 = vld [vmem:[#allocation6 + $0x38] sm:$0xff]  ;;  %v4819_v33 = vld [vmem:[#allocation6 + $0x20] sm:$0xff] }
  0x90   :  { %931 = vmatprep.subr.mxu0 %v4789_v38  ;;  %1002 = vmatprep.subr.mxu1 %v4791_v35  ;;  %v4823_v35 = vld [vmem:[#allocation6 + $0x30] sm:$0xff] }
  0x91   :  { %932 = vmatpush1.msra.mxu0 %v4795_v34  ;;  %1003 = vmatpush1.msra.mxu1 %v4797_v31 }
  0x92   :  { %933 = vmatprep.subr.mxu0 %v4801_v30  ;;  %1004 = vmatprep.subr.mxu1 %v4803_v32 }
  0x93   :  { %934 = vmatpush1.msra.mxu0 %v4807_v37  ;;  %1005 = vmatpush1.msra.mxu1 %v4809_v41 }
  0x94   :  { %935 = vmatprep.subr.mxu0 %v4813_v40  ;;  %1006 = vmatprep.subr.mxu1 %v4815_v0 }
  0x95   :  { %936 = vmatpush1.msra.mxu0 %v4819_v33  ;;  %969 = vmatprep.mubr.f32.mxu0 %v6954_v42 }
  0x96   :  { %1007 = vmatpush1.msra.mxu1 %v4823_v35  ;;  %1040 = vmatprep.mubr.f32.mxu1 %v6954_v42 }
  0x97   :  { %970 = vmatmul.mubr.f32.vlgmr.msra.gmra.mxu0 %v6954_v42  ;;  %1041 = vmatmul.mubr.f32.vlgmr.msra.gmra.mxu1 %v6954_v42 }
  0x98   :  { %1114 = vmatprep.subr.mxu0 %v4363_v39  ;;  %1185 = vmatprep.subr.mxu1 %v4349_v36  ;;  %v7006_v36 = vld [vmem:[#allocation12_spill] sm:$0xff]  ;;  %v7007_v39 = vld [vmem:[#allocation13_spill] sm:$0xff] }
  0x99   :  { %1115 = vmatpush1.msra.mxu0 %v4401_v43  ;;  %1186 = vmatpush1.msra.mxu1 %v4403_v44  ;;  %v7008_v43 = vld [vmem:[#allocation14_spill] sm:$0xff]  ;;  %v7009_v44 = vld [vmem:[#allocation15_spill] sm:$0xff] }
  0x9a   :  { %1116 = vmatprep.subr.mxu0 %v4405_v45  ;;  %1187 = vmatprep.subr.mxu1 %v4407_v46  ;;  %v7010_v45 = vld [vmem:[#allocation16_spill] sm:$0xff]  ;;  %v7011_v46 = vld [vmem:[#allocation17_spill] sm:$0xff] }
  0x9b   :  { %1117 = vmatpush1.msra.mxu0 %v4413_v47  ;;  %1188 = vmatpush1.msra.mxu1 %v4415_v48  ;;  %v7012_v47 = vld [vmem:[#allocation18_spill] sm:$0xff]  ;;  %v7013_v48 = vld [vmem:[#allocation19_spill] sm:$0xff] }
  0x9c   :  { %1118 = vmatprep.subr.mxu0 %v4421_v49  ;;  %1189 = vmatprep.subr.mxu1 %v4423_v50  ;;  %v7014_v49 = vld [vmem:[#allocation20_spill] sm:$0xff]  ;;  %v7015_v50 = vld [vmem:[#allocation21_spill] sm:$0xff] }
  0x9d   :  { %1119 = vmatpush1.msra.mxu0 %v4429_v51  ;;  %1190 = vmatpush1.msra.mxu1 %v4431_v52  ;;  %v7016_v51 = vld [vmem:[#allocation22_spill] sm:$0xff]  ;;  %v7017_v52 = vld [vmem:[#allocation23_spill] sm:$0xff] }
  0x9e   :  { %1120 = vmatprep.subr.mxu0 %v4435_v53  ;;  %1191 = vmatprep.subr.mxu1 %v4437_v54  ;;  %v7018_v53 = vld [vmem:[#allocation24_spill] sm:$0xff]  ;;  %v7019_v54 = vld [vmem:[#allocation25_spill] sm:$0xff] }
  0x9f   :  { %1121 = vmatpush1.msra.mxu0 %v4443_v55  ;;  %1192 = vmatpush1.msra.mxu1 %v4445_v56 }
  0xa0   :  { %1122 = vmatprep.subr.mxu0 %v4451_v57  ;;  %1193 = vmatprep.subr.mxu1 %v4453_v58 }
  0xa1   :  { %1123 = vmatpush1.msra.mxu0 %v4459_v59  ;;  %1194 = vmatpush1.msra.mxu1 %v4461_v60 }
  0xa2   :  { %1124 = vmatprep.subr.mxu0 %v4465_v61  ;;  %1195 = vmatprep.subr.mxu1 %v4467_v62 }
  0xa3   :  { %1125 = vmatpush1.msra.mxu0 %v4473_v63  ;;  %1196 = vmatpush1.msra.mxu1 %v4475_v1 }
  0xa4   :  { %1126 = vmatprep.subr.mxu0 %v4481_v2  ;;  %1197 = vmatprep.subr.mxu1 %v4483_v3 }
  0xa5   :  { %1127 = vmatpush1.msra.mxu0 %v4489_v4  ;;  %1198 = vmatpush1.msra.mxu1 %v4491_v5 }
  0xa6   :  { %1128 = vmatprep.subr.mxu0 %v4495_v6  ;;  %1199 = vmatprep.subr.mxu1 %v4497_v7 }
  0xa7   :  { %1129 = vmatpush1.msra.mxu0 %v4503_v8  ;;  %1200 = vmatpush1.msra.mxu1 %v4505_v9 }
  0xa8   :  { %1130 = vmatprep.subr.mxu0 %v4511_v10  ;;  %1201 = vmatprep.subr.mxu1 %v4513_v11 }
  0xa9   :  { %1131 = vmatpush1.msra.mxu0 %v4519_v12  ;;  %1202 = vmatpush1.msra.mxu1 %v4521_v13 }
  0xaa   :  { %1132 = vmatprep.subr.mxu0 %v4525_v14  ;;  %1203 = vmatprep.subr.mxu1 %v4527_v15 }
  0xab   :  { %1133 = vmatpush1.msra.mxu0 %v4533_v16  ;;  %1204 = vmatpush1.msra.mxu1 %v4535_v17 }
  0xac   :  { %1134 = vmatprep.subr.mxu0 %v4541_v18  ;;  %1205 = vmatprep.subr.mxu1 %v4543_v19 }
  0xad   :  { %1135 = vmatpush1.msra.mxu0 %v4549_v20  ;;  %1206 = vmatpush1.msra.mxu1 %v4551_v21 }
  0xae   :  { %1136 = vmatprep.subr.mxu0 %v4555_v22  ;;  %1207 = vmatprep.subr.mxu1 %v4557_v23 }
  0xaf   :  { %1137 = vmatpush1.msra.mxu0 %v4563_v24  ;;  %1208 = vmatpush1.msra.mxu1 %v4565_v25 }
  0xb0   :  { %1138 = vmatprep.subr.mxu0 %v4571_v26  ;;  %1209 = vmatprep.subr.mxu1 %v4573_v27 }
  0xb1   :  { %1139 = vmatpush1.msra.mxu0 %v4579_v28  ;;  %1210 = vmatpush1.msra.mxu1 %v4581_v29 }
  0xb2   :  { %1140 = vmatprep.subr.mxu0 %v7006_v36  ;;  %1211 = vmatprep.subr.mxu1 %v7007_v39 }
  0xb3   :  { %1141 = vmatpush1.msra.mxu0 %v7008_v43  ;;  %1212 = vmatpush1.msra.mxu1 %v7009_v44 }
  0xb4   :  { %1142 = vmatprep.subr.mxu0 %v7010_v45  ;;  %1213 = vmatprep.subr.mxu1 %v7011_v46 }
  0xb5   :  { %1143 = vmatpush1.msra.mxu0 %v7012_v47  ;;  %1214 = vmatpush1.msra.mxu1 %v7013_v48 }
  0xb6   :  { %1144 = vmatprep.subr.mxu0 %v7014_v49  ;;  %1215 = vmatprep.subr.mxu1 %v7015_v50 }
  0xb7   :  { %1145 = vmatpush1.msra.mxu0 %v7016_v51  ;;  %1216 = vmatpush1.msra.mxu1 %v7017_v52 }
  0xb8   :  { %1178 = vmatprep.mubr.f32.mxu0 %v6954_v42  ;;  %1249 = vmatprep.mubr.f32.mxu1 %v6954_v42 }
  0xb9   :  { %1256 = vmatprep.subr.mxu0 %v7018_v53  ;;  %1327 = vmatprep.subr.mxu1 %v7019_v54 }
  0xe6   :  { %v4901_v55 = vpop.f32.mrf.mxu0  ;;  %v4903_v56 = vpop.f32.mrf.mxu1 }
  0xe8   :  { %v4905_v57 = vpop.f32.mrf.mxu0  ;;  %v4907_v58 = vpop.f32.mrf.mxu1 }
  0xea   :  { %v4909_v59 = vpop.f32.mrf.mxu0  ;;  %v4911_v60 = vpop.f32.mrf.mxu1 }
  0xeb   :  { %7020 = vst [vmem:[#allocation12_spill] sm:$0xff] %v4909_v59  ;;  %7021 = vst [vmem:[#allocation13_spill] sm:$0xff] %v4911_v60 }
  0xec   :  { %v4913_v61 = vpop.f32.mrf.mxu0  ;;  %v4915_v62 = vpop.f32.mrf.mxu1 }
  0xed   :  { %7022 = vst [vmem:[#allocation14_spill] sm:$0xff] %v4913_v61  ;;  %7023 = vst [vmem:[#allocation15_spill] sm:$0xff] %v4915_v62 }
  0xee   :  { %v4917_v63 = vpop.f32.mrf.mxu0  ;;  %v4919_v1 = vpop.f32.mrf.mxu1 }
  0xef   :  { %7024 = vst [vmem:[#allocation16_spill] sm:$0xff] %v4917_v63  ;;  %7025 = vst [vmem:[#allocation17_spill] sm:$0xff] %v4919_v1 }
  0xf0   :  { %v4921_v2 = vpop.f32.mrf.mxu0  ;;  %v4923_v3 = vpop.f32.mrf.mxu1 }
  0xf1   :  { %7026 = vst [vmem:[#allocation18_spill] sm:$0xff] %v4921_v2  ;;  %7027 = vst [vmem:[#allocation19_spill] sm:$0xff] %v4923_v3 }
  0xf2   :  { %v4925_v4 = vpop.f32.mrf.mxu0  ;;  %v4927_v5 = vpop.f32.mrf.mxu1 }
  0xf3   :  { %7028 = vst [vmem:[#allocation20_spill] sm:$0xff] %v4925_v4  ;;  %7029 = vst [vmem:[#allocation21_spill] sm:$0xff] %v4927_v5 }
  0xf4   :  { %v4929_v6 = vpop.f32.mrf.mxu0  ;;  %v4931_v7 = vpop.f32.mrf.mxu1 }
  0xf5   :  { %7030 = vst [vmem:[#allocation22_spill] sm:$0xff] %v4929_v6  ;;  %7031 = vst [vmem:[#allocation23_spill] sm:$0xff] %v4931_v7 }
  0xf6   :  { %v4933_v8 = vpop.f32.mrf.mxu0  ;;  %v4935_v9 = vpop.f32.mrf.mxu1 }
  0xf7   :  { %7032 = vst [vmem:[#allocation77_spill] sm:$0xff] %v4933_v8  ;;  %7033 = vst [vmem:[#allocation78_spill] sm:$0xff] %v4935_v9 }
  0xf8   :  { %v4937_v10 = vpop.f32.mrf.mxu0  ;;  %v4939_v11 = vpop.f32.mrf.mxu1 }
  0xf9   :  { %7034 = vst [vmem:[#allocation79_spill] sm:$0xff] %v4937_v10  ;;  %7035 = vst [vmem:[#allocation80_spill] sm:$0xff] %v4939_v11 }
  0xfa   :  { %v4941_v12 = vpop.f32.mrf.mxu1  ;;  %v4943_v13 = vpop.f32.mrf.mxu0 }
  0xfb   :  { %7036 = vst [vmem:[#allocation81_spill] sm:$0xff] %v4941_v12  ;;  %7037 = vst [vmem:[#allocation82_spill] sm:$0xff] %v4943_v13 }
  0xfc   :  { %v4945_v14 = vpop.f32.mrf.mxu1  ;;  %v4947_v15 = vpop.f32.mrf.mxu0 }
  0xfd   :  { %7038 = vst [vmem:[#allocation83_spill] sm:$0xff] %v4945_v14  ;;  %7039 = vst [vmem:[#allocation84_spill] sm:$0xff] %v4947_v15 }
  0xfe   :  { %v4949_v16 = vpop.f32.mrf.mxu1  ;;  %v4951_v17 = vpop.f32.mrf.mxu0 }
  0xff   :  { %7040 = vst [vmem:[#allocation85_spill] sm:$0xff] %v4949_v16  ;;  %7041 = vst [vmem:[#allocation86_spill] sm:$0xff] %v4951_v17 }
 0x100   :  { %v4953_v7 = vpop.f32.mrf.mxu1  ;;  %v4955_v8 = vpop.f32.mrf.mxu0 }
 0x101   :  { %7042 = vst [vmem:[#allocation87_spill] sm:$0xff] %v4953_v7  ;;  %7043 = vst [vmem:[#allocation88_spill] sm:$0xff] %v4955_v8 }
 0x102   :  { %v4957_v9 = vpop.f32.mrf.mxu1  ;;  %v4959_v10 = vpop.f32.mrf.mxu0 }
 0x103   :  { %7044 = vst [vmem:[#allocation89_spill] sm:$0xff] %v4957_v9  ;;  %7045 = vst [vmem:[#allocation90_spill] sm:$0xff] %v4959_v10 }
 0x104   :  { %v4961_v11 = vpop.f32.mrf.mxu1  ;;  %v4963_v12 = vpop.f32.mrf.mxu0 }
 0x105   :  { %7046 = vst [vmem:[#allocation91_spill] sm:$0xff] %v4961_v11  ;;  %7047 = vst [vmem:[#allocation92_spill] sm:$0xff] %v4963_v12 }
 0x106   :  { %v513_v13 = vpop.f32.mrf.mxu1  ;;  %v400_v14 = vpop.f32.mrf.mxu0 }
 0x108   :  { %v515_v6 = vpop.f32.mrf.mxu1  ;;  %v402_v15 = vpop.f32.mrf.mxu0 }
 0x10c   :  { %v4965_v5 = vpop.f32.mrf.mxu1  ;;  %v4967_v16 = vpop.f32.mrf.mxu0 }
 0x10d   :  { %7048 = vst [vmem:[#allocation93_spill] sm:$0xff] %v4965_v5  ;;  %7049 = vst [vmem:[#allocation94_spill] sm:$0xff] %v4967_v16 }
 0x10e   :  { %v4969_v17 = vpop.f32.mrf.mxu1  ;;  %v4971_v7 = vpop.f32.mrf.mxu0 }
 0x10f   :  { %7050 = vst [vmem:[#allocation95_spill] sm:$0xff] %v4969_v17  ;;  %7051 = vst [vmem:[#allocation96_spill] sm:$0xff] %v4971_v7 }
 0x112   :  { %v4973_v8 = vpop.f32.mrf.mxu1  ;;  %v4975_v9 = vpop.f32.mrf.mxu0 }
 0x113   :  { %7052 = vst [vmem:[#allocation97_spill] sm:$0xff] %v4973_v8  ;;  %7053 = vst [vmem:[#allocation98_spill] sm:$0xff] %v4975_v9 }
 0x114   :  { %v4977_v10 = vpop.f32.mrf.mxu1  ;;  %v4979_v11 = vpop.f32.mrf.mxu0 }
 0x115   :  { %7054 = vst [vmem:[#allocation99_spill] sm:$0xff] %v4977_v10  ;;  %7055 = vst [vmem:[#allocation100_spill] sm:$0xff] %v4979_v11 }
 0x118   :  { %v4981_v12 = vpop.f32.mrf.mxu1  ;;  %v4983_v4 = vpop.f32.mrf.mxu0 }
 0x119   :  { %7056 = vst [vmem:[#allocation101_spill] sm:$0xff] %v4981_v12  ;;  %7057 = vst [vmem:[#allocation102_spill] sm:$0xff] %v4983_v4 }
 0x11a   :  { %v4985_v3 = vpop.f32.mrf.mxu1  ;;  %v4987_v2 = vpop.f32.mrf.mxu0 }
 0x11b   :  { %7058 = vst [vmem:[#allocation103_spill] sm:$0xff] %v4985_v3  ;;  %7059 = vst [vmem:[#allocation104_spill] sm:$0xff] %v4987_v2 }
 0x11e   :  { %v4989_v1 = vpop.f32.mrf.mxu1  ;;  %v4991_v63 = vpop.f32.mrf.mxu0 }
 0x11f   :  { %7060 = vst [vmem:[#allocation105_spill] sm:$0xff] %v4989_v1  ;;  %7061 = vst [vmem:[#allocation106_spill] sm:$0xff] %v4991_v63 }
 0x120   :  { %v4993_v62 = vpop.f32.mrf.mxu1  ;;  %v4995_v8 = vpop.f32.mrf.mxu0 }
 0x121   :  { %7062 = vst [vmem:[#allocation107_spill] sm:$0xff] %v4993_v62  ;;  %7063 = vst [vmem:[#allocation108_spill] sm:$0xff] %v4995_v8 }
 0x124   :  { %v4997_v9 = vpop.f32.mrf.mxu1  ;;  %v4999_v10 = vpop.f32.mrf.mxu0 }
 0x125   :  { %7064 = vst [vmem:[#allocation109_spill] sm:$0xff] %v4997_v9  ;;  %7065 = vst [vmem:[#allocation110_spill] sm:$0xff] %v4999_v10 }
 0x126   :  { %v5001_v11 = vpop.f32.mrf.mxu1  ;;  %v5003_v12 = vpop.f32.mrf.mxu0 }
 0x127   :  { %7066 = vst [vmem:[#allocation111_spill] sm:$0xff] %v5001_v11  ;;  %7067 = vst [vmem:[#allocation112_spill] sm:$0xff] %v5003_v12 }
 0x12a   :  { %v5005_v4 = vpop.f32.mrf.mxu1  ;;  %v5007_v3 = vpop.f32.mrf.mxu0 }
 0x12b   :  { %7068 = vst [vmem:[#allocation113_spill] sm:$0xff] %v5005_v4  ;;  %7069 = vst [vmem:[#allocation114_spill] sm:$0xff] %v5007_v3 }
 0x12c   :  { %v5009_v2 = vpop.f32.mrf.mxu1  ;;  %v5011_v1 = vpop.f32.mrf.mxu0 }
 0x12d   :  { %7070 = vst [vmem:[#allocation115_spill] sm:$0xff] %v5009_v2  ;;  %7071 = vst [vmem:[#allocation116_spill] sm:$0xff] %v5011_v1 }
 0x130   :  { %v5013_v63 = vpop.f32.mrf.mxu1  ;;  %v5015_v62 = vpop.f32.mrf.mxu0 }
 0x131   :  { %7072 = vst [vmem:[#allocation117_spill] sm:$0xff] %v5013_v63  ;;  %7073 = vst [vmem:[#allocation118_spill] sm:$0xff] %v5015_v62 }
 0x132   :  { %v5017_v8 = vpop.f32.mrf.mxu1  ;;  %v5019_v9 = vpop.f32.mrf.mxu0 }
 0x133   :  { %7074 = vst [vmem:[#allocation119_spill] sm:$0xff] %v5017_v8  ;;  %7075 = vst [vmem:[#allocation120_spill] sm:$0xff] %v5019_v9 }
 0x136   :  { %v900_v10 = vpop.f32.mrf.mxu1  ;;  %v829_v11 = vpop.f32.mrf.mxu0 }
 0x137   :  { %v1047_v2 = vadd.f32 %v829_v11, %v4901_v55  ;;  %v1049_v59 = vadd.f32 %v900_v10, %v4903_v56 }
 0x138   :  { %v902_v61 = vpop.f32.mrf.mxu1  ;;  %v831_v12 = vpop.f32.mrf.mxu0 }
 0x139   :  { %v3617_v7 = vmul.f32 -1.442695, %v1047_v2  ;;  %v3618_v53 = vmul.f32 -1.442695, %v1049_v59 }
 0x157   :  { %v1042_v16 = vpop.f32.mrf.mxu1  ;;  %v971_v4 = vpop.f32.mrf.mxu0 }
 0x158   :  { %v1053_v8 = vadd.f32 %v1042_v16, %v513_v13  ;;  %v1050_v13 = vadd.f32 %v902_v61, %v4907_v58  ;;  %v7076_v58 = vld [vmem:[#allocation26_spill] sm:$0xff]  ;;  %v7077_v61 = vld [vmem:[#allocation27_spill] sm:$0xff] }
 0x159   :  { %v1044_v60 = vpop.f32.mrf.mxu1  ;;  %v973_v1 = vpop.f32.mrf.mxu0 }
 0x15a   :  { %v1054_v3 = vadd.f32 %v1044_v60, %v515_v6  ;;  %v1052_v63 = vadd.f32 %v973_v1, %v402_v15  ;;  %v1048_v6 = vadd.f32 %v831_v12, %v4905_v57  ;;  %v1068_v15 = vmax.f32 %v1050_v13, 0.0  ;;  %v7090_v13 = vld [vmem:[#allocation40_spill] sm:$0xff] }
 0x15c   :  { %v3620_v5 = vmul.f32 -1.442695, %v1054_v3  ;;  %v3619_v62 = vmul.f32 -1.442695, %v1052_v63 }
 0x15e   :  { %3663 = vpow2.f32 %v3620_v5  ;;  %v1051_v5 = vadd.f32 %v971_v4, %v400_v14 }
 0x15f   :  { %3665 = vpow2.f32 %v3617_v7 }
 0x160   :  { %3667 = vpow2.f32 %v3619_v62 }
 0x161   :  { %3669 = vtanh.f32 %v1053_v8 }
 0x16b   :  { %v3664_v9 = vpop.eup %3663 }
 0x16c   :  { %v1080_v17 = vadd.f32 1.0, %v3664_v9  ;;  %v3666_v54 = vpop.eup %3665  ;;  %v1061_v9 = vmax.f32 %v1048_v6, 0.0  ;;  %v7079_v6 = vld [vmem:[#allocation29_spill] sm:$0xff] }
 0x16d   :  { %v3668_v60 = vpop.eup %3667  ;;  %v1058_v3 = vadd.f32 1.0, %v3666_v54 }
 0x16e   :  { %3671 = vrcp.f32 %v1080_v17  ;;  %v1073_v55 = vadd.f32 1.0, %v3668_v60  ;;  %v3670_v1 = vpop.eup %3669 }
 0x16f   :  { %3673 = vpow2.f32 %v3618_v53 }
 0x170   :  { %3675 = vrcp.f32 %v1058_v3 }
 0x171   :  { %3677 = vrcp.f32 %v1073_v55 }
 0x172   :  { %3679 = vtanh.f32 %v1051_v5 }
 0x17b   :  { %v3672_v2 = vpop.eup %3671 }
 0x17c   :  { %v1089_v63 = vadd.f32 %v3672_v2, %v3670_v1  ;;  %v3674_v7 = vpop.eup %3673 }
 0x17d   :  { %v3676_v56 = vpop.eup %3675  ;;  %v1065_v8 = vadd.f32 1.0, %v3674_v7  ;;  %v7080_v7 = vld [vmem:[#allocation30_spill] sm:$0xff] }
 0x17e   :  { %v3621_v62 = vmul.f32 -1.442695, %v1089_v63  ;;  %v3678_v59 = vpop.eup %3677  ;;  %v1083_v10 = vmul.f32 %v3676_v56, %v1061_v9  ;;  %v7081_v56 = vld [vmem:[#allocation31_spill] sm:$0xff]  ;;  %v7083_v9 = vld [vmem:[#allocation33_spill] sm:$0xff] }
 0x17f   :  { %v3680_v54 = vpop.eup %3679 }
 0x180   :  { %3681 = vpow2.f32 %v3621_v62  ;;  %v1087_v53 = vmul.f32 %v3680_v54, %v3678_v59  ;;  %v7078_v62 = vld [vmem:[#allocation28_spill] sm:$0xff]  ;;  %v7084_v59 = vld [vmem:[#allocation34_spill] sm:$0xff] }
 0x181   :  { %3683 = vrcp.f32 %v1065_v8  ;;  %v7082_v8 = vld [vmem:[#allocation32_spill] sm:$0xff] }
 0x182   :  { %3685 = vtanh.f32 %v1083_v10  ;;  %v7085_v10 = vld [vmem:[#allocation35_spill] sm:$0xff]  ;;  %v7086_v54 = vld [vmem:[#allocation36_spill] sm:$0xff] }
 0x183   :  { %3687 = vtanh.f32 %v1087_v53  ;;  %v7087_v53 = vld [vmem:[#allocation37_spill] sm:$0xff] }
 0x18d   :  { %v3682_v4 = vpop.eup %3681 }
 0x18e   :  { %v1093_v11 = vadd.f32 1.0, %v3682_v4  ;;  %v3684_v14 = vpop.eup %3683  ;;  %v7088_v4 = vld [vmem:[#allocation38_spill] sm:$0xff] }
 0x18f   :  { %v3686_v16 = vpop.eup %3685  ;;  %v1085_v57 = vadd.f32 %v3684_v14, %v1068_v15  ;;  %v7091_v14 = vld [vmem:[#allocation41_spill] sm:$0xff]  ;;  %v7092_v15 = vld [vmem:[#allocation42_spill] sm:$0xff] }
 0x190   :  { %3689 = vrcp.f32 %v1093_v11  ;;  %v3688_v12 = vpop.eup %3687  ;;  %v7089_v11 = vld [vmem:[#allocation39_spill] sm:$0xff] }
 0x191   :  { %3691 = vtanh.f32 %v3686_v16  ;;  %v7093_v16 = vld [vmem:[#allocation43_spill] sm:$0xff] }
 0x192   :  { %3693 = vtanh.f32 %v1085_v57  ;;  %v7094_v57 = vld [vmem:[#allocation44_spill] sm:$0xff] }
 0x19d   :  { %v3690_v17 = vpop.eup %3689 }
 0x19e   :  { %v1099_v60 = vadd.f32 %v3690_v17, %v3688_v12  ;;  %v3692_v3 = vpop.eup %3691  ;;  %v7095_v12 = vld [vmem:[#allocation45_spill] sm:$0xff]  ;;  %v7096_v17 = vld [vmem:[#allocation46_spill] sm:$0xff] }
 0x19f   :  { %v3694_v55 = vpop.eup %3693 }
 0x1a0   :  { %3695 = vtanh.f32 %v1099_v60  ;;  %v5025_v5 = vmul.f32 %v3694_v55, %v3692_v3  ;;  %v7097_v60 = vld [vmem:[#allocation47_spill] sm:$0xff]  ;;  %v7098_v3 = vld [vmem:[#allocation48_spill] sm:$0xff]  ;;  %v7099_v55 = vld [vmem:[#allocation49_spill] sm:$0xff] }
 0x1ad   :  { %v3696_v1 = vpop.eup %3695 }
 0x1ae   :  { %v1101_v2 = vmul.f32 %v3696_v1, %v5025_v5  ;;  %v7100_v1 = vld [vmem:[#allocation50_spill] sm:$0xff] }
 0x1b0   :  { %3697 = vtanh.f32 %v1101_v2  ;;  %v7101_v2 = vld [vmem:[#allocation51_spill] sm:$0xff] }
 0x1bd   :  { %v5028_v63 = vpop.eup %3697 }
 0x1be   :  { %1179 = vmatmul.mubr.f32.vlgmr.msra.gmra.mxu0 %v5028_v63  ;;  %1250 = vmatmul.mubr.f32.vlgmr.msra.gmra.mxu1 %v5028_v63 }
 0x1bf   :  { %1257 = vmatpush1.msra.mxu0 %v7076_v58  ;;  %1328 = vmatpush1.msra.mxu1 %v7077_v61  ;;  %v7102_v58 = vld [vmem:[#allocation52_spill] sm:$0xff]  ;;  %v7103_v61 = vld [vmem:[#allocation53_spill] sm:$0xff] }
 0x1c0   :  { %1258 = vmatprep.subr.mxu0 %v7078_v62  ;;  %1329 = vmatprep.subr.mxu1 %v7079_v6  ;;  %v7104_v62 = vld [vmem:[#allocation54_spill] sm:$0xff]  ;;  %v7105_v6 = vld [vmem:[#allocation55_spill] sm:$0xff] }
 0x1c1   :  { %1259 = vmatpush1.msra.mxu0 %v7080_v7  ;;  %1330 = vmatpush1.msra.mxu1 %v7081_v56  ;;  %v7106_v7 = vld [vmem:[#allocation56_spill] sm:$0xff]  ;;  %v7107_v56 = vld [vmem:[#allocation57_spill] sm:$0xff] }
 0x1c2   :  { %1260 = vmatprep.subr.mxu0 %v7082_v8  ;;  %1331 = vmatprep.subr.mxu1 %v7083_v9  ;;  %v7108_v8 = vld [vmem:[#allocation58_spill] sm:$0xff]  ;;  %v7109_v9 = vld [vmem:[#allocation59_spill] sm:$0xff] }
 0x1c3   :  { %1261 = vmatpush1.msra.mxu0 %v7084_v59  ;;  %1332 = vmatpush1.msra.mxu1 %v7085_v10  ;;  %v7110_v59 = vld [vmem:[#allocation60_spill] sm:$0xff]  ;;  %v7111_v10 = vld [vmem:[#allocation61_spill] sm:$0xff] }
 0x1c4   :  { %1262 = vmatprep.subr.mxu0 %v7086_v54  ;;  %1333 = vmatprep.subr.mxu1 %v7087_v53  ;;  %v7112_v54 = vld [vmem:[#allocation62_spill] sm:$0xff]  ;;  %v7113_v53 = vld [vmem:[#allocation63_spill] sm:$0xff] }
 0x1c5   :  { %1263 = vmatpush1.msra.mxu0 %v7088_v4  ;;  %1334 = vmatpush1.msra.mxu1 %v7089_v11  ;;  %v7114_v4 = vld [vmem:[#allocation64_spill] sm:$0xff]  ;;  %v7115_v11 = vld [vmem:[#allocation65_spill] sm:$0xff] }
 0x1c6   :  { %1264 = vmatprep.subr.mxu0 %v7090_v13  ;;  %1335 = vmatprep.subr.mxu1 %v7091_v14  ;;  %v7116_v13 = vld [vmem:[#allocation66_spill] sm:$0xff]  ;;  %v7117_v14 = vld [vmem:[#allocation67_spill] sm:$0xff] }
 0x1c7   :  { %1265 = vmatpush1.msra.mxu0 %v7092_v15  ;;  %1336 = vmatpush1.msra.mxu1 %v7093_v16  ;;  %v7118_v15 = vld [vmem:[#allocation68_spill] sm:$0xff]  ;;  %v7119_v16 = vld [vmem:[#allocation69_spill] sm:$0xff] }
 0x1c8   :  { %1266 = vmatprep.subr.mxu0 %v7094_v57  ;;  %1337 = vmatprep.subr.mxu1 %v7095_v12  ;;  %v7120_v57 = vld [vmem:[#allocation70_spill] sm:$0xff]  ;;  %v7121_v12 = vld [vmem:[#allocation71_spill] sm:$0xff] }
 0x1c9   :  { %1267 = vmatpush1.msra.mxu0 %v7096_v17  ;;  %1338 = vmatpush1.msra.mxu1 %v7097_v60  ;;  %v7122_v17 = vld [vmem:[#allocation72_spill] sm:$0xff]  ;;  %v7123_v60 = vld [vmem:[#allocation73_spill] sm:$0xff] }
 0x1ca   :  { %1268 = vmatprep.subr.mxu0 %v7098_v3  ;;  %1339 = vmatprep.subr.mxu1 %v7099_v55  ;;  %v7124_v3 = vld [vmem:[#allocation74_spill] sm:$0xff]  ;;  %v7125_v55 = vld [vmem:[#allocation75_spill] sm:$0xff] }
 0x1cb   :  { %1269 = vmatpush1.msra.mxu0 %v7100_v1  ;;  %1340 = vmatpush1.msra.mxu1 %v7101_v2  ;;  %v7126_v1 = vld [vmem:[#allocation76_spill] sm:$0xff] }
 0x1cc   :  { %1270 = vmatprep.subr.mxu0 %v7102_v58  ;;  %1341 = vmatprep.subr.mxu1 %v7103_v61  ;;  %v5098_v2 = vld [vmem:[#allocation6 + $0x3c8] sm:$0xff]  ;;  %v5101_v58 = vld [vmem:[#allocation6 + $0x3d8] sm:$0xff]  ;;  %v5104_v61 = vld [vmem:[#allocation6 + $0x3c0] sm:$0xff] }
 0x1cd   :  { %1271 = vmatpush1.msra.mxu0 %v7104_v62  ;;  %1342 = vmatpush1.msra.mxu1 %v7105_v6  ;;  %v5107_v62 = vld [vmem:[#allocation6 + $0x3d0] sm:$0xff]  ;;  %v5110_v6 = vld [vmem:[#allocation6 + $0x388] sm:$0xff] }
 0x1ce   :  { %1272 = vmatprep.subr.mxu0 %v7106_v7  ;;  %1343 = vmatprep.subr.mxu1 %v7107_v56  ;;  %7127 = vst [vmem:[#allocation26_spill] sm:$0xff] %v5110_v6  ;;  %v5116_v7 = vld [vmem:[#allocation6 + $0x380] sm:$0xff]  ;;  %v5119_v56 = vld [vmem:[#allocation6 + $0x390] sm:$0xff] }
 0x1cf   :  { %1273 = vmatpush1.msra.mxu0 %v7108_v8  ;;  %1344 = vmatpush1.msra.mxu1 %v7109_v9  ;;  %7129 = vst [vmem:[#allocation28_spill] sm:$0xff] %v5116_v7  ;;  %7130 = vst [vmem:[#allocation29_spill] sm:$0xff] %v5119_v56  ;;  %v5122_v8 = vld [vmem:[#allocation6 + $0x348] sm:$0xff]  ;;  %v5125_v9 = vld [vmem:[#allocation6 + $0x358] sm:$0xff] }
 0x1d0   :  { %1274 = vmatprep.subr.mxu0 %v7110_v59  ;;  %1345 = vmatprep.subr.mxu1 %v7111_v10  ;;  %7131 = vst [vmem:[#allocation30_spill] sm:$0xff] %v5122_v8  ;;  %7132 = vst [vmem:[#allocation31_spill] sm:$0xff] %v5125_v9 }
 0x1d1   :  { %1275 = vmatpush1.msra.mxu0 %v7112_v54  ;;  %1346 = vmatpush1.msra.mxu1 %v7113_v53 }
 0x1d2   :  { %1276 = vmatprep.subr.mxu0 %v7114_v4  ;;  %1347 = vmatprep.subr.mxu1 %v7115_v11 }
 0x1d3   :  { %1277 = vmatpush1.msra.mxu0 %v7116_v13  ;;  %1348 = vmatpush1.msra.mxu1 %v7117_v14 }
 0x1d4   :  { %1278 = vmatprep.subr.mxu0 %v7118_v15  ;;  %1349 = vmatprep.subr.mxu1 %v7119_v16 }
 0x1d5   :  { %1279 = vmatpush1.msra.mxu0 %v7120_v57  ;;  %1350 = vmatpush1.msra.mxu1 %v7121_v12 }
 0x1d6   :  { %1280 = vmatprep.subr.mxu0 %v7122_v17  ;;  %1351 = vmatprep.subr.mxu1 %v7123_v60 }
 0x1d7   :  { %1281 = vmatpush1.msra.mxu0 %v7124_v3  ;;  %1352 = vmatpush1.msra.mxu1 %v7125_v55 }
 0x1d8   :  { %1282 = vmatprep.subr.mxu0 %v4789_v38  ;;  %1353 = vmatprep.subr.mxu1 %v7126_v1 }
 0x1d9   :  { %1283 = vmatpush1.msra.mxu0 %v4795_v34  ;;  %1354 = vmatpush1.msra.mxu1 %v4797_v31 }
 0x1da   :  { %1284 = vmatprep.subr.mxu0 %v4801_v30  ;;  %1355 = vmatprep.subr.mxu1 %v4803_v32 }
 0x1db   :  { %1285 = vmatpush1.msra.mxu0 %v4807_v37  ;;  %1356 = vmatpush1.msra.mxu1 %v4809_v41 }
 0x1dc   :  { %1286 = vmatprep.subr.mxu0 %v4813_v40  ;;  %1357 = vmatprep.subr.mxu1 %v4815_v0 }
 0x1dd   :  { %1287 = vmatpush1.msra.mxu0 %v4819_v33  ;;  %1320 = vmatprep.mubr.f32.mxu0 %v6954_v42 }
 0x1de   :  { %1358 = vmatpush1.msra.mxu1 %v4823_v35  ;;  %1391 = vmatprep.mubr.f32.mxu1 %v6954_v42 }
 0x1df   :  { %1321 = vmatmul.mubr.f32.vlgmr.msra.gmra.mxu0 %v5028_v63  ;;  %1392 = vmatmul.mubr.f32.vlgmr.msra.gmra.mxu1 %v5028_v63  ;;  %v5113_v63 = vld [vmem:[#allocation6 + $0x398] sm:$0xff] }
 0x1e0   :  { %1465 = vmatprep.subr.mxu0 %v5098_v2  ;;  %1536 = vmatprep.subr.mxu1 %v5101_v58  ;;  %7128 = vst [vmem:[#allocation27_spill] sm:$0xff] %v5113_v63 }
 0x1e1   :  { %1466 = vmatpush1.msra.mxu0 %v5104_v61  ;;  %1537 = vmatpush1.msra.mxu1 %v5107_v62 }
 0x1e2   :  { %1467 = vmatprep.subr.mxu0 %v5110_v6  ;;  %1538 = vmatprep.subr.mxu1 %v5113_v63  ;;  %v5128_v6 = vld [vmem:[#allocation6 + $0x340] sm:$0xff]  ;;  %v5131_v63 = vld [vmem:[#allocation6 + $0x350] sm:$0xff] }
 0x1e3   :  { %1468 = vmatpush1.msra.mxu0 %v5116_v7  ;;  %1539 = vmatpush1.msra.mxu1 %v5119_v56  ;;  %7133 = vst [vmem:[#allocation32_spill] sm:$0xff] %v5128_v6  ;;  %7134 = vst [vmem:[#allocation33_spill] sm:$0xff] %v5131_v63  ;;  %v5134_v7 = vld [vmem:[#allocation6 + $0x308] sm:$0xff]  ;;  %v5137_v56 = vld [vmem:[#allocation6 + $0x318] sm:$0xff] }
 0x1e4   :  { %1469 = vmatprep.subr.mxu0 %v5122_v8  ;;  %1540 = vmatprep.subr.mxu1 %v5125_v9  ;;  %7135 = vst [vmem:[#allocation34_spill] sm:$0xff] %v5134_v7  ;;  %7136 = vst [vmem:[#allocation35_spill] sm:$0xff] %v5137_v56  ;;  %v5140_v8 = vld [vmem:[#allocation6 + $0x300] sm:$0xff]  ;;  %v5143_v9 = vld [vmem:[#allocation6 + $0x310] sm:$0xff] }
 0x1e5   :  { %1470 = vmatpush1.msra.mxu0 %v5128_v6  ;;  %1541 = vmatpush1.msra.mxu1 %v5131_v63  ;;  %7137 = vst [vmem:[#allocation36_spill] sm:$0xff] %v5140_v8  ;;  %7138 = vst [vmem:[#allocation37_spill] sm:$0xff] %v5143_v9  ;;  %v5146_v6 = vld [vmem:[#allocation6 + $0x2c8] sm:$0xff]  ;;  %v5149_v63 = vld [vmem:[#allocation6 + $0x2d8] sm:$0xff] }
 0x1e6   :  { %1471 = vmatprep.subr.mxu0 %v5134_v7  ;;  %1542 = vmatprep.subr.mxu1 %v5137_v56  ;;  %7139 = vst [vmem:[#allocation38_spill] sm:$0xff] %v5146_v6  ;;  %7140 = vst [vmem:[#allocation39_spill] sm:$0xff] %v5149_v63  ;;  %v5152_v7 = vld [vmem:[#allocation6 + $0x2c0] sm:$0xff]  ;;  %v5155_v56 = vld [vmem:[#allocation6 + $0x2d0] sm:$0xff] }
 0x1e7   :  { %1472 = vmatpush1.msra.mxu0 %v5140_v8  ;;  %1543 = vmatpush1.msra.mxu1 %v5143_v9  ;;  %7141 = vst [vmem:[#allocation40_spill] sm:$0xff] %v5152_v7  ;;  %7142 = vst [vmem:[#allocation41_spill] sm:$0xff] %v5155_v56  ;;  %v5158_v8 = vld [vmem:[#allocation6 + $0x288] sm:$0xff]  ;;  %v5161_v9 = vld [vmem:[#allocation6 + $0x298] sm:$0xff] }
 0x1e8   :  { %1473 = vmatprep.subr.mxu0 %v5146_v6  ;;  %1544 = vmatprep.subr.mxu1 %v5149_v63  ;;  %7143 = vst [vmem:[#allocation42_spill] sm:$0xff] %v5158_v8  ;;  %7144 = vst [vmem:[#allocation43_spill] sm:$0xff] %v5161_v9  ;;  %v5164_v6 = vld [vmem:[#allocation6 + $0x280] sm:$0xff]  ;;  %v5167_v63 = vld [vmem:[#allocation6 + $0x290] sm:$0xff] }
 0x1e9   :  { %1474 = vmatpush1.msra.mxu0 %v5152_v7  ;;  %1545 = vmatpush1.msra.mxu1 %v5155_v56  ;;  %7145 = vst [vmem:[#allocation44_spill] sm:$0xff] %v5164_v6  ;;  %7146 = vst [vmem:[#allocation45_spill] sm:$0xff] %v5167_v63  ;;  %v5170_v7 = vld [vmem:[#allocation6 + $0x248] sm:$0xff]  ;;  %v5173_v56 = vld [vmem:[#allocation6 + $0x258] sm:$0xff] }
 0x1ea   :  { %1475 = vmatprep.subr.mxu0 %v5158_v8  ;;  %1546 = vmatprep.subr.mxu1 %v5161_v9  ;;  %7147 = vst [vmem:[#allocation46_spill] sm:$0xff] %v5170_v7  ;;  %7148 = vst [vmem:[#allocation47_spill] sm:$0xff] %v5173_v56  ;;  %v5176_v8 = vld [vmem:[#allocation6 + $0x240] sm:$0xff]  ;;  %v5179_v9 = vld [vmem:[#allocation6 + $0x250] sm:$0xff] }
 0x1eb   :  { %1476 = vmatpush1.msra.mxu0 %v5164_v6  ;;  %1547 = vmatpush1.msra.mxu1 %v5167_v63  ;;  %7149 = vst [vmem:[#allocation48_spill] sm:$0xff] %v5176_v8  ;;  %7150 = vst [vmem:[#allocation49_spill] sm:$0xff] %v5179_v9  ;;  %v5182_v6 = vld [vmem:[#allocation6 + $0x208] sm:$0xff]  ;;  %v5185_v63 = vld [vmem:[#allocation6 + $0x218] sm:$0xff] }
 0x1ec   :  { %1477 = vmatprep.subr.mxu0 %v5170_v7  ;;  %1548 = vmatprep.subr.mxu1 %v5173_v56  ;;  %7151 = vst [vmem:[#allocation50_spill] sm:$0xff] %v5182_v6  ;;  %7152 = vst [vmem:[#allocation51_spill] sm:$0xff] %v5185_v63  ;;  %v5188_v7 = vld [vmem:[#allocation6 + $0x200] sm:$0xff]  ;;  %v5191_v56 = vld [vmem:[#allocation6 + $0x210] sm:$0xff] }
 0x1ed   :  { %1478 = vmatpush1.msra.mxu0 %v5176_v8  ;;  %1549 = vmatpush1.msra.mxu1 %v5179_v9  ;;  %7153 = vst [vmem:[#allocation52_spill] sm:$0xff] %v5188_v7  ;;  %7154 = vst [vmem:[#allocation53_spill] sm:$0xff] %v5191_v56  ;;  %v5194_v8 = vld [vmem:[#allocation6 + $0x1c8] sm:$0xff]  ;;  %v5197_v9 = vld [vmem:[#allocation6 + $0x1d8] sm:$0xff] }
 0x1ee   :  { %1479 = vmatprep.subr.mxu0 %v5182_v6  ;;  %1550 = vmatprep.subr.mxu1 %v5185_v63  ;;  %7155 = vst [vmem:[#allocation54_spill] sm:$0xff] %v5194_v8  ;;  %7156 = vst [vmem:[#allocation55_spill] sm:$0xff] %v5197_v9  ;;  %v5200_v6 = vld [vmem:[#allocation6 + $0x1c0] sm:$0xff]  ;;  %v5203_v63 = vld [vmem:[#allocation6 + $0x1d0] sm:$0xff] }
 0x1ef   :  { %1480 = vmatpush1.msra.mxu0 %v5188_v7  ;;  %1551 = vmatpush1.msra.mxu1 %v5191_v56  ;;  %7157 = vst [vmem:[#allocation56_spill] sm:$0xff] %v5200_v6  ;;  %7158 = vst [vmem:[#allocation57_spill] sm:$0xff] %v5203_v63  ;;  %v5206_v7 = vld [vmem:[#allocation6 + $0x188] sm:$0xff]  ;;  %v5209_v56 = vld [vmem:[#allocation6 + $0x198] sm:$0xff] }
 0x1f0   :  { %1481 = vmatprep.subr.mxu0 %v5194_v8  ;;  %1552 = vmatprep.subr.mxu1 %v5197_v9  ;;  %7159 = vst [vmem:[#allocation58_spill] sm:$0xff] %v5206_v7  ;;  %7160 = vst [vmem:[#allocation59_spill] sm:$0xff] %v5209_v56  ;;  %v5212_v8 = vld [vmem:[#allocation6 + $0x180] sm:$0xff]  ;;  %v5215_v9 = vld [vmem:[#allocation6 + $0x190] sm:$0xff] }
 0x1f1   :  { %1482 = vmatpush1.msra.mxu0 %v5200_v6  ;;  %1553 = vmatpush1.msra.mxu1 %v5203_v63  ;;  %7161 = vst [vmem:[#allocation60_spill] sm:$0xff] %v5212_v8  ;;  %7162 = vst [vmem:[#allocation61_spill] sm:$0xff] %v5215_v9 }
 0x1f2   :  { %1483 = vmatprep.subr.mxu0 %v5206_v7  ;;  %1554 = vmatprep.subr.mxu1 %v5209_v56 }
 0x1f3   :  { %1484 = vmatpush1.msra.mxu0 %v5212_v8  ;;  %1555 = vmatpush1.msra.mxu1 %v5215_v9 }
 0x1f4   :  { %1485 = vmatprep.subr.mxu0 %v4541_v18  ;;  %1556 = vmatprep.subr.mxu1 %v4543_v19  ;;  %v7163_v18 = vld [vmem:[#allocation24_spill] sm:$0xff]  ;;  %v7164_v19 = vld [vmem:[#allocation25_spill] sm:$0xff] }
 0x1f5   :  { %1486 = vmatpush1.msra.mxu0 %v4549_v20  ;;  %1557 = vmatpush1.msra.mxu1 %v4551_v21 }
 0x1f6   :  { %1487 = vmatprep.subr.mxu0 %v4555_v22  ;;  %1558 = vmatprep.subr.mxu1 %v4557_v23 }
 0x1f7   :  { %1488 = vmatpush1.msra.mxu0 %v4563_v24  ;;  %1559 = vmatpush1.msra.mxu1 %v4565_v25  ;;  %v7165_v25 = vld [vmem:[#allocation12_spill] sm:$0xff] }
 0x1f8   :  { %1489 = vmatprep.subr.mxu0 %v4571_v26  ;;  %1560 = vmatprep.subr.mxu1 %v4573_v27 }
 0x1f9   :  { %1490 = vmatpush1.msra.mxu0 %v4579_v28  ;;  %1561 = vmatpush1.msra.mxu1 %v4581_v29  ;;  %v7166_v29 = vld [vmem:[#allocation95_spill] sm:$0xff] }
 0x1fa   :  { %1491 = vmatprep.subr.mxu0 %v7006_v36  ;;  %1562 = vmatprep.subr.mxu1 %v7007_v39 }
 0x1fb   :  { %1492 = vmatpush1.msra.mxu0 %v7008_v43  ;;  %1563 = vmatpush1.msra.mxu1 %v7009_v44 }
 0x1fc   :  { %1493 = vmatprep.subr.mxu0 %v7010_v45  ;;  %1564 = vmatprep.subr.mxu1 %v7011_v46  ;;  %v7167_v45 = vld [vmem:[#allocation96_spill] sm:$0xff] }
 0x1fd   :  { %1494 = vmatpush1.msra.mxu0 %v7012_v47  ;;  %1565 = vmatpush1.msra.mxu1 %v7013_v48  ;;  %v7168_v48 = vld [vmem:[#allocation93_spill] sm:$0xff] }
 0x1fe   :  { %1495 = vmatprep.subr.mxu0 %v7014_v49  ;;  %1566 = vmatprep.subr.mxu1 %v7015_v50 }
 0x1ff   :  { %1496 = vmatpush1.msra.mxu0 %v7016_v51  ;;  %1567 = vmatpush1.msra.mxu1 %v7017_v52 }
 0x200   :  { %1529 = vmatprep.mubr.f32.mxu0 %v6954_v42  ;;  %1600 = vmatprep.mubr.f32.mxu1 %v6954_v42 }
 0x201   :  { %1607 = vmatprep.subr.mxu0 %v7163_v18  ;;  %1678 = vmatprep.subr.mxu1 %v7164_v19  ;;  %v7169_v18 = vld [vmem:[#allocation13_spill] sm:$0xff] }
 0x27e   :  { %v1251_v20 = vpop.f32.mrf.mxu1  ;;  %v1180_v21 = vpop.f32.mrf.mxu0 }
 0x27f   :  { %v1398_v26 = vadd.f32 %v1180_v21, %v7165_v25  ;;  %v1400_v19 = vadd.f32 %v1251_v20, %v7169_v18 }
 0x280   :  { %v1253_v22 = vpop.f32.mrf.mxu1  ;;  %v1182_v23 = vpop.f32.mrf.mxu0 }
 0x281   :  { %v3622_v43 = vmul.f32 -1.442695, %v1398_v26  ;;  %v3623_v25 = vmul.f32 -1.442695, %v1400_v19 }
 0x29f   :  { %v1393_v24 = vpop.f32.mrf.mxu1  ;;  %v1322_v27 = vpop.f32.mrf.mxu0 }
 0x2a0   :  { %v1404_v49 = vadd.f32 %v1393_v24, %v7168_v48  ;;  %v7171_v24 = vld [vmem:[#allocation14_spill] sm:$0xff] }
 0x2a1   :  { %v1395_v28 = vpop.f32.mrf.mxu1  ;;  %v1324_v44 = vpop.f32.mrf.mxu0 }
 0x2a2   :  { %v1405_v36 = vadd.f32 %v1395_v28, %v7166_v29  ;;  %v1403_v46 = vadd.f32 %v1324_v44, %v7167_v45  ;;  %v7170_v29 = vld [vmem:[#allocation94_spill] sm:$0xff]  ;;  %v1399_v45 = vadd.f32 %v1182_v23, %v7171_v24 }
 0x2a4   :  { %v3625_v39 = vmul.f32 -1.442695, %v1405_v36  ;;  %v3624_v47 = vmul.f32 -1.442695, %v1403_v46  ;;  %v1402_v36 = vadd.f32 %v1322_v27, %v7170_v29  ;;  %v1412_v20 = vmax.f32 %v1399_v45, 0.0 }
 0x2a6   :  { %3699 = vpow2.f32 %v3625_v39 }
 0x2a7   :  { %3701 = vpow2.f32 %v3622_v43 }
 0x2a8   :  { %3703 = vpow2.f32 %v3624_v47 }
 0x2a9   :  { %3705 = vtanh.f32 %v1404_v49 }
 0x2b3   :  { %v3700_v50 = vpop.eup %3699 }
 0x2b4   :  { %v1431_v51 = vadd.f32 1.0, %v3700_v50  ;;  %v3702_v52 = vpop.eup %3701 }
 0x2b5   :  { %v1409_v21 = vadd.f32 1.0, %v3702_v52  ;;  %v3704_v28 = vpop.eup %3703 }
 0x2b6   :  { %3707 = vrcp.f32 %v1431_v51  ;;  %v1424_v26 = vadd.f32 1.0, %v3704_v28  ;;  %v3706_v39 = vpop.eup %3705 }
 0x2b7   :  { %3709 = vrcp.f32 %v1409_v21  ;;  %v7172_v21 = vld [vmem:[#allocation15_spill] sm:$0xff] }
 0x2b8   :  { %3711 = vpow2.f32 %v3623_v25  ;;  %v1401_v25 = vadd.f32 %v1253_v22, %v7172_v21  ;;  %v5289_v21 = vld [vmem:[#allocation6 + $0x370] sm:$0xff] }
 0x2b9   :  { %3713 = vrcp.f32 %v1424_v26 }
 0x2ba   :  { %3715 = vtanh.f32 %v1402_v36  ;;  %v1419_v29 = vmax.f32 %v1401_v25, 0.0  ;;  %v5292_v25 = vld [vmem:[#allocation6 + $0x328] sm:$0xff] }
 0x2c3   :  { %v3708_v43 = vpop.eup %3707 }
 0x2c4   :  { %v1440_v44 = vadd.f32 %v3708_v43, %v3706_v39  ;;  %v3710_v47 = vpop.eup %3709 }
 0x2c5   :  { %v3712_v48 = vpop.eup %3711  ;;  %v1434_v49 = vmul.f32 %v3710_v47, %v1412_v20 }
 0x2c6   :  { %v3626_v46 = vmul.f32 -1.442695, %v1440_v44  ;;  %v1416_v50 = vadd.f32 1.0, %v3712_v48  ;;  %v3714_v51 = vpop.eup %3713  ;;  %v5265_v48 = vld [vmem:[#allocation6 + $0x3f0] sm:$0xff] }
 0x2c7   :  { %v3716_v52 = vpop.eup %3715 }
 0x2c8   :  { %3717 = vpow2.f32 %v3626_v46  ;;  %v1438_v18 = vmul.f32 %v3716_v52, %v3714_v51  ;;  %v5274_v51 = vld [vmem:[#allocation6 + $0x3a0] sm:$0xff]  ;;  %v5277_v52 = vld [vmem:[#allocation6 + $0x3b0] sm:$0xff] }
 0x2c9   :  { %3719 = vtanh.f32 %v1434_v49  ;;  %v5268_v49 = vld [vmem:[#allocation6 + $0x3a8] sm:$0xff] }
 0x2ca   :  { %3721 = vrcp.f32 %v1416_v50  ;;  %v5271_v50 = vld [vmem:[#allocation6 + $0x3b8] sm:$0xff] }
 0x2cb   :  { %3723 = vtanh.f32 %v1438_v18  ;;  %v5280_v18 = vld [vmem:[#allocation6 + $0x368] sm:$0xff] }
 0x2d5   :  { %v3718_v27 = vpop.eup %3717 }
 0x2d6   :  { %v1444_v19 = vadd.f32 1.0, %v3718_v27  ;;  %v3720_v28 = vpop.eup %3719  ;;  %v5283_v27 = vld [vmem:[#allocation6 + $0x378] sm:$0xff] }
 0x2d7   :  { %v3722_v23 = vpop.eup %3721  ;;  %v1447_v26 = vadd.f32 %v3720_v28, %v5025_v5  ;;  %v5262_v5 = vld [vmem:[#allocation6 + $0x3e0] sm:$0xff]  ;;  %v5295_v28 = vld [vmem:[#allocation6 + $0x338] sm:$0xff] }
 0x2d8   :  { %3725 = vrcp.f32 %v1444_v19  ;;  %v1436_v36 = vadd.f32 %v3722_v23, %v1419_v29  ;;  %v3724_v39 = vpop.eup %3723  ;;  %v5286_v19 = vld [vmem:[#allocation6 + $0x360] sm:$0xff]  ;;  %v5304_v29 = vld [vmem:[#allocation6 + $0x2e8] sm:$0xff] }
 0x2d9   :  { %3727 = vtanh.f32 %v1447_v26  ;;  %v5298_v23 = vld [vmem:[#allocation6 + $0x320] sm:$0xff]  ;;  %v5301_v26 = vld [vmem:[#allocation6 + $0x330] sm:$0xff] }
 0x2da   :  { %3729 = vtanh.f32 %v1436_v36  ;;  %v5307_v36 = vld [vmem:[#allocation6 + $0x2f8] sm:$0xff] }
 0x2e5   :  { %v3726_v43 = vpop.eup %3725 }
 0x2e6   :  { %v1450_v44 = vadd.f32 %v3726_v43, %v3724_v39  ;;  %v3728_v24 = vpop.eup %3727  ;;  %v5310_v39 = vld [vmem:[#allocation6 + $0x2e0] sm:$0xff]  ;;  %v5313_v43 = vld [vmem:[#allocation6 + $0x2f0] sm:$0xff] }
 0x2e7   :  { %v3730_v45 = vpop.eup %3729  ;;  %7173 = vst [vmem:[#allocation62_spill] sm:$0xff] %v5313_v43 }
 0x2e8   :  { %3731 = vtanh.f32 %v1450_v44  ;;  %v5255_v46 = vmul.f32 %v3730_v45, %v3728_v24  ;;  %v5316_v44 = vld [vmem:[#allocation6 + $0x2a8] sm:$0xff]  ;;  %v5319_v24 = vld [vmem:[#allocation6 + $0x2b8] sm:$0xff]  ;;  %v5322_v45 = vld [vmem:[#allocation6 + $0x2a0] sm:$0xff] }
 0x2e9   :  { %7174 = vst [vmem:[#allocation63_spill] sm:$0xff] %v5316_v44  ;;  %7175 = vst [vmem:[#allocation64_spill] sm:$0xff] %v5319_v24 }
 0x2ea   :  { %7176 = vst [vmem:[#allocation65_spill] sm:$0xff] %v5322_v45 }
 0x2f5   :  { %v3732_v47 = vpop.eup %3731 }
 0x2f6   :  { %v1452_v20 = vmul.f32 %v3732_v47, %v5255_v46  ;;  %v5325_v47 = vld [vmem:[#allocation6 + $0x2b0] sm:$0xff] }
 0x2f7   :  { %7177 = vst [vmem:[#allocation66_spill] sm:$0xff] %v5325_v47 }
 0x2f8   :  { %3733 = vtanh.f32 %v1452_v20  ;;  %v5328_v20 = vld [vmem:[#allocation6 + $0x268] sm:$0xff] }
 0x2f9   :  { %7178 = vst [vmem:[#allocation67_spill] sm:$0xff] %v5328_v20 }
 0x305   :  { %v5258_v22 = vpop.eup %3733 }
 0x306   :  { %1530 = vmatmul.mubr.f32.vlgmr.msra.gmra.mxu0 %v5258_v22  ;;  %1601 = vmatmul.mubr.f32.vlgmr.msra.gmra.mxu1 %v5258_v22 }
 0x307   :  { %1608 = vmatpush1.msra.mxu0 %v5262_v5  ;;  %1679 = vmatpush1.msra.mxu1 %v5265_v48 }
 0x308   :  { %1609 = vmatprep.subr.mxu0 %v5268_v49  ;;  %1680 = vmatprep.subr.mxu1 %v5271_v50 }
 0x309   :  { %1610 = vmatpush1.msra.mxu0 %v5274_v51  ;;  %1681 = vmatpush1.msra.mxu1 %v5277_v52 }
 0x30a   :  { %1611 = vmatprep.subr.mxu0 %v5280_v18  ;;  %1682 = vmatprep.subr.mxu1 %v5283_v27 }
 0x30b   :  { %1612 = vmatpush1.msra.mxu0 %v5286_v19  ;;  %1683 = vmatpush1.msra.mxu1 %v5289_v21 }
 0x30c   :  { %1613 = vmatprep.subr.mxu0 %v5292_v25  ;;  %1684 = vmatprep.subr.mxu1 %v5295_v28 }
 0x30d   :  { %1614 = vmatpush1.msra.mxu0 %v5298_v23  ;;  %1685 = vmatpush1.msra.mxu1 %v5301_v26 }
 0x30e   :  { %1615 = vmatprep.subr.mxu0 %v5304_v29  ;;  %1686 = vmatprep.subr.mxu1 %v5307_v36 }
 0x30f   :  { %1616 = vmatpush1.msra.mxu0 %v5310_v39  ;;  %1687 = vmatpush1.msra.mxu1 %v5313_v43  ;;  %v5331_v43 = vld [vmem:[#allocation6 + $0x278] sm:$0xff] }
 0x310   :  { %1617 = vmatprep.subr.mxu0 %v5316_v44  ;;  %1688 = vmatprep.subr.mxu1 %v5319_v24  ;;  %7179 = vst [vmem:[#allocation68_spill] sm:$0xff] %v5331_v43  ;;  %v5334_v44 = vld [vmem:[#allocation6 + $0x260] sm:$0xff]  ;;  %v5337_v24 = vld [vmem:[#allocation6 + $0x270] sm:$0xff] }
 0x311   :  { %1618 = vmatpush1.msra.mxu0 %v5322_v45  ;;  %1689 = vmatpush1.msra.mxu1 %v5325_v47  ;;  %7180 = vst [vmem:[#allocation69_spill] sm:$0xff] %v5334_v44  ;;  %7181 = vst [vmem:[#allocation70_spill] sm:$0xff] %v5337_v24  ;;  %v5340_v45 = vld [vmem:[#allocation6 + $0x228] sm:$0xff]  ;;  %v5343_v47 = vld [vmem:[#allocation6 + $0x238] sm:$0xff] }
 0x312   :  { %1619 = vmatprep.subr.mxu0 %v5328_v20  ;;  %1690 = vmatprep.subr.mxu1 %v5331_v43  ;;  %7182 = vst [vmem:[#allocation71_spill] sm:$0xff] %v5340_v45  ;;  %7183 = vst [vmem:[#allocation72_spill] sm:$0xff] %v5343_v47  ;;  %v5346_v20 = vld [vmem:[#allocation6 + $0x220] sm:$0xff]  ;;  %v5349_v43 = vld [vmem:[#allocation6 + $0x230] sm:$0xff] }
 0x313   :  { %1620 = vmatpush1.msra.mxu0 %v5334_v44  ;;  %1691 = vmatpush1.msra.mxu1 %v5337_v24  ;;  %v5352_v44 = vld [vmem:[#allocation6 + $0x1e8] sm:$0xff]  ;;  %v5355_v24 = vld [vmem:[#allocation6 + $0x1f8] sm:$0xff] }
 0x314   :  { %1621 = vmatprep.subr.mxu0 %v5340_v45  ;;  %1692 = vmatprep.subr.mxu1 %v5343_v47  ;;  %v5358_v45 = vld [vmem:[#allocation6 + $0x1e0] sm:$0xff]  ;;  %v5361_v47 = vld [vmem:[#allocation6 + $0x1f0] sm:$0xff] }
 0x315   :  { %1622 = vmatpush1.msra.mxu0 %v5346_v20  ;;  %1693 = vmatpush1.msra.mxu1 %v5349_v43 }
 0x316   :  { %1623 = vmatprep.subr.mxu0 %v5352_v44  ;;  %1694 = vmatprep.subr.mxu1 %v5355_v24 }
 0x317   :  { %1624 = vmatpush1.msra.mxu0 %v5358_v45  ;;  %1695 = vmatpush1.msra.mxu1 %v5361_v47 }
 0x318   :  { %1625 = vmatprep.subr.mxu0 %v7110_v59  ;;  %1696 = vmatprep.subr.mxu1 %v7111_v10  ;;  %v7195_v59 = vld [vmem:[#allocation37_spill] sm:$0xff]  ;;  %v7196_v10 = vld [vmem:[#allocation38_spill] sm:$0xff] }
 0x319   :  { %1626 = vmatpush1.msra.mxu0 %v7112_v54  ;;  %1697 = vmatpush1.msra.mxu1 %v7113_v53  ;;  %v7197_v54 = vld [vmem:[#allocation39_spill] sm:$0xff]  ;;  %v7198_v53 = vld [vmem:[#allocation40_spill] sm:$0xff] }
 0x31a   :  { %1627 = vmatprep.subr.mxu0 %v7114_v4  ;;  %1698 = vmatprep.subr.mxu1 %v7115_v11  ;;  %v7199_v4 = vld [vmem:[#allocation41_spill] sm:$0xff]  ;;  %v7200_v11 = vld [vmem:[#allocation42_spill] sm:$0xff] }
 0x31b   :  { %1628 = vmatpush1.msra.mxu0 %v7116_v13  ;;  %1699 = vmatpush1.msra.mxu1 %v7117_v14  ;;  %v7201_v13 = vld [vmem:[#allocation43_spill] sm:$0xff]  ;;  %v7202_v14 = vld [vmem:[#allocation44_spill] sm:$0xff] }
 0x31c   :  { %1629 = vmatprep.subr.mxu0 %v7118_v15  ;;  %1700 = vmatprep.subr.mxu1 %v7119_v16  ;;  %v7203_v15 = vld [vmem:[#allocation45_spill] sm:$0xff]  ;;  %v7204_v16 = vld [vmem:[#allocation46_spill] sm:$0xff] }
 0x31d   :  { %1630 = vmatpush1.msra.mxu0 %v7120_v57  ;;  %1701 = vmatpush1.msra.mxu1 %v7121_v12  ;;  %v7205_v57 = vld [vmem:[#allocation47_spill] sm:$0xff]  ;;  %v7206_v12 = vld [vmem:[#allocation48_spill] sm:$0xff] }
 0x31e   :  { %1631 = vmatprep.subr.mxu0 %v7122_v17  ;;  %1702 = vmatprep.subr.mxu1 %v7123_v60  ;;  %v7207_v17 = vld [vmem:[#allocation49_spill] sm:$0xff]  ;;  %v7208_v60 = vld [vmem:[#allocation50_spill] sm:$0xff] }
 0x31f   :  { %1632 = vmatpush1.msra.mxu0 %v7124_v3  ;;  %1703 = vmatpush1.msra.mxu1 %v7125_v55  ;;  %v7209_v3 = vld [vmem:[#allocation51_spill] sm:$0xff]  ;;  %v7210_v55 = vld [vmem:[#allocation52_spill] sm:$0xff] }
 0x320   :  { %1633 = vmatprep.subr.mxu0 %v4789_v38  ;;  %1704 = vmatprep.subr.mxu1 %v7126_v1  ;;  %v7192_v38 = vld [vmem:[#allocation34_spill] sm:$0xff]  ;;  %v7211_v1 = vld [vmem:[#allocation53_spill] sm:$0xff] }
 0x321   :  { %1634 = vmatpush1.msra.mxu0 %v4795_v34  ;;  %1705 = vmatpush1.msra.mxu1 %v4797_v31  ;;  %v7186_v31 = vld [vmem:[#allocation28_spill] sm:$0xff]  ;;  %v7189_v34 = vld [vmem:[#allocation31_spill] sm:$0xff] }
 0x322   :  { %1635 = vmatprep.subr.mxu0 %v4801_v30  ;;  %1706 = vmatprep.subr.mxu1 %v4803_v32  ;;  %v7185_v30 = vld [vmem:[#allocation27_spill] sm:$0xff]  ;;  %v7187_v32 = vld [vmem:[#allocation29_spill] sm:$0xff] }
 0x323   :  { %1636 = vmatpush1.msra.mxu0 %v4807_v37  ;;  %1707 = vmatpush1.msra.mxu1 %v4809_v41  ;;  %v7191_v37 = vld [vmem:[#allocation33_spill] sm:$0xff]  ;;  %v7194_v41 = vld [vmem:[#allocation36_spill] sm:$0xff] }
 0x324   :  { %1637 = vmatprep.subr.mxu0 %v4813_v40  ;;  %1708 = vmatprep.subr.mxu1 %v4815_v0  ;;  %v7184_v0 = vld [vmem:[#allocation26_spill] sm:$0xff]  ;;  %v7193_v40 = vld [vmem:[#allocation35_spill] sm:$0xff] }
 0x325   :  { %1638 = vmatpush1.msra.mxu0 %v4819_v33  ;;  %1671 = vmatprep.mubr.f32.mxu0 %v6954_v42  ;;  %v7188_v33 = vld [vmem:[#allocation30_spill] sm:$0xff] }
 0x326   :  { %1709 = vmatpush1.msra.mxu1 %v4823_v35  ;;  %1742 = vmatprep.mubr.f32.mxu1 %v6954_v42  ;;  %v7190_v35 = vld [vmem:[#allocation32_spill] sm:$0xff] }
 0x327   :  { %1672 = vmatmul.mubr.f32.vlgmr.msra.gmra.mxu0 %v5258_v22  ;;  %1743 = vmatmul.mubr.f32.vlgmr.msra.gmra.mxu1 %v5258_v22  ;;  %v7212_v22 = vld [vmem:[#allocation54_spill] sm:$0xff] }
 0x328   :  { %1816 = vmatprep.subr.mxu0 %v5098_v2  ;;  %1887 = vmatprep.subr.mxu1 %v5101_v58 }
 0x329   :  { %1817 = vmatpush1.msra.mxu0 %v5104_v61  ;;  %1888 = vmatpush1.msra.mxu1 %v5107_v62 }
 0x32a   :  { %1818 = vmatprep.subr.mxu0 %v7184_v0  ;;  %1889 = vmatprep.subr.mxu1 %v7185_v30 }
 0x32b   :  { %1819 = vmatpush1.msra.mxu0 %v7186_v31  ;;  %1890 = vmatpush1.msra.mxu1 %v7187_v32 }
 0x32c   :  { %1820 = vmatprep.subr.mxu0 %v7188_v33  ;;  %1891 = vmatprep.subr.mxu1 %v7189_v34 }
 0x32d   :  { %1821 = vmatpush1.msra.mxu0 %v7190_v35  ;;  %1892 = vmatpush1.msra.mxu1 %v7191_v37 }
 0x32e   :  { %1822 = vmatprep.subr.mxu0 %v7192_v38  ;;  %1893 = vmatprep.subr.mxu1 %v7193_v40 }
 0x32f   :  { %1823 = vmatpush1.msra.mxu0 %v7194_v41  ;;  %1894 = vmatpush1.msra.mxu1 %v7195_v59 }
 0x330   :  { %1824 = vmatprep.subr.mxu0 %v7196_v10  ;;  %1895 = vmatprep.subr.mxu1 %v7197_v54 }
 0x331   :  { %1825 = vmatpush1.msra.mxu0 %v7198_v53  ;;  %1896 = vmatpush1.msra.mxu1 %v7199_v4 }
 0x332   :  { %1826 = vmatprep.subr.mxu0 %v7200_v11  ;;  %1897 = vmatprep.subr.mxu1 %v7201_v13 }
 0x333   :  { %1827 = vmatpush1.msra.mxu0 %v7202_v14  ;;  %1898 = vmatpush1.msra.mxu1 %v7203_v15  ;;  %v7213_v14 = vld [vmem:[#allocation55_spill] sm:$0xff] }
 0x334   :  { %1828 = vmatprep.subr.mxu0 %v7204_v16  ;;  %1899 = vmatprep.subr.mxu1 %v7205_v57 }
 0x335   :  { %1829 = vmatpush1.msra.mxu0 %v7206_v12  ;;  %1900 = vmatpush1.msra.mxu1 %v7207_v17 }
 0x336   :  { %1830 = vmatprep.subr.mxu0 %v7208_v60  ;;  %1901 = vmatprep.subr.mxu1 %v7209_v3  ;;  %v5436_v3 = vld [vmem:[#allocation6 + $0x148] sm:$0xff]  ;;  %v7241_v60 = vld [vmem:[#allocation99_spill] sm:$0xff] }
 0x337   :  { %1831 = vmatpush1.msra.mxu0 %v7210_v55  ;;  %1902 = vmatpush1.msra.mxu1 %v7211_v1  ;;  %7214 = vst [vmem:[#allocation73_spill] sm:$0xff] %v5436_v3  ;;  %v5439_v1 = vld [vmem:[#allocation6 + $0x158] sm:$0xff] }
 0x338   :  { %1832 = vmatprep.subr.mxu0 %v7212_v22  ;;  %1903 = vmatprep.subr.mxu1 %v7213_v14  ;;  %7215 = vst [vmem:[#allocation74_spill] sm:$0xff] %v5439_v1  ;;  %v5442_v14 = vld [vmem:[#allocation6 + $0x140] sm:$0xff] }
 0x339   :  { %1833 = vmatpush1.msra.mxu0 %v5200_v6  ;;  %1904 = vmatpush1.msra.mxu1 %v5203_v63  ;;  %7216 = vst [vmem:[#allocation75_spill] sm:$0xff] %v5442_v14  ;;  %v5445_v63 = vld [vmem:[#allocation6 + $0x150] sm:$0xff]  ;;  %v7240_v6 = vld [vmem:[#allocation16_spill] sm:$0xff] }
 0x33a   :  { %1834 = vmatprep.subr.mxu0 %v5206_v7  ;;  %1905 = vmatprep.subr.mxu1 %v5209_v56  ;;  %7217 = vst [vmem:[#allocation76_spill] sm:$0xff] %v5445_v63  ;;  %v5448_v56 = vld [vmem:[#allocation6 + $0x108] sm:$0xff] }
 0x33b   :  { %1835 = vmatpush1.msra.mxu0 %v5212_v8  ;;  %1906 = vmatpush1.msra.mxu1 %v5215_v9  ;;  %7218 = vst [vmem:[#allocation24_spill] sm:$0xff] %v5448_v56  ;;  %v5451_v9 = vld [vmem:[#allocation6 + $0x118] sm:$0xff] }
 0x33c   :  { %1836 = vmatprep.subr.mxu0 %v5436_v3  ;;  %1907 = vmatprep.subr.mxu1 %v5439_v1  ;;  %7219 = vst [vmem:[#allocation25_spill] sm:$0xff] %v5451_v9  ;;  %v5454_v3 = vld [vmem:[#allocation6 + $0x100] sm:$0xff]  ;;  %v5457_v1 = vld [vmem:[#allocation6 + $0x110] sm:$0xff] }
 0x33d   :  { %1837 = vmatpush1.msra.mxu0 %v5442_v14  ;;  %1908 = vmatpush1.msra.mxu1 %v5445_v63  ;;  %7220 = vst [vmem:[#allocation12_spill] sm:$0xff] %v5454_v3  ;;  %7221 = vst [vmem:[#allocation95_spill] sm:$0xff] %v5457_v1  ;;  %v5460_v14 = vld [vmem:[#allocation6 + $0xc8] sm:$0xff]  ;;  %v5463_v63 = vld [vmem:[#allocation6 + $0xd8] sm:$0xff] }
 0x33e   :  { %1838 = vmatprep.subr.mxu0 %v5448_v56  ;;  %1909 = vmatprep.subr.mxu1 %v5451_v9  ;;  %7222 = vst [vmem:[#allocation96_spill] sm:$0xff] %v5460_v14  ;;  %7223 = vst [vmem:[#allocation93_spill] sm:$0xff] %v5463_v63  ;;  %v5466_v56 = vld [vmem:[#allocation6 + $0xc0] sm:$0xff]  ;;  %v5469_v9 = vld [vmem:[#allocation6 + $0xd0] sm:$0xff] }
 0x33f   :  { %1839 = vmatpush1.msra.mxu0 %v5454_v3  ;;  %1910 = vmatpush1.msra.mxu1 %v5457_v1  ;;  %7224 = vst [vmem:[#allocation13_spill] sm:$0xff] %v5466_v56  ;;  %7225 = vst [vmem:[#allocation94_spill] sm:$0xff] %v5469_v9  ;;  %v5472_v3 = vld [vmem:[#allocation6 + $0x88] sm:$0xff]  ;;  %v5475_v1 = vld [vmem:[#allocation6 + $0x98] sm:$0xff] }
 0x340   :  { %1840 = vmatprep.subr.mxu0 %v5460_v14  ;;  %1911 = vmatprep.subr.mxu1 %v5463_v63  ;;  %7226 = vst [vmem:[#allocation14_spill] sm:$0xff] %v5472_v3  ;;  %7227 = vst [vmem:[#allocation15_spill] sm:$0xff] %v5475_v1  ;;  %v5478_v14 = vld [vmem:[#allocation6 + $0x80] sm:$0xff]  ;;  %v5481_v63 = vld [vmem:[#allocation6 + $0x90] sm:$0xff] }
 0x341   :  { %1841 = vmatpush1.msra.mxu0 %v5466_v56  ;;  %1912 = vmatpush1.msra.mxu1 %v5469_v9  ;;  %7228 = vst [vmem:[#allocation26_spill] sm:$0xff] %v5478_v14  ;;  %7229 = vst [vmem:[#allocation27_spill] sm:$0xff] %v5481_v63  ;;  %v5484_v56 = vld [vmem:[#allocation6 + $0x48] sm:$0xff]  ;;  %v5487_v9 = vld [vmem:[#allocation6 + $0x58] sm:$0xff] }
 0x342   :  { %1842 = vmatprep.subr.mxu0 %v5472_v3  ;;  %1913 = vmatprep.subr.mxu1 %v5475_v1  ;;  %7230 = vst [vmem:[#allocation28_spill] sm:$0xff] %v5484_v56  ;;  %7231 = vst [vmem:[#allocation29_spill] sm:$0xff] %v5487_v9  ;;  %v5490_v3 = vld [vmem:[#allocation6 + $0x40] sm:$0xff]  ;;  %v5493_v1 = vld [vmem:[#allocation6 + $0x50] sm:$0xff] }
 0x343   :  { %1843 = vmatpush1.msra.mxu0 %v5478_v14  ;;  %1914 = vmatpush1.msra.mxu1 %v5481_v63  ;;  %7232 = vst [vmem:[#allocation30_spill] sm:$0xff] %v5490_v3  ;;  %7233 = vst [vmem:[#allocation31_spill] sm:$0xff] %v5493_v1  ;;  %v5496_v14 = vld [vmem:[#allocation6 + $0x8] sm:$0xff]  ;;  %v5499_v63 = vld [vmem:[#allocation6 + $0x18] sm:$0xff] }
 0x344   :  { %1844 = vmatprep.subr.mxu0 %v5484_v56  ;;  %1915 = vmatprep.subr.mxu1 %v5487_v9  ;;  %7234 = vst [vmem:[#allocation32_spill] sm:$0xff] %v5496_v14  ;;  %7235 = vst [vmem:[#allocation33_spill] sm:$0xff] %v5499_v63  ;;  %v5502_v56 = vld [vmem:[#allocation6] sm:$0xff]  ;;  %v5505_v9 = vld [vmem:[#allocation6 + $0x10] sm:$0xff] }
 0x345   :  { %1845 = vmatpush1.msra.mxu0 %v5490_v3  ;;  %1916 = vmatpush1.msra.mxu1 %v5493_v1  ;;  %7236 = vst [vmem:[#allocation34_spill] sm:$0xff] %v5502_v56  ;;  %7237 = vst [vmem:[#allocation35_spill] sm:$0xff] %v5505_v9  ;;  %v5510_v1 = vld [vmem:[#allocation6 + $0x3e8] sm:$0xff] }
 0x346   :  { %1846 = vmatprep.subr.mxu0 %v5496_v14  ;;  %1917 = vmatprep.subr.mxu1 %v5499_v63  ;;  %7238 = vst [vmem:[#allocation36_spill] sm:$0xff] %v5510_v1  ;;  %v5513_v14 = vld [vmem:[#allocation6 + $0x3f8] sm:$0xff] }
 0x347   :  { %1847 = vmatpush1.msra.mxu0 %v5502_v56  ;;  %1918 = vmatpush1.msra.mxu1 %v5505_v9  ;;  %7239 = vst [vmem:[#allocation37_spill] sm:$0xff] %v5513_v14 }
 0x348   :  { %1880 = vmatprep.mubr.f32.mxu0 %v6954_v42  ;;  %1951 = vmatprep.mubr.f32.mxu1 %v6954_v42 }
 0x349   :  { %1958 = vmatprep.subr.mxu0 %v5510_v1  ;;  %2029 = vmatprep.subr.mxu1 %v5513_v14  ;;  %v7242_v1 = vld [vmem:[#allocation100_spill] sm:$0xff]  ;;  %v7243_v14 = vld [vmem:[#allocation97_spill] sm:$0xff] }
 0x3c6   :  { %v1602_v63 = vpop.f32.mrf.mxu1  ;;  %v1531_v3 = vpop.f32.mrf.mxu0 }
 0x3c7   :  { %v1749_v22 = vadd.f32 %v1531_v3, %v7240_v6  ;;  %v7244_v6 = vld [vmem:[#allocation17_spill] sm:$0xff] }
 0x3c8   :  { %v1604_v8 = vpop.f32.mrf.mxu1  ;;  %v1533_v56 = vpop.f32.mrf.mxu0  ;;  %v1751_v3 = vadd.f32 %v1602_v63, %v7244_v6 }
 0x3c9   :  { %v3627_v57 = vmul.f32 -1.442695, %v1749_v22 }
 0x3e7   :  { %v1744_v7 = vpop.f32.mrf.mxu1  ;;  %v1673_v9 = vpop.f32.mrf.mxu0 }
 0x3e8   :  { %v1755_v11 = vadd.f32 %v1744_v7, %v7243_v14  ;;  %v7246_v7 = vld [vmem:[#allocation18_spill] sm:$0xff] }
 0x3e9   :  { %v1746_v55 = vpop.f32.mrf.mxu1  ;;  %v1675_v16 = vpop.f32.mrf.mxu0 }
 0x3ea   :  { %v1756_v17 = vadd.f32 %v1746_v55, %v7241_v60  ;;  %v1754_v15 = vadd.f32 %v1675_v16, %v7242_v1  ;;  %v3628_v60 = vmul.f32 -1.442695, %v1751_v3  ;;  %v7245_v55 = vld [vmem:[#allocation98_spill] sm:$0xff] }
 0x3eb   :  { %v1753_v16 = vadd.f32 %v1673_v9, %v7245_v55 }
 0x3ec   :  { %v3630_v12 = vmul.f32 -1.442695, %v1756_v17  ;;  %v3629_v13 = vmul.f32 -1.442695, %v1754_v15 }
 0x3ee   :  { %3735 = vpow2.f32 %v3630_v12 }
 0x3ef   :  { %3737 = vpow2.f32 %v3627_v57 }
 0x3f0   :  { %3739 = vpow2.f32 %v3629_v13 }
 0x3f1   :  { %3741 = vtanh.f32 %v1755_v11 }
 0x3fb   :  { %v3736_v4 = vpop.eup %3735 }
 0x3fc   :  { %v1782_v53 = vadd.f32 1.0, %v3736_v4  ;;  %v3738_v54 = vpop.eup %3737  ;;  %v1750_v4 = vadd.f32 %v1533_v56, %v7246_v7 }
 0x3fd   :  { %v1760_v10 = vadd.f32 1.0, %v3738_v54  ;;  %v3740_v17 = vpop.eup %3739 }
 0x3fe   :  { %3743 = vrcp.f32 %v1782_v53  ;;  %v1775_v12 = vadd.f32 1.0, %v3740_v17  ;;  %v3742_v57 = vpop.eup %3741  ;;  %v1763_v63 = vmax.f32 %v1750_v4, 0.0 }
 0x3ff   :  { %3745 = vrcp.f32 %v1760_v10 }
 0x400   :  { %3747 = vpow2.f32 %v3628_v60  ;;  %v7247_v60 = vld [vmem:[#allocation19_spill] sm:$0xff] }
 0x401   :  { %3749 = vrcp.f32 %v1775_v12  ;;  %v1752_v17 = vadd.f32 %v1604_v8, %v7247_v60  ;;  %v7256_v60 = vld [vmem:[#allocation70_spill] sm:$0xff] }
 0x402   :  { %3751 = vtanh.f32 %v1753_v16 }
 0x403   :  { %v1770_v16 = vmax.f32 %v1752_v17, 0.0  ;;  %v7257_v17 = vld [vmem:[#allocation71_spill] sm:$0xff] }
 0x40b   :  { %v3744_v15 = vpop.eup %3743 }
 0x40c   :  { %v1791_v13 = vadd.f32 %v3744_v15, %v3742_v57  ;;  %v3746_v11 = vpop.eup %3745 }
 0x40d   :  { %v3748_v53 = vpop.eup %3747  ;;  %v1785_v54 = vmul.f32 %v3746_v11, %v1763_v63 }
 0x40e   :  { %v3631_v14 = vmul.f32 -1.442695, %v1791_v13  ;;  %v1767_v1 = vadd.f32 1.0, %v3748_v53  ;;  %v3750_v22 = vpop.eup %3749 }
 0x40f   :  { %v3752_v10 = vpop.eup %3751 }
 0x410   :  { %3753 = vpow2.f32 %v3631_v14  ;;  %v1789_v6 = vmul.f32 %v3752_v10, %v3750_v22  ;;  %v7251_v22 = vld [vmem:[#allocation65_spill] sm:$0xff]  ;;  %v7252_v10 = vld [vmem:[#allocation66_spill] sm:$0xff] }
 0x411   :  { %3755 = vtanh.f32 %v1785_v54  ;;  %v7249_v54 = vld [vmem:[#allocation63_spill] sm:$0xff] }
 0x412   :  { %3757 = vrcp.f32 %v1767_v1  ;;  %v7250_v1 = vld [vmem:[#allocation64_spill] sm:$0xff] }
 0x413   :  { %3759 = vtanh.f32 %v1789_v6  ;;  %v7253_v6 = vld [vmem:[#allocation67_spill] sm:$0xff] }
 0x41d   :  { %v3754_v9 = vpop.eup %3753 }
 0x41e   :  { %v1795_v3 = vadd.f32 1.0, %v3754_v9  ;;  %v3756_v12 = vpop.eup %3755  ;;  %v7254_v9 = vld [vmem:[#allocation68_spill] sm:$0xff] }
 0x41f   :  { %v3758_v56 = vpop.eup %3757  ;;  %v1798_v55 = vadd.f32 %v3756_v12, %v5255_v46  ;;  %v7248_v46 = vld [vmem:[#allocation62_spill] sm:$0xff]  ;;  %v7258_v12 = vld [vmem:[#allocation72_spill] sm:$0xff] }
 0x420   :  { %3761 = vrcp.f32 %v1795_v3  ;;  %v1787_v57 = vadd.f32 %v3758_v56, %v1770_v16  ;;  %v3760_v15 = vpop.eup %3759  ;;  %v7255_v3 = vld [vmem:[#allocation69_spill] sm:$0xff]  ;;  %v5566_v56 = vld [vmem:[#allocation6 + $0x1a8] sm:$0xff]  ;;  %v5572_v16 = vld [vmem:[#allocation6 + $0x1a0] sm:$0xff] }
 0x421   :  { %3763 = vtanh.f32 %v1798_v55  ;;  %v5569_v55 = vld [vmem:[#allocation6 + $0x1b8] sm:$0xff] }
 0x422   :  { %3765 = vtanh.f32 %v1787_v57  ;;  %v5575_v57 = vld [vmem:[#allocation6 + $0x1b0] sm:$0xff] }
 0x42d   :  { %v3762_v13 = vpop.eup %3761 }
 0x42e   :  { %v1801_v7 = vadd.f32 %v3762_v13, %v3760_v15  ;;  %v3764_v4 = vpop.eup %3763  ;;  %v5578_v15 = vld [vmem:[#allocation6 + $0x168] sm:$0xff]  ;;  %v5581_v13 = vld [vmem:[#allocation6 + $0x178] sm:$0xff] }
 0x42f   :  { %v3766_v14 = vpop.eup %3765  ;;  %7259 = vst [vmem:[#allocation16_spill] sm:$0xff] %v5581_v13 }
 0x430   :  { %3767 = vtanh.f32 %v1801_v7  ;;  %v5525_v11 = vmul.f32 %v3766_v14, %v3764_v4  ;;  %v5584_v7 = vld [vmem:[#allocation6 + $0x160] sm:$0xff]  ;;  %v5587_v4 = vld [vmem:[#allocation6 + $0x170] sm:$0xff]  ;;  %v5590_v14 = vld [vmem:[#allocation6 + $0x128] sm:$0xff] }
 0x431   :  { %7260 = vst [vmem:[#allocation99_spill] sm:$0xff] %v5584_v7  ;;  %7261 = vst [vmem:[#allocation100_spill] sm:$0xff] %v5587_v4 }
 0x432   :  { %7262 = vst [vmem:[#allocation97_spill] sm:$0xff] %v5590_v14 }
 0x43d   :  { %v3768_v63 = vpop.eup %3767 }
 0x43e   :  { %v1803_v53 = vmul.f32 %v3768_v63, %v5525_v11  ;;  %v5593_v63 = vld [vmem:[#allocation6 + $0x138] sm:$0xff] }
 0x43f   :  { %7263 = vst [vmem:[#allocation17_spill] sm:$0xff] %v5593_v63 }
 0x440   :  { %3769 = vtanh.f32 %v1803_v53  ;;  %v5596_v53 = vld [vmem:[#allocation6 + $0x120] sm:$0xff] }
 0x441   :  { %7264 = vst [vmem:[#allocation98_spill] sm:$0xff] %v5596_v53 }
 0x44d   :  { %v5528_v8 = vpop.eup %3769 }
 0x44e   :  { %1881 = vmatmul.mubr.f32.vlgmr.msra.gmra.mxu0 %v5528_v8  ;;  %1952 = vmatmul.mubr.f32.vlgmr.msra.gmra.mxu1 %v5528_v8 }
 0x44f   :  { %1959 = vmatpush1.msra.mxu0 %v5262_v5  ;;  %2030 = vmatpush1.msra.mxu1 %v5265_v48 }
 0x450   :  { %1960 = vmatprep.subr.mxu0 %v5268_v49  ;;  %2031 = vmatprep.subr.mxu1 %v5271_v50 }
 0x451   :  { %1961 = vmatpush1.msra.mxu0 %v5274_v51  ;;  %2032 = vmatpush1.msra.mxu1 %v5277_v52 }
 0x452   :  { %1962 = vmatprep.subr.mxu0 %v5280_v18  ;;  %2033 = vmatprep.subr.mxu1 %v5283_v27 }
 0x453   :  { %1963 = vmatpush1.msra.mxu0 %v5286_v19  ;;  %2034 = vmatpush1.msra.mxu1 %v5289_v21 }
 0x454   :  { %1964 = vmatprep.subr.mxu0 %v5292_v25  ;;  %2035 = vmatprep.subr.mxu1 %v5295_v28 }
 0x455   :  { %1965 = vmatpush1.msra.mxu0 %v5298_v23  ;;  %2036 = vmatpush1.msra.mxu1 %v5301_v26 }
 0x456   :  { %1966 = vmatprep.subr.mxu0 %v5304_v29  ;;  %2037 = vmatprep.subr.mxu1 %v5307_v36 }
 0x457   :  { %1967 = vmatpush1.msra.mxu0 %v5310_v39  ;;  %2038 = vmatpush1.msra.mxu1 %v7248_v46 }
 0x458   :  { %1968 = vmatprep.subr.mxu0 %v7249_v54  ;;  %2039 = vmatprep.subr.mxu1 %v7250_v1 }
 0x459   :  { %1969 = vmatpush1.msra.mxu0 %v7251_v22  ;;  %2040 = vmatpush1.msra.mxu1 %v7252_v10 }
 0x45a   :  { %1970 = vmatprep.subr.mxu0 %v7253_v6  ;;  %2041 = vmatprep.subr.mxu1 %v7254_v9 }
 0x45b   :  { %1971 = vmatpush1.msra.mxu0 %v7255_v3  ;;  %2042 = vmatpush1.msra.mxu1 %v7256_v60 }
 0x45c   :  { %1972 = vmatprep.subr.mxu0 %v7257_v17  ;;  %2043 = vmatprep.subr.mxu1 %v7258_v12 }
 0x45d   :  { %1973 = vmatpush1.msra.mxu0 %v5346_v20  ;;  %2044 = vmatpush1.msra.mxu1 %v5349_v43 }
 0x45e   :  { %1974 = vmatprep.subr.mxu0 %v5352_v44  ;;  %2045 = vmatprep.subr.mxu1 %v5355_v24 }
 0x45f   :  { %1975 = vmatpush1.msra.mxu0 %v5358_v45  ;;  %2046 = vmatpush1.msra.mxu1 %v5361_v47 }
 0x460   :  { %1976 = vmatprep.subr.mxu0 %v5566_v56  ;;  %2047 = vmatprep.subr.mxu1 %v5569_v55 }
 0x461   :  { %1977 = vmatpush1.msra.mxu0 %v5572_v16  ;;  %2048 = vmatpush1.msra.mxu1 %v5575_v57 }
 0x462   :  { %1978 = vmatprep.subr.mxu0 %v5578_v15  ;;  %2049 = vmatprep.subr.mxu1 %v5581_v13  ;;  %v5599_v13 = vld [vmem:[#allocation6 + $0x130] sm:$0xff] }
 0x463   :  { %1979 = vmatpush1.msra.mxu0 %v5584_v7  ;;  %2050 = vmatpush1.msra.mxu1 %v5587_v4  ;;  %7265 = vst [vmem:[#allocation18_spill] sm:$0xff] %v5599_v13  ;;  %v5602_v7 = vld [vmem:[#allocation6 + $0xe8] sm:$0xff]  ;;  %v5605_v4 = vld [vmem:[#allocation6 + $0xf8] sm:$0xff] }
 0x464   :  { %1980 = vmatprep.subr.mxu0 %v5590_v14  ;;  %2051 = vmatprep.subr.mxu1 %v5593_v63  ;;  %7266 = vst [vmem:[#allocation19_spill] sm:$0xff] %v5602_v7  ;;  %7267 = vst [vmem:[#allocation62_spill] sm:$0xff] %v5605_v4  ;;  %v5608_v14 = vld [vmem:[#allocation6 + $0xe0] sm:$0xff]  ;;  %v5611_v63 = vld [vmem:[#allocation6 + $0xf0] sm:$0xff] }
 0x465   :  { %1981 = vmatpush1.msra.mxu0 %v5596_v53  ;;  %2052 = vmatpush1.msra.mxu1 %v5599_v13  ;;  %7268 = vst [vmem:[#allocation63_spill] sm:$0xff] %v5608_v14  ;;  %7269 = vst [vmem:[#allocation64_spill] sm:$0xff] %v5611_v63  ;;  %v5614_v53 = vld [vmem:[#allocation6 + $0xa8] sm:$0xff]  ;;  %v5617_v13 = vld [vmem:[#allocation6 + $0xb8] sm:$0xff] }
 0x466   :  { %1982 = vmatprep.subr.mxu0 %v5602_v7  ;;  %2053 = vmatprep.subr.mxu1 %v5605_v4  ;;  %7270 = vst [vmem:[#allocation65_spill] sm:$0xff] %v5614_v53  ;;  %7271 = vst [vmem:[#allocation66_spill] sm:$0xff] %v5617_v13  ;;  %v5620_v7 = vld [vmem:[#allocation6 + $0xa0] sm:$0xff]  ;;  %v5623_v4 = vld [vmem:[#allocation6 + $0xb0] sm:$0xff] }
 0x467   :  { %1983 = vmatpush1.msra.mxu0 %v5608_v14  ;;  %2054 = vmatpush1.msra.mxu1 %v5611_v63  ;;  %7272 = vst [vmem:[#allocation67_spill] sm:$0xff] %v5620_v7  ;;  %7273 = vst [vmem:[#allocation68_spill] sm:$0xff] %v5623_v4  ;;  %v5626_v14 = vld [vmem:[#allocation6 + $0x68] sm:$0xff]  ;;  %v5629_v63 = vld [vmem:[#allocation6 + $0x78] sm:$0xff] }
 0x468   :  { %1984 = vmatprep.subr.mxu0 %v5614_v53  ;;  %2055 = vmatprep.subr.mxu1 %v5617_v13  ;;  %7274 = vst [vmem:[#allocation69_spill] sm:$0xff] %v5626_v14  ;;  %7275 = vst [vmem:[#allocation70_spill] sm:$0xff] %v5629_v63  ;;  %v5632_v53 = vld [vmem:[#allocation6 + $0x60] sm:$0xff]  ;;  %v5635_v13 = vld [vmem:[#allocation6 + $0x70] sm:$0xff] }
 0x469   :  { %1985 = vmatpush1.msra.mxu0 %v5620_v7  ;;  %2056 = vmatpush1.msra.mxu1 %v5623_v4  ;;  %7276 = vst [vmem:[#allocation71_spill] sm:$0xff] %v5635_v13  ;;  %v5638_v7 = vld [vmem:[#allocation6 + $0x28] sm:$0xff]  ;;  %v5641_v4 = vld [vmem:[#allocation6 + $0x38] sm:$0xff] }
 0x46a   :  { %1986 = vmatprep.subr.mxu0 %v5626_v14  ;;  %2057 = vmatprep.subr.mxu1 %v5629_v63  ;;  %7277 = vst [vmem:[#allocation72_spill] sm:$0xff] %v5638_v7  ;;  %7278 = vst [vmem:[#allocation121_spill] sm:$0xff] %v5641_v4  ;;  %v5644_v14 = vld [vmem:[#allocation6 + $0x20] sm:$0xff]  ;;  %v5648_v63 = vld [vmem:[#allocation6 + $0x30] sm:$0xff] }
 0x46b   :  { %1987 = vmatpush1.msra.mxu0 %v5632_v53  ;;  %2058 = vmatpush1.msra.mxu1 %v5635_v13  ;;  %7279 = vst [vmem:[#allocation122_spill] sm:$0xff] %v5644_v14  ;;  %7280 = vst [vmem:[#allocation123_spill] sm:$0xff] %v5648_v63 }
 0x46c   :  { %1988 = vmatprep.subr.mxu0 %v5638_v7  ;;  %2059 = vmatprep.subr.mxu1 %v5641_v4 }
 0x46d   :  { %1989 = vmatpush1.msra.mxu0 %v5644_v14  ;;  %2022 = vmatprep.mubr.f32.mxu0 %v6954_v42 }
 0x46e   :  { %2060 = vmatpush1.msra.mxu1 %v5648_v63  ;;  %2093 = vmatprep.mubr.f32.mxu1 %v6954_v42 }
 0x46f   :  { %2023 = vmatmul.mubr.f32.vlgmr.msra.gmra.mxu0 %v5528_v8  ;;  %2094 = vmatmul.mubr.f32.vlgmr.msra.gmra.mxu1 %v5528_v8  ;;  %v7297_v8 = vld [vmem:[#allocation54_spill] sm:$0xff] }
 0x470   :  { %2167 = vmatprep.subr.mxu0 %v5098_v2  ;;  %2238 = vmatprep.subr.mxu1 %v5101_v58  ;;  %v7281_v2 = vld [vmem:[#allocation38_spill] sm:$0xff]  ;;  %v7282_v58 = vld [vmem:[#allocation39_spill] sm:$0xff] }
 0x471   :  { %2168 = vmatpush1.msra.mxu0 %v5104_v61  ;;  %2239 = vmatpush1.msra.mxu1 %v5107_v62  ;;  %v7283_v61 = vld [vmem:[#allocation40_spill] sm:$0xff]  ;;  %v7284_v62 = vld [vmem:[#allocation41_spill] sm:$0xff] }
 0x472   :  { %2169 = vmatprep.subr.mxu0 %v7184_v0  ;;  %2240 = vmatprep.subr.mxu1 %v7185_v30  ;;  %v7285_v0 = vld [vmem:[#allocation42_spill] sm:$0xff]  ;;  %v7286_v30 = vld [vmem:[#allocation43_spill] sm:$0xff] }
 0x473   :  { %2170 = vmatpush1.msra.mxu0 %v7186_v31  ;;  %2241 = vmatpush1.msra.mxu1 %v7187_v32  ;;  %v7287_v31 = vld [vmem:[#allocation44_spill] sm:$0xff]  ;;  %v7288_v32 = vld [vmem:[#allocation45_spill] sm:$0xff] }
 0x474   :  { %2171 = vmatprep.subr.mxu0 %v7188_v33  ;;  %2242 = vmatprep.subr.mxu1 %v7189_v34  ;;  %v7289_v33 = vld [vmem:[#allocation46_spill] sm:$0xff]  ;;  %v7290_v34 = vld [vmem:[#allocation47_spill] sm:$0xff] }
 0x475   :  { %2172 = vmatpush1.msra.mxu0 %v7190_v35  ;;  %2243 = vmatpush1.msra.mxu1 %v7191_v37  ;;  %v7291_v35 = vld [vmem:[#allocation48_spill] sm:$0xff]  ;;  %v7292_v37 = vld [vmem:[#allocation49_spill] sm:$0xff] }
 0x476   :  { %2173 = vmatprep.subr.mxu0 %v7192_v38  ;;  %2244 = vmatprep.subr.mxu1 %v7193_v40  ;;  %v7293_v38 = vld [vmem:[#allocation50_spill] sm:$0xff]  ;;  %v7294_v40 = vld [vmem:[#allocation51_spill] sm:$0xff] }
 0x477   :  { %2174 = vmatpush1.msra.mxu0 %v7194_v41  ;;  %2245 = vmatpush1.msra.mxu1 %v7195_v59  ;;  %v7295_v41 = vld [vmem:[#allocation52_spill] sm:$0xff]  ;;  %v7296_v59 = vld [vmem:[#allocation53_spill] sm:$0xff] }
 0x478   :  { %2175 = vmatprep.subr.mxu0 %v7281_v2  ;;  %2246 = vmatprep.subr.mxu1 %v7282_v58  ;;  %v7298_v2 = vld [vmem:[#allocation55_spill] sm:$0xff]  ;;  %v7299_v58 = vld [vmem:[#allocation56_spill] sm:$0xff] }
 0x479   :  { %2176 = vmatpush1.msra.mxu0 %v7283_v61  ;;  %2247 = vmatpush1.msra.mxu1 %v7284_v62  ;;  %v7300_v61 = vld [vmem:[#allocation57_spill] sm:$0xff]  ;;  %v7301_v62 = vld [vmem:[#allocation58_spill] sm:$0xff] }
 0x47a   :  { %2177 = vmatprep.subr.mxu0 %v7285_v0  ;;  %2248 = vmatprep.subr.mxu1 %v7286_v30  ;;  %v7302_v0 = vld [vmem:[#allocation59_spill] sm:$0xff]  ;;  %v7303_v30 = vld [vmem:[#allocation60_spill] sm:$0xff] }
 0x47b   :  { %2178 = vmatpush1.msra.mxu0 %v7287_v31  ;;  %2249 = vmatpush1.msra.mxu1 %v7288_v32  ;;  %v7304_v31 = vld [vmem:[#allocation61_spill] sm:$0xff] }
 0x47c   :  { %2179 = vmatprep.subr.mxu0 %v7289_v33  ;;  %2250 = vmatprep.subr.mxu1 %v7290_v34  ;;  %v7305_v32 = vld [vmem:[#allocation73_spill] sm:$0xff]  ;;  %v7306_v33 = vld [vmem:[#allocation74_spill] sm:$0xff]  ;;  %v7307_v34 = vld [vmem:[#allocation75_spill] sm:$0xff] }
 0x47d   :  { %2180 = vmatpush1.msra.mxu0 %v7291_v35  ;;  %2251 = vmatpush1.msra.mxu1 %v7292_v37  ;;  %v7308_v35 = vld [vmem:[#allocation76_spill] sm:$0xff] }
 0x47e   :  { %2181 = vmatprep.subr.mxu0 %v7293_v38  ;;  %2252 = vmatprep.subr.mxu1 %v7294_v40  ;;  %v7309_v37 = vld [vmem:[#allocation24_spill] sm:$0xff]  ;;  %v7310_v38 = vld [vmem:[#allocation25_spill] sm:$0xff] }
 0x47f   :  { %2182 = vmatpush1.msra.mxu0 %v7295_v41  ;;  %2253 = vmatpush1.msra.mxu1 %v7296_v59  ;;  %v7311_v40 = vld [vmem:[#allocation12_spill] sm:$0xff]  ;;  %v7312_v41 = vld [vmem:[#allocation95_spill] sm:$0xff] }
 0x480   :  { %2183 = vmatprep.subr.mxu0 %v7297_v8  ;;  %2254 = vmatprep.subr.mxu1 %v7298_v2  ;;  %v7313_v59 = vld [vmem:[#allocation96_spill] sm:$0xff]  ;;  %v7314_v8 = vld [vmem:[#allocation93_spill] sm:$0xff] }
 0x481   :  { %2184 = vmatpush1.msra.mxu0 %v7299_v58  ;;  %2255 = vmatpush1.msra.mxu1 %v7300_v61  ;;  %v7315_v2 = vld [vmem:[#allocation13_spill] sm:$0xff]  ;;  %v7316_v58 = vld [vmem:[#allocation94_spill] sm:$0xff] }
 0x482   :  { %2185 = vmatprep.subr.mxu0 %v7301_v62  ;;  %2256 = vmatprep.subr.mxu1 %v7302_v0  ;;  %v7317_v61 = vld [vmem:[#allocation14_spill] sm:$0xff]  ;;  %v7318_v62 = vld [vmem:[#allocation15_spill] sm:$0xff] }
 0x483   :  { %2186 = vmatpush1.msra.mxu0 %v7303_v30  ;;  %2257 = vmatpush1.msra.mxu1 %v7304_v31  ;;  %v7319_v0 = vld [vmem:[#allocation26_spill] sm:$0xff]  ;;  %v7320_v30 = vld [vmem:[#allocation27_spill] sm:$0xff]  ;;  %v7321_v31 = vld [vmem:[#allocation28_spill] sm:$0xff] }
 0x484   :  { %2187 = vmatprep.subr.mxu0 %v7305_v32  ;;  %2258 = vmatprep.subr.mxu1 %v7306_v33  ;;  %v7333_v32 = vld [vmem:[#allocation104_spill] sm:$0xff] }
 0x485   :  { %2188 = vmatpush1.msra.mxu0 %v7307_v34  ;;  %2259 = vmatpush1.msra.mxu1 %v7308_v35 }
 0x486   :  { %2189 = vmatprep.subr.mxu0 %v7309_v37  ;;  %2260 = vmatprep.subr.mxu1 %v7310_v38 }
 0x487   :  { %2190 = vmatpush1.msra.mxu0 %v7311_v40  ;;  %2261 = vmatpush1.msra.mxu1 %v7312_v41  ;;  %v7322_v40 = vld [vmem:[#allocation29_spill] sm:$0xff]  ;;  %v7323_v41 = vld [vmem:[#allocation30_spill] sm:$0xff] }
 0x488   :  { %2191 = vmatprep.subr.mxu0 %v7313_v59  ;;  %2262 = vmatprep.subr.mxu1 %v7314_v8  ;;  %v7324_v59 = vld [vmem:[#allocation31_spill] sm:$0xff]  ;;  %v7325_v8 = vld [vmem:[#allocation32_spill] sm:$0xff] }
 0x489   :  { %2192 = vmatpush1.msra.mxu0 %v7315_v2  ;;  %2263 = vmatpush1.msra.mxu1 %v7316_v58  ;;  %v7326_v2 = vld [vmem:[#allocation33_spill] sm:$0xff]  ;;  %v7327_v58 = vld [vmem:[#allocation34_spill] sm:$0xff] }
 0x48a   :  { %2193 = vmatprep.subr.mxu0 %v7317_v61  ;;  %2264 = vmatprep.subr.mxu1 %v7318_v62  ;;  %v7328_v61 = vld [vmem:[#allocation35_spill] sm:$0xff] }
 0x48b   :  { %2194 = vmatpush1.msra.mxu0 %v7319_v0  ;;  %2265 = vmatpush1.msra.mxu1 %v7320_v30  ;;  %v7329_v30 = vld [vmem:[#allocation36_spill] sm:$0xff] }
 0x48c   :  { %2195 = vmatprep.subr.mxu0 %v7321_v31  ;;  %2266 = vmatprep.subr.mxu1 %v7322_v40  ;;  %v7330_v31 = vld [vmem:[#allocation37_spill] sm:$0xff] }
 0x48d   :  { %2196 = vmatpush1.msra.mxu0 %v7323_v41  ;;  %2267 = vmatpush1.msra.mxu1 %v7324_v59 }
 0x48e   :  { %2197 = vmatprep.subr.mxu0 %v7325_v8  ;;  %2268 = vmatprep.subr.mxu1 %v7326_v2  ;;  %v7331_v8 = vld [vmem:[#allocation20_spill] sm:$0xff] }
 0x48f   :  { %2198 = vmatpush1.msra.mxu0 %v7327_v58  ;;  %2269 = vmatpush1.msra.mxu1 %v7328_v61  ;;  %v7332_v58 = vld [vmem:[#allocation103_spill] sm:$0xff] }
 0x490   :  { %2231 = vmatprep.mubr.f32.mxu0 %v6954_v42  ;;  %2302 = vmatprep.mubr.f32.mxu1 %v6954_v42 }
 0x491   :  { %2309 = vmatprep.subr.mxu0 %v7329_v30  ;;  %2380 = vmatprep.subr.mxu1 %v7330_v31  ;;  %v7334_v31 = vld [vmem:[#allocation101_spill] sm:$0xff] }
 0x50e   :  { %v1953_v40 = vpop.f32.mrf.mxu1  ;;  %v1882_v41 = vpop.f32.mrf.mxu0 }
 0x50f   :  { %v2100_v38 = vadd.f32 %v1882_v41, %v7331_v8  ;;  %v7335_v41 = vld [vmem:[#allocation21_spill] sm:$0xff] }
 0x510   :  { %v1955_v0 = vpop.f32.mrf.mxu1  ;;  %v1884_v59 = vpop.f32.mrf.mxu0  ;;  %v2102_v8 = vadd.f32 %v1953_v40, %v7335_v41 }
 0x511   :  { %v3632_v34 = vmul.f32 -1.442695, %v2100_v38 }
 0x52f   :  { %v2095_v62 = vpop.f32.mrf.mxu1  ;;  %v2024_v2 = vpop.f32.mrf.mxu0 }
 0x530   :  { %v2106_v42 = vadd.f32 %v2095_v62, %v7334_v31 }
 0x531   :  { %v2097_v37 = vpop.f32.mrf.mxu1  ;;  %v2026_v33 = vpop.f32.mrf.mxu0 }
 0x532   :  { %v2107_v35 = vadd.f32 %v2097_v37, %v7332_v58  ;;  %v2105_v63 = vadd.f32 %v2026_v33, %v7333_v32  ;;  %v3633_v37 = vmul.f32 -1.442695, %v2102_v8  ;;  %v7336_v58 = vld [vmem:[#allocation102_spill] sm:$0xff] }
 0x533   :  { %v2104_v32 = vadd.f32 %v2024_v2, %v7336_v58 }
 0x534   :  { %v3635_v61 = vmul.f32 -1.442695, %v2107_v35  ;;  %v3634_v30 = vmul.f32 -1.442695, %v2105_v63 }
 0x536   :  { %3771 = vpow2.f32 %v3635_v61  ;;  %v7337_v61 = vld [vmem:[#allocation22_spill] sm:$0xff] }
 0x537   :  { %3773 = vpow2.f32 %v3632_v34 }
 0x538   :  { %3775 = vpow2.f32 %v3634_v30 }
 0x539   :  { %3777 = vtanh.f32 %v2106_v42 }
 0x543   :  { %v3772_v14 = vpop.eup %3771 }
 0x544   :  { %v2133_v4 = vadd.f32 1.0, %v3772_v14  ;;  %v3774_v7 = vpop.eup %3773  ;;  %v2101_v14 = vadd.f32 %v1884_v59, %v7337_v61 }
 0x545   :  { %v2111_v13 = vadd.f32 1.0, %v3774_v7  ;;  %v3776_v35 = vpop.eup %3775 }
 0x546   :  { %3779 = vrcp.f32 %v2133_v4  ;;  %v2126_v38 = vadd.f32 1.0, %v3776_v35  ;;  %v3778_v33 = vpop.eup %3777  ;;  %v2114_v40 = vmax.f32 %v2101_v14, 0.0 }
 0x547   :  { %3781 = vrcp.f32 %v2111_v13 }
 0x548   :  { %3783 = vpow2.f32 %v3633_v37  ;;  %v7338_v37 = vld [vmem:[#allocation23_spill] sm:$0xff] }
 0x549   :  { %3785 = vrcp.f32 %v2126_v38  ;;  %v2103_v35 = vadd.f32 %v1955_v0, %v7338_v37  ;;  %v5861_v37 = vld [vmem:[#allocation6 + $0x2d0] sm:$0xff] }
 0x54a   :  { %3787 = vtanh.f32 %v2104_v32  ;;  %7370 = vst [vmem:[#allocation46_spill] sm:$0xff] %v5861_v37 }
 0x54b   :  { %v2121_v32 = vmax.f32 %v2103_v35, 0.0  ;;  %v5864_v35 = vld [vmem:[#allocation6 + $0x288] sm:$0xff] }
 0x54c   :  { %7371 = vst [vmem:[#allocation47_spill] sm:$0xff] %v5864_v35 }
 0x553   :  { %v3780_v63 = vpop.eup %3779 }
 0x554   :  { %v2142_v34 = vadd.f32 %v3780_v63, %v3778_v33  ;;  %v3782_v42 = vpop.eup %3781 }
 0x555   :  { %v3784_v4 = vpop.eup %3783  ;;  %v2136_v7 = vmul.f32 %v3782_v42, %v2114_v40 }
 0x556   :  { %v3636_v62 = vmul.f32 -1.442695, %v2142_v34  ;;  %v2118_v30 = vadd.f32 1.0, %v3784_v4  ;;  %v3786_v31 = vpop.eup %3785 }
 0x557   :  { %v3788_v13 = vpop.eup %3787 }
 0x558   :  { %3789 = vpow2.f32 %v3636_v62  ;;  %v2140_v41 = vmul.f32 %v3788_v13, %v3786_v31  ;;  %v5846_v31 = vld [vmem:[#allocation6 + $0x300] sm:$0xff]  ;;  %v5849_v13 = vld [vmem:[#allocation6 + $0x310] sm:$0xff] }
 0x559   :  { %3791 = vtanh.f32 %v2136_v7  ;;  %v5840_v7 = vld [vmem:[#allocation6 + $0x308] sm:$0xff]  ;;  %7365 = vst [vmem:[#allocation41_spill] sm:$0xff] %v5846_v31  ;;  %7366 = vst [vmem:[#allocation42_spill] sm:$0xff] %v5849_v13 }
 0x55a   :  { %3793 = vrcp.f32 %v2118_v30  ;;  %7363 = vst [vmem:[#allocation39_spill] sm:$0xff] %v5840_v7  ;;  %v5843_v30 = vld [vmem:[#allocation6 + $0x318] sm:$0xff] }
 0x55b   :  { %3795 = vtanh.f32 %v2140_v41  ;;  %7364 = vst [vmem:[#allocation40_spill] sm:$0xff] %v5843_v30  ;;  %v5852_v41 = vld [vmem:[#allocation6 + $0x2c8] sm:$0xff] }
 0x55c   :  { %7367 = vst [vmem:[#allocation43_spill] sm:$0xff] %v5852_v41 }
 0x565   :  { %v3790_v2 = vpop.eup %3789 }
 0x566   :  { %v2146_v8 = vadd.f32 1.0, %v3790_v2  ;;  %v3792_v38 = vpop.eup %3791  ;;  %v5855_v2 = vld [vmem:[#allocation6 + $0x2d8] sm:$0xff] }
 0x567   :  { %v3794_v59 = vpop.eup %3793  ;;  %v2149_v58 = vadd.f32 %v3792_v38, %v5525_v11  ;;  %v5804_v11 = vld [vmem:[#allocation6 + $0x3c8] sm:$0xff]  ;;  %7368 = vst [vmem:[#allocation44_spill] sm:$0xff] %v5855_v2  ;;  %v5867_v38 = vld [vmem:[#allocation6 + $0x298] sm:$0xff] }
 0x568   :  { %3797 = vrcp.f32 %v2146_v8  ;;  %v2138_v33 = vadd.f32 %v3794_v59, %v2121_v32  ;;  %v3796_v63 = vpop.eup %3795  ;;  %v5858_v8 = vld [vmem:[#allocation6 + $0x2c0] sm:$0xff]  ;;  %7372 = vst [vmem:[#allocation48_spill] sm:$0xff] %v5867_v38  ;;  %v5876_v32 = vld [vmem:[#allocation6 + $0x248] sm:$0xff] }
 0x569   :  { %3799 = vtanh.f32 %v2149_v58  ;;  %7369 = vst [vmem:[#allocation45_spill] sm:$0xff] %v5858_v8  ;;  %v5870_v59 = vld [vmem:[#allocation6 + $0x280] sm:$0xff]  ;;  %v5873_v58 = vld [vmem:[#allocation6 + $0x290] sm:$0xff]  ;;  %7375 = vst [vmem:[#allocation51_spill] sm:$0xff] %v5876_v32 }
 0x56a   :  { %3801 = vtanh.f32 %v2138_v33  ;;  %7373 = vst [vmem:[#allocation49_spill] sm:$0xff] %v5870_v59  ;;  %7374 = vst [vmem:[#allocation50_spill] sm:$0xff] %v5873_v58  ;;  %v5879_v33 = vld [vmem:[#allocation6 + $0x258] sm:$0xff] }
 0x56b   :  { %7376 = vst [vmem:[#allocation52_spill] sm:$0xff] %v5879_v33 }
 0x575   :  { %v3798_v34 = vpop.eup %3797 }
 0x576   :  { %v2152_v61 = vadd.f32 %v3798_v34, %v3796_v63  ;;  %v3800_v14 = vpop.eup %3799  ;;  %v5882_v63 = vld [vmem:[#allocation6 + $0x240] sm:$0xff]  ;;  %v5885_v34 = vld [vmem:[#allocation6 + $0x250] sm:$0xff] }
 0x577   :  { %v3802_v62 = vpop.eup %3801  ;;  %7377 = vst [vmem:[#allocation53_spill] sm:$0xff] %v5882_v63  ;;  %7378 = vst [vmem:[#allocation54_spill] sm:$0xff] %v5885_v34 }
 0x578   :  { %3803 = vtanh.f32 %v2152_v61  ;;  %v5731_v42 = vmul.f32 %v3802_v62, %v3800_v14  ;;  %v5888_v61 = vld [vmem:[#allocation6 + $0x208] sm:$0xff]  ;;  %v5891_v14 = vld [vmem:[#allocation6 + $0x218] sm:$0xff]  ;;  %v5894_v62 = vld [vmem:[#allocation6 + $0x200] sm:$0xff] }
 0x579   :  { %7379 = vst [vmem:[#allocation55_spill] sm:$0xff] %v5888_v61  ;;  %7380 = vst [vmem:[#allocation56_spill] sm:$0xff] %v5891_v14 }
 0x57a   :  { %7381 = vst [vmem:[#allocation57_spill] sm:$0xff] %v5894_v62 }
 0x585   :  { %v3804_v40 = vpop.eup %3803 }
 0x586   :  { %v2154_v4 = vmul.f32 %v3804_v40, %v5731_v42  ;;  %v5897_v40 = vld [vmem:[#allocation6 + $0x210] sm:$0xff] }
 0x587   :  { %7382 = vst [vmem:[#allocation58_spill] sm:$0xff] %v5897_v40 }
 0x588   :  { %3805 = vtanh.f32 %v2154_v4  ;;  %v5900_v4 = vld [vmem:[#allocation6 + $0x1c8] sm:$0xff] }
 0x589   :  { %7383 = vst [vmem:[#allocation59_spill] sm:$0xff] %v5900_v4 }
 0x595   :  { %v5734_v0 = vpop.eup %3805 }
 0x596   :  { %2232 = vmatmul.mubr.f32.vlgmr.msra.gmra.mxu0 %v5734_v0  ;;  %2303 = vmatmul.mubr.f32.vlgmr.msra.gmra.mxu1 %v5734_v0 }
 0x597   :  { %2310 = vmatpush1.msra.mxu0 %v5262_v5  ;;  %2381 = vmatpush1.msra.mxu1 %v5265_v48  ;;  %v7339_v5 = vld [vmem:[#allocation16_spill] sm:$0xff]  ;;  %v7340_v48 = vld [vmem:[#allocation99_spill] sm:$0xff] }
 0x598   :  { %2311 = vmatprep.subr.mxu0 %v5268_v49  ;;  %2382 = vmatprep.subr.mxu1 %v5271_v50  ;;  %v7341_v49 = vld [vmem:[#allocation100_spill] sm:$0xff]  ;;  %v7342_v50 = vld [vmem:[#allocation97_spill] sm:$0xff] }
 0x599   :  { %2312 = vmatpush1.msra.mxu0 %v5274_v51  ;;  %2383 = vmatpush1.msra.mxu1 %v5277_v52  ;;  %v7343_v51 = vld [vmem:[#allocation17_spill] sm:$0xff]  ;;  %v7344_v52 = vld [vmem:[#allocation98_spill] sm:$0xff] }
 0x59a   :  { %2313 = vmatprep.subr.mxu0 %v5280_v18  ;;  %2384 = vmatprep.subr.mxu1 %v5283_v27  ;;  %v7345_v18 = vld [vmem:[#allocation18_spill] sm:$0xff]  ;;  %v7346_v27 = vld [vmem:[#allocation19_spill] sm:$0xff] }
 0x59b   :  { %2314 = vmatpush1.msra.mxu0 %v5286_v19  ;;  %2385 = vmatpush1.msra.mxu1 %v5289_v21  ;;  %v7347_v19 = vld [vmem:[#allocation62_spill] sm:$0xff]  ;;  %v7348_v21 = vld [vmem:[#allocation63_spill] sm:$0xff] }
 0x59c   :  { %2315 = vmatprep.subr.mxu0 %v5292_v25  ;;  %2386 = vmatprep.subr.mxu1 %v5295_v28  ;;  %v7349_v25 = vld [vmem:[#allocation64_spill] sm:$0xff]  ;;  %v7350_v28 = vld [vmem:[#allocation65_spill] sm:$0xff] }
 0x59d   :  { %2316 = vmatpush1.msra.mxu0 %v5298_v23  ;;  %2387 = vmatpush1.msra.mxu1 %v5301_v26  ;;  %v7351_v23 = vld [vmem:[#allocation66_spill] sm:$0xff]  ;;  %v7352_v26 = vld [vmem:[#allocation67_spill] sm:$0xff] }
 0x59e   :  { %2317 = vmatprep.subr.mxu0 %v5304_v29  ;;  %2388 = vmatprep.subr.mxu1 %v5307_v36  ;;  %v7353_v29 = vld [vmem:[#allocation68_spill] sm:$0xff]  ;;  %v7354_v36 = vld [vmem:[#allocation69_spill] sm:$0xff] }
 0x59f   :  { %2318 = vmatpush1.msra.mxu0 %v5310_v39  ;;  %2389 = vmatpush1.msra.mxu1 %v7248_v46  ;;  %v7355_v39 = vld [vmem:[#allocation70_spill] sm:$0xff] }
 0x5a0   :  { %2319 = vmatprep.subr.mxu0 %v7249_v54  ;;  %2390 = vmatprep.subr.mxu1 %v7250_v1  ;;  %v5807_v46 = vld [vmem:[#allocation6 + $0x3d8] sm:$0xff]  ;;  %v5810_v54 = vld [vmem:[#allocation6 + $0x3c0] sm:$0xff]  ;;  %v5813_v1 = vld [vmem:[#allocation6 + $0x3d0] sm:$0xff] }
 0x5a1   :  { %2320 = vmatpush1.msra.mxu0 %v7251_v22  ;;  %2391 = vmatpush1.msra.mxu1 %v7252_v10  ;;  %v5816_v22 = vld [vmem:[#allocation6 + $0x388] sm:$0xff]  ;;  %v5819_v10 = vld [vmem:[#allocation6 + $0x398] sm:$0xff] }
 0x5a2   :  { %2321 = vmatprep.subr.mxu0 %v7253_v6  ;;  %2392 = vmatprep.subr.mxu1 %v7254_v9  ;;  %v5822_v6 = vld [vmem:[#allocation6 + $0x380] sm:$0xff]  ;;  %v5825_v9 = vld [vmem:[#allocation6 + $0x390] sm:$0xff] }
 0x5a3   :  { %2322 = vmatpush1.msra.mxu0 %v7255_v3  ;;  %2393 = vmatpush1.msra.mxu1 %v7256_v60  ;;  %v5828_v3 = vld [vmem:[#allocation6 + $0x348] sm:$0xff]  ;;  %v5831_v60 = vld [vmem:[#allocation6 + $0x358] sm:$0xff] }
 0x5a4   :  { %2323 = vmatprep.subr.mxu0 %v7257_v17  ;;  %2394 = vmatprep.subr.mxu1 %v7258_v12  ;;  %v5834_v17 = vld [vmem:[#allocation6 + $0x340] sm:$0xff]  ;;  %v5837_v12 = vld [vmem:[#allocation6 + $0x350] sm:$0xff] }
 0x5a5   :  { %2324 = vmatpush1.msra.mxu0 %v5346_v20  ;;  %2395 = vmatpush1.msra.mxu1 %v5349_v43  ;;  %v7356_v43 = vld [vmem:[#allocation71_spill] sm:$0xff]  ;;  %7362 = vst [vmem:[#allocation38_spill] sm:$0xff] %v5837_v12 }
 0x5a6   :  { %2325 = vmatprep.subr.mxu0 %v5352_v44  ;;  %2396 = vmatprep.subr.mxu1 %v5355_v24  ;;  %v7357_v44 = vld [vmem:[#allocation72_spill] sm:$0xff]  ;;  %v7358_v24 = vld [vmem:[#allocation121_spill] sm:$0xff]  ;;  %v7361_v20 = vld [vmem:[#allocation123_spill] sm:$0xff] }
 0x5a7   :  { %2326 = vmatpush1.msra.mxu0 %v5358_v45  ;;  %2397 = vmatpush1.msra.mxu1 %v5361_v47  ;;  %v7359_v45 = vld [vmem:[#allocation122_spill] sm:$0xff]  ;;  %v7360_v47 = vmov 0.0  }
 0x5a8   :  { %2327 = vmatprep.subr.mxu0 %v5566_v56  ;;  %2398 = vmatprep.subr.mxu1 %v5569_v55 }
 0x5a9   :  { %2328 = vmatpush1.msra.mxu0 %v5572_v16  ;;  %2399 = vmatpush1.msra.mxu1 %v5575_v57 }
 0x5aa   :  { %2329 = vmatprep.subr.mxu0 %v5578_v15  ;;  %2400 = vmatprep.subr.mxu1 %v7339_v5 }
 0x5ab   :  { %2330 = vmatpush1.msra.mxu0 %v7340_v48  ;;  %2401 = vmatpush1.msra.mxu1 %v7341_v49 }
 0x5ac   :  { %2331 = vmatprep.subr.mxu0 %v7342_v50  ;;  %2402 = vmatprep.subr.mxu1 %v7343_v51 }
 0x5ad   :  { %2332 = vmatpush1.msra.mxu0 %v7344_v52  ;;  %2403 = vmatpush1.msra.mxu1 %v7345_v18 }
 0x5ae   :  { %2333 = vmatprep.subr.mxu0 %v7346_v27  ;;  %2404 = vmatprep.subr.mxu1 %v7347_v19 }
 0x5af   :  { %2334 = vmatpush1.msra.mxu0 %v7348_v21  ;;  %2405 = vmatpush1.msra.mxu1 %v7349_v25 }
 0x5b0   :  { %2335 = vmatprep.subr.mxu0 %v7350_v28  ;;  %2406 = vmatprep.subr.mxu1 %v7351_v23 }
 0x5b1   :  { %2336 = vmatpush1.msra.mxu0 %v7352_v26  ;;  %2407 = vmatpush1.msra.mxu1 %v7353_v29 }
 0x5b2   :  { %2337 = vmatprep.subr.mxu0 %v7354_v36  ;;  %2408 = vmatprep.subr.mxu1 %v7355_v39 }
 0x5b3   :  { %2338 = vmatpush1.msra.mxu0 %v5632_v53  ;;  %2409 = vmatpush1.msra.mxu1 %v7356_v43 }
 0x5b4   :  { %2339 = vmatprep.subr.mxu0 %v7357_v44  ;;  %2410 = vmatprep.subr.mxu1 %v7358_v24 }
 0x5b5   :  { %2340 = vmatpush1.msra.mxu0 %v7359_v45  ;;  %2373 = vmatprep.mubr.f32.mxu0 %v7360_v47 }
 0x5b6   :  { %2411 = vmatpush1.msra.mxu1 %v7361_v20  ;;  %2444 = vmatprep.mubr.f32.mxu1 %v7360_v47 }
 0x5b7   :  { %2374 = vmatmul.mubr.f32.vlgmr.msra.gmra.mxu0 %v5734_v0  ;;  %2445 = vmatmul.mubr.f32.vlgmr.msra.gmra.mxu1 %v5734_v0  ;;  %v5903_v0 = vld [vmem:[#allocation6 + $0x1d8] sm:$0xff] }
 0x5b8   :  { %2518 = vmatprep.subr.mxu0 %v5804_v11  ;;  %2589 = vmatprep.subr.mxu1 %v5807_v46  ;;  %7384 = vst [vmem:[#allocation60_spill] sm:$0xff] %v5903_v0 }
 0x5b9   :  { %2519 = vmatpush1.msra.mxu0 %v5810_v54  ;;  %2590 = vmatpush1.msra.mxu1 %v5813_v1 }
 0x5ba   :  { %2520 = vmatprep.subr.mxu0 %v5816_v22  ;;  %2591 = vmatprep.subr.mxu1 %v5819_v10 }
 0x5bb   :  { %2521 = vmatpush1.msra.mxu0 %v5822_v6  ;;  %2592 = vmatpush1.msra.mxu1 %v5825_v9 }
 0x5bc   :  { %2522 = vmatprep.subr.mxu0 %v5828_v3  ;;  %2593 = vmatprep.subr.mxu1 %v5831_v60 }
 0x5bd   :  { %2523 = vmatpush1.msra.mxu0 %v5834_v17  ;;  %2594 = vmatpush1.msra.mxu1 %v5837_v12 }
 0x5be   :  { %2524 = vmatprep.subr.mxu0 %v5840_v7  ;;  %2595 = vmatprep.subr.mxu1 %v5843_v30 }
 0x5bf   :  { %2525 = vmatpush1.msra.mxu0 %v5846_v31  ;;  %2596 = vmatpush1.msra.mxu1 %v5849_v13 }
 0x5c0   :  { %2526 = vmatprep.subr.mxu0 %v5852_v41  ;;  %2597 = vmatprep.subr.mxu1 %v5855_v2  ;;  %v7419_v2 = vld [vmem:[#allocation108_spill] sm:$0xff] }
 0x5c1   :  { %2527 = vmatpush1.msra.mxu0 %v5858_v8  ;;  %2598 = vmatpush1.msra.mxu1 %v5861_v37 }
 0x5c2   :  { %2528 = vmatprep.subr.mxu0 %v5864_v35  ;;  %2599 = vmatprep.subr.mxu1 %v5867_v38 }
 0x5c3   :  { %2529 = vmatpush1.msra.mxu0 %v5870_v59  ;;  %2600 = vmatpush1.msra.mxu1 %v5873_v58  ;;  %v7400_v58 = vld [vmem:[#allocation93_spill] sm:$0xff] }
 0x5c4   :  { %2530 = vmatprep.subr.mxu0 %v5876_v32  ;;  %2601 = vmatprep.subr.mxu1 %v5879_v33  ;;  %v7396_v33 = vld [vmem:[#allocation25_spill] sm:$0xff]  ;;  %v7398_v32 = vld [vmem:[#allocation95_spill] sm:$0xff] }
 0x5c5   :  { %2531 = vmatpush1.msra.mxu0 %v5882_v63  ;;  %2602 = vmatpush1.msra.mxu1 %v5885_v34  ;;  %v7392_v34 = vld [vmem:[#allocation74_spill] sm:$0xff]  ;;  %v7394_v63 = vld [vmem:[#allocation76_spill] sm:$0xff] }
 0x5c6   :  { %2532 = vmatprep.subr.mxu0 %v5888_v61  ;;  %2603 = vmatprep.subr.mxu1 %v5891_v14  ;;  %v5906_v61 = vld [vmem:[#allocation6 + $0x1c0] sm:$0xff]  ;;  %v5909_v14 = vld [vmem:[#allocation6 + $0x1d0] sm:$0xff] }
 0x5c7   :  { %2533 = vmatpush1.msra.mxu0 %v5894_v62  ;;  %2604 = vmatpush1.msra.mxu1 %v5897_v40  ;;  %7385 = vst [vmem:[#allocation61_spill] sm:$0xff] %v5906_v61  ;;  %7386 = vst [vmem:[#allocation20_spill] sm:$0xff] %v5909_v14  ;;  %v5912_v62 = vld [vmem:[#allocation6 + $0x188] sm:$0xff]  ;;  %v5915_v40 = vld [vmem:[#allocation6 + $0x198] sm:$0xff] }
 0x5c8   :  { %2534 = vmatprep.subr.mxu0 %v5900_v4  ;;  %2605 = vmatprep.subr.mxu1 %v5903_v0  ;;  %7387 = vst [vmem:[#allocation103_spill] sm:$0xff] %v5912_v62  ;;  %7388 = vst [vmem:[#allocation104_spill] sm:$0xff] %v5915_v40  ;;  %v5918_v4 = vld [vmem:[#allocation6 + $0x180] sm:$0xff]  ;;  %v5921_v0 = vld [vmem:[#allocation6 + $0x190] sm:$0xff] }
 0x5c9   :  { %2535 = vmatpush1.msra.mxu0 %v5906_v61  ;;  %2606 = vmatpush1.msra.mxu1 %v5909_v14  ;;  %7389 = vst [vmem:[#allocation101_spill] sm:$0xff] %v5918_v4  ;;  %7390 = vst [vmem:[#allocation21_spill] sm:$0xff] %v5921_v0  ;;  %v7391_v61 = vld [vmem:[#allocation73_spill] sm:$0xff]  ;;  %v7393_v14 = vld [vmem:[#allocation75_spill] sm:$0xff] }
 0x5ca   :  { %2536 = vmatprep.subr.mxu0 %v5912_v62  ;;  %2607 = vmatprep.subr.mxu1 %v5915_v40  ;;  %v7395_v62 = vld [vmem:[#allocation24_spill] sm:$0xff] }
 0x5cb   :  { %2537 = vmatpush1.msra.mxu0 %v5918_v4  ;;  %2608 = vmatpush1.msra.mxu1 %v5921_v0  ;;  %v7397_v40 = vld [vmem:[#allocation12_spill] sm:$0xff]  ;;  %v7401_v0 = vld [vmem:[#allocation13_spill] sm:$0xff] }
 0x5cc   :  { %2538 = vmatprep.subr.mxu0 %v7391_v61  ;;  %2609 = vmatprep.subr.mxu1 %v7392_v34  ;;  %v7399_v4 = vld [vmem:[#allocation96_spill] sm:$0xff]  ;;  %v7402_v61 = vld [vmem:[#allocation94_spill] sm:$0xff] }
 0x5cd   :  { %2539 = vmatpush1.msra.mxu0 %v7393_v14  ;;  %2610 = vmatpush1.msra.mxu1 %v7394_v63  ;;  %v7403_v34 = vld [vmem:[#allocation14_spill] sm:$0xff]  ;;  %v7404_v14 = vld [vmem:[#allocation15_spill] sm:$0xff] }
 0x5ce   :  { %2540 = vmatprep.subr.mxu0 %v7395_v62  ;;  %2611 = vmatprep.subr.mxu1 %v7396_v33  ;;  %v7405_v63 = vld [vmem:[#allocation26_spill] sm:$0xff]  ;;  %v7406_v62 = vld [vmem:[#allocation27_spill] sm:$0xff]  ;;  %v7407_v33 = vld [vmem:[#allocation28_spill] sm:$0xff] }
 0x5cf   :  { %2541 = vmatpush1.msra.mxu0 %v7397_v40  ;;  %2612 = vmatpush1.msra.mxu1 %v7398_v32  ;;  %v7408_v40 = vld [vmem:[#allocation29_spill] sm:$0xff]  ;;  %v7409_v32 = vld [vmem:[#allocation30_spill] sm:$0xff] }
 0x5d0   :  { %2542 = vmatprep.subr.mxu0 %v7399_v4  ;;  %2613 = vmatprep.subr.mxu1 %v7400_v58  ;;  %v7410_v4 = vld [vmem:[#allocation31_spill] sm:$0xff]  ;;  %v7411_v58 = vld [vmem:[#allocation32_spill] sm:$0xff] }
 0x5d1   :  { %2543 = vmatpush1.msra.mxu0 %v7401_v0  ;;  %2614 = vmatpush1.msra.mxu1 %v7402_v61  ;;  %v7412_v0 = vld [vmem:[#allocation33_spill] sm:$0xff]  ;;  %v7413_v61 = vld [vmem:[#allocation34_spill] sm:$0xff] }
 0x5d2   :  { %2544 = vmatprep.subr.mxu0 %v7403_v34  ;;  %2615 = vmatprep.subr.mxu1 %v7404_v14  ;;  %v7414_v34 = vld [vmem:[#allocation35_spill] sm:$0xff]  ;;  %v7415_v14 = vld [vmem:[#allocation36_spill] sm:$0xff] }
 0x5d3   :  { %2545 = vmatpush1.msra.mxu0 %v7405_v63  ;;  %2616 = vmatpush1.msra.mxu1 %v7406_v62  ;;  %v7416_v63 = vld [vmem:[#allocation37_spill] sm:$0xff] }
 0x5d4   :  { %2546 = vmatprep.subr.mxu0 %v7407_v33  ;;  %2617 = vmatprep.subr.mxu1 %v7408_v40 }
 0x5d5   :  { %2547 = vmatpush1.msra.mxu0 %v7409_v32  ;;  %2618 = vmatpush1.msra.mxu1 %v7410_v4 }
 0x5d6   :  { %2548 = vmatprep.subr.mxu0 %v7411_v58  ;;  %2619 = vmatprep.subr.mxu1 %v7412_v0  ;;  %v7417_v58 = vld [vmem:[#allocation77_spill] sm:$0xff] }
 0x5d7   :  { %2549 = vmatpush1.msra.mxu0 %v7413_v61  ;;  %2620 = vmatpush1.msra.mxu1 %v7414_v34  ;;  %v7418_v61 = vld [vmem:[#allocation107_spill] sm:$0xff] }
 0x5d8   :  { %2582 = vmatprep.mubr.f32.mxu0 %v7360_v47  ;;  %2653 = vmatprep.mubr.f32.mxu1 %v7360_v47 }
 0x5d9   :  { %2660 = vmatprep.subr.mxu0 %v7415_v14  ;;  %2731 = vmatprep.subr.mxu1 %v7416_v63  ;;  %v7420_v63 = vld [vmem:[#allocation105_spill] sm:$0xff] }
 0x656   :  { %v2304_v62 = vpop.f32.mrf.mxu1  ;;  %v2233_v33 = vpop.f32.mrf.mxu0 }
 0x657   :  { %v2451_v59 = vadd.f32 %v2233_v33, %v7417_v58  ;;  %v7421_v33 = vld [vmem:[#allocation78_spill] sm:$0xff] }
 0x658   :  { %v2306_v40 = vpop.f32.mrf.mxu1  ;;  %v2235_v32 = vpop.f32.mrf.mxu0  ;;  %v2453_v58 = vadd.f32 %v2304_v62, %v7421_v33 }
 0x659   :  { %v3637_v37 = vmul.f32 -1.442695, %v2451_v59 }
 0x677   :  { %v2446_v4 = vpop.f32.mrf.mxu1  ;;  %v2375_v0 = vpop.f32.mrf.mxu0 }
 0x678   :  { %v2457_v13 = vadd.f32 %v2446_v4, %v7420_v63  ;;  %v7423_v4 = vld [vmem:[#allocation79_spill] sm:$0xff] }
 0x679   :  { %v2448_v38 = vpop.f32.mrf.mxu1  ;;  %v2377_v8 = vpop.f32.mrf.mxu0 }
 0x67a   :  { %v2458_v35 = vadd.f32 %v2448_v38, %v7418_v61  ;;  %v2456_v41 = vadd.f32 %v2377_v8, %v7419_v2  ;;  %v3638_v38 = vmul.f32 -1.442695, %v2453_v58  ;;  %v7422_v61 = vld [vmem:[#allocation106_spill] sm:$0xff] }
 0x67b   :  { %v2455_v2 = vadd.f32 %v2375_v0, %v7422_v61 }
 0x67c   :  { %v3640_v34 = vmul.f32 -1.442695, %v2458_v35  ;;  %v3639_v14 = vmul.f32 -1.442695, %v2456_v41 }
 0x67e   :  { %3807 = vpow2.f32 %v3640_v34 }
 0x67f   :  { %3809 = vpow2.f32 %v3637_v37 }
 0x680   :  { %3811 = vpow2.f32 %v3639_v14 }
 0x681   :  { %3813 = vtanh.f32 %v2457_v13 }
 0x68b   :  { %v3808_v31 = vpop.eup %3807 }
 0x68c   :  { %v2484_v30 = vadd.f32 1.0, %v3808_v31  ;;  %v3810_v7 = vpop.eup %3809  ;;  %v2452_v31 = vadd.f32 %v2235_v32, %v7423_v4 }
 0x68d   :  { %v2462_v12 = vadd.f32 1.0, %v3810_v7  ;;  %v3812_v35 = vpop.eup %3811 }
 0x68e   :  { %3815 = vrcp.f32 %v2484_v30  ;;  %v2477_v59 = vadd.f32 1.0, %v3812_v35  ;;  %v3814_v8 = vpop.eup %3813  ;;  %v2465_v62 = vmax.f32 %v2452_v31, 0.0 }
 0x68f   :  { %3817 = vrcp.f32 %v2462_v12 }
 0x690   :  { %3819 = vpow2.f32 %v3638_v38  ;;  %v7424_v38 = vld [vmem:[#allocation80_spill] sm:$0xff] }
 0x691   :  { %3821 = vrcp.f32 %v2477_v59  ;;  %v2454_v35 = vadd.f32 %v2306_v40, %v7424_v38  ;;  %v5992_v38 = vld [vmem:[#allocation6 + $0x360] sm:$0xff] }
 0x692   :  { %3823 = vtanh.f32 %v2455_v2 }
 0x693   :  { %v2472_v2 = vmax.f32 %v2454_v35, 0.0  ;;  %v5995_v35 = vld [vmem:[#allocation6 + $0x370] sm:$0xff] }
 0x69b   :  { %v3816_v41 = vpop.eup %3815 }
 0x69c   :  { %v2493_v37 = vadd.f32 %v3816_v41, %v3814_v8  ;;  %v3818_v13 = vpop.eup %3817 }
 0x69d   :  { %v3820_v30 = vpop.eup %3819  ;;  %v2487_v7 = vmul.f32 %v3818_v13, %v2465_v62 }
 0x69e   :  { %v3641_v34 = vmul.f32 -1.442695, %v2493_v37  ;;  %v2469_v14 = vadd.f32 1.0, %v3820_v30  ;;  %v3822_v63 = vpop.eup %3821 }
 0x69f   :  { %v3824_v12 = vpop.eup %3823 }
 0x6a0   :  { %3825 = vpow2.f32 %v3641_v34  ;;  %v2491_v33 = vmul.f32 %v3824_v12, %v3822_v63  ;;  %v5977_v63 = vld [vmem:[#allocation6 + $0x3b8] sm:$0xff]  ;;  %v5980_v12 = vld [vmem:[#allocation6 + $0x3a0] sm:$0xff] }
 0x6a1   :  { %3827 = vtanh.f32 %v2487_v7  ;;  %v5971_v7 = vld [vmem:[#allocation6 + $0x3f0] sm:$0xff] }
 0x6a2   :  { %3829 = vrcp.f32 %v2469_v14  ;;  %v5974_v14 = vld [vmem:[#allocation6 + $0x3a8] sm:$0xff] }
 0x6a3   :  { %3831 = vtanh.f32 %v2491_v33  ;;  %v5983_v33 = vld [vmem:[#allocation6 + $0x3b0] sm:$0xff] }
 0x6ad   :  { %v3826_v0 = vpop.eup %3825 }
 0x6ae   :  { %v2497_v58 = vadd.f32 1.0, %v3826_v0  ;;  %v3828_v59 = vpop.eup %3827  ;;  %v5986_v0 = vld [vmem:[#allocation6 + $0x368] sm:$0xff] }
 0x6af   :  { %v3830_v32 = vpop.eup %3829  ;;  %v2500_v61 = vadd.f32 %v3828_v59, %v5731_v42  ;;  %v5968_v42 = vld [vmem:[#allocation6 + $0x3e0] sm:$0xff]  ;;  %v5998_v59 = vld [vmem:[#allocation6 + $0x328] sm:$0xff] }
 0x6b0   :  { %3833 = vrcp.f32 %v2497_v58  ;;  %v2489_v8 = vadd.f32 %v3830_v32, %v2472_v2  ;;  %v3832_v41 = vpop.eup %3831  ;;  %v5989_v58 = vld [vmem:[#allocation6 + $0x378] sm:$0xff]  ;;  %v6007_v2 = vld [vmem:[#allocation6 + $0x330] sm:$0xff] }
 0x6b1   :  { %3835 = vtanh.f32 %v2500_v61  ;;  %v6001_v32 = vld [vmem:[#allocation6 + $0x338] sm:$0xff]  ;;  %v6004_v61 = vld [vmem:[#allocation6 + $0x320] sm:$0xff] }
 0x6b2   :  { %3837 = vtanh.f32 %v2489_v8  ;;  %v6010_v8 = vld [vmem:[#allocation6 + $0x2e8] sm:$0xff] }
 0x6bd   :  { %v3834_v37 = vpop.eup %3833 }
 0x6be   :  { %v2503_v4 = vadd.f32 %v3834_v37, %v3832_v41  ;;  %v3836_v31 = vpop.eup %3835  ;;  %v6013_v41 = vld [vmem:[#allocation6 + $0x2f8] sm:$0xff]  ;;  %v6016_v37 = vld [vmem:[#allocation6 + $0x2e0] sm:$0xff] }
 0x6bf   :  { %v3838_v34 = vpop.eup %3837  ;;  %7425 = vst [vmem:[#allocation102_spill] sm:$0xff] %v6016_v37 }
 0x6c0   :  { %3839 = vtanh.f32 %v2503_v4  ;;  %v5961_v13 = vmul.f32 %v3838_v34, %v3836_v31  ;;  %v6019_v4 = vld [vmem:[#allocation6 + $0x2f0] sm:$0xff]  ;;  %v6022_v31 = vld [vmem:[#allocation6 + $0x2a8] sm:$0xff]  ;;  %v6025_v34 = vld [vmem:[#allocation6 + $0x2b8] sm:$0xff] }
 0x6c1   :  { %7426 = vst [vmem:[#allocation22_spill] sm:$0xff] %v6019_v4  ;;  %7427 = vst [vmem:[#allocation23_spill] sm:$0xff] %v6022_v31 }
 0x6c2   :  { %7428 = vst [vmem:[#allocation16_spill] sm:$0xff] %v6025_v34 }
 0x6cd   :  { %v3840_v62 = vpop.eup %3839 }
 0x6ce   :  { %v2505_v30 = vmul.f32 %v3840_v62, %v5961_v13  ;;  %v6028_v62 = vld [vmem:[#allocation6 + $0x2a0] sm:$0xff] }
 0x6cf   :  { %7429 = vst [vmem:[#allocation99_spill] sm:$0xff] %v6028_v62 }
 0x6d0   :  { %3841 = vtanh.f32 %v2505_v30  ;;  %v6031_v30 = vld [vmem:[#allocation6 + $0x2b0] sm:$0xff] }
 0x6d1   :  { %7430 = vst [vmem:[#allocation100_spill] sm:$0xff] %v6031_v30 }
 0x6dd   :  { %v5964_v40 = vpop.eup %3841 }
 0x6de   :  { %2583 = vmatmul.mubr.f32.vlgmr.msra.gmra.mxu0 %v5964_v40  ;;  %2654 = vmatmul.mubr.f32.vlgmr.msra.gmra.mxu1 %v5964_v40 }
 0x6df   :  { %2661 = vmatpush1.msra.mxu0 %v5968_v42  ;;  %2732 = vmatpush1.msra.mxu1 %v5971_v7 }
 0x6e0   :  { %2662 = vmatprep.subr.mxu0 %v5974_v14  ;;  %2733 = vmatprep.subr.mxu1 %v5977_v63 }
 0x6e1   :  { %2663 = vmatpush1.msra.mxu0 %v5980_v12  ;;  %2734 = vmatpush1.msra.mxu1 %v5983_v33 }
 0x6e2   :  { %2664 = vmatprep.subr.mxu0 %v5986_v0  ;;  %2735 = vmatprep.subr.mxu1 %v5989_v58 }
 0x6e3   :  { %2665 = vmatpush1.msra.mxu0 %v5992_v38  ;;  %2736 = vmatpush1.msra.mxu1 %v5995_v35 }
 0x6e4   :  { %2666 = vmatprep.subr.mxu0 %v5998_v59  ;;  %2737 = vmatprep.subr.mxu1 %v6001_v32 }
 0x6e5   :  { %2667 = vmatpush1.msra.mxu0 %v6004_v61  ;;  %2738 = vmatpush1.msra.mxu1 %v6007_v2 }
 0x6e6   :  { %2668 = vmatprep.subr.mxu0 %v6010_v8  ;;  %2739 = vmatprep.subr.mxu1 %v6013_v41 }
 0x6e7   :  { %2669 = vmatpush1.msra.mxu0 %v6016_v37  ;;  %2740 = vmatpush1.msra.mxu1 %v6019_v4  ;;  %v6034_v37 = vld [vmem:[#allocation6 + $0x268] sm:$0xff]  ;;  %v6037_v4 = vld [vmem:[#allocation6 + $0x278] sm:$0xff] }
 0x6e8   :  { %2670 = vmatprep.subr.mxu0 %v6022_v31  ;;  %2741 = vmatprep.subr.mxu1 %v6025_v34  ;;  %7431 = vst [vmem:[#allocation97_spill] sm:$0xff] %v6034_v37  ;;  %7432 = vst [vmem:[#allocation17_spill] sm:$0xff] %v6037_v4  ;;  %v6040_v31 = vld [vmem:[#allocation6 + $0x260] sm:$0xff]  ;;  %v6043_v34 = vld [vmem:[#allocation6 + $0x270] sm:$0xff] }
 0x6e9   :  { %2671 = vmatpush1.msra.mxu0 %v6028_v62  ;;  %2742 = vmatpush1.msra.mxu1 %v6031_v30  ;;  %7433 = vst [vmem:[#allocation98_spill] sm:$0xff] %v6040_v31  ;;  %7434 = vst [vmem:[#allocation18_spill] sm:$0xff] %v6043_v34  ;;  %v6046_v62 = vld [vmem:[#allocation6 + $0x228] sm:$0xff]  ;;  %v6049_v30 = vld [vmem:[#allocation6 + $0x238] sm:$0xff] }
 0x6ea   :  { %2672 = vmatprep.subr.mxu0 %v6034_v37  ;;  %2743 = vmatprep.subr.mxu1 %v6037_v4  ;;  %7435 = vst [vmem:[#allocation19_spill] sm:$0xff] %v6046_v62  ;;  %7436 = vst [vmem:[#allocation62_spill] sm:$0xff] %v6049_v30  ;;  %v6052_v37 = vld [vmem:[#allocation6 + $0x220] sm:$0xff]  ;;  %v6055_v4 = vld [vmem:[#allocation6 + $0x230] sm:$0xff] }
 0x6eb   :  { %2673 = vmatpush1.msra.mxu0 %v6040_v31  ;;  %2744 = vmatpush1.msra.mxu1 %v6043_v34  ;;  %v6058_v31 = vld [vmem:[#allocation6 + $0x1e8] sm:$0xff]  ;;  %v6061_v34 = vld [vmem:[#allocation6 + $0x1f8] sm:$0xff] }
 0x6ec   :  { %2674 = vmatprep.subr.mxu0 %v6046_v62  ;;  %2745 = vmatprep.subr.mxu1 %v6049_v30  ;;  %v6064_v62 = vld [vmem:[#allocation6 + $0x1e0] sm:$0xff]  ;;  %v6067_v30 = vld [vmem:[#allocation6 + $0x1f0] sm:$0xff] }
 0x6ed   :  { %2675 = vmatpush1.msra.mxu0 %v6052_v37  ;;  %2746 = vmatpush1.msra.mxu1 %v6055_v4 }
 0x6ee   :  { %2676 = vmatprep.subr.mxu0 %v6058_v31  ;;  %2747 = vmatprep.subr.mxu1 %v6061_v34 }
 0x6ef   :  { %2677 = vmatpush1.msra.mxu0 %v6064_v62  ;;  %2748 = vmatpush1.msra.mxu1 %v6067_v30 }
 0x6f0   :  { %2678 = vmatprep.subr.mxu0 %v5566_v56  ;;  %2749 = vmatprep.subr.mxu1 %v5569_v55  ;;  %v7437_v56 = vld [vmem:[#allocation38_spill] sm:$0xff]  ;;  %v7438_v55 = vld [vmem:[#allocation39_spill] sm:$0xff] }
 0x6f1   :  { %2679 = vmatpush1.msra.mxu0 %v5572_v16  ;;  %2750 = vmatpush1.msra.mxu1 %v5575_v57  ;;  %v7439_v16 = vld [vmem:[#allocation40_spill] sm:$0xff]  ;;  %v7440_v57 = vld [vmem:[#allocation41_spill] sm:$0xff] }
 0x6f2   :  { %2680 = vmatprep.subr.mxu0 %v5578_v15  ;;  %2751 = vmatprep.subr.mxu1 %v7339_v5  ;;  %v7441_v15 = vld [vmem:[#allocation42_spill] sm:$0xff]  ;;  %v7443_v5 = vld [vmem:[#allocation44_spill] sm:$0xff] }
 0x6f3   :  { %2681 = vmatpush1.msra.mxu0 %v7340_v48  ;;  %2752 = vmatpush1.msra.mxu1 %v7341_v49  ;;  %v7444_v48 = vld [vmem:[#allocation45_spill] sm:$0xff]  ;;  %v7445_v49 = vld [vmem:[#allocation46_spill] sm:$0xff] }
 0x6f4   :  { %2682 = vmatprep.subr.mxu0 %v7342_v50  ;;  %2753 = vmatprep.subr.mxu1 %v7343_v51  ;;  %v7446_v50 = vld [vmem:[#allocation47_spill] sm:$0xff]  ;;  %v7447_v51 = vld [vmem:[#allocation48_spill] sm:$0xff] }
 0x6f5   :  { %2683 = vmatpush1.msra.mxu0 %v7344_v52  ;;  %2754 = vmatpush1.msra.mxu1 %v7345_v18  ;;  %v7448_v52 = vld [vmem:[#allocation49_spill] sm:$0xff]  ;;  %v7449_v18 = vld [vmem:[#allocation50_spill] sm:$0xff] }
 0x6f6   :  { %2684 = vmatprep.subr.mxu0 %v7346_v27  ;;  %2755 = vmatprep.subr.mxu1 %v7347_v19  ;;  %v7450_v27 = vld [vmem:[#allocation51_spill] sm:$0xff]  ;;  %v7451_v19 = vld [vmem:[#allocation52_spill] sm:$0xff] }
 0x6f7   :  { %2685 = vmatpush1.msra.mxu0 %v7348_v21  ;;  %2756 = vmatpush1.msra.mxu1 %v7349_v25  ;;  %v7452_v21 = vld [vmem:[#allocation53_spill] sm:$0xff]  ;;  %v7453_v25 = vld [vmem:[#allocation54_spill] sm:$0xff] }
 0x6f8   :  { %2686 = vmatprep.subr.mxu0 %v7350_v28  ;;  %2757 = vmatprep.subr.mxu1 %v7351_v23  ;;  %v7454_v28 = vld [vmem:[#allocation55_spill] sm:$0xff]  ;;  %v7455_v23 = vld [vmem:[#allocation56_spill] sm:$0xff] }
 0x6f9   :  { %2687 = vmatpush1.msra.mxu0 %v7352_v26  ;;  %2758 = vmatpush1.msra.mxu1 %v7353_v29  ;;  %v7456_v26 = vld [vmem:[#allocation57_spill] sm:$0xff]  ;;  %v7457_v29 = vld [vmem:[#allocation58_spill] sm:$0xff] }
 0x6fa   :  { %2688 = vmatprep.subr.mxu0 %v7354_v36  ;;  %2759 = vmatprep.subr.mxu1 %v7355_v39  ;;  %v7458_v36 = vld [vmem:[#allocation59_spill] sm:$0xff]  ;;  %v7459_v39 = vld [vmem:[#allocation60_spill] sm:$0xff] }
 0x6fb   :  { %2689 = vmatpush1.msra.mxu0 %v5632_v53  ;;  %2760 = vmatpush1.msra.mxu1 %v7356_v43  ;;  %v7442_v53 = vld [vmem:[#allocation43_spill] sm:$0xff]  ;;  %v7460_v43 = vld [vmem:[#allocation61_spill] sm:$0xff] }
 0x6fc   :  { %2690 = vmatprep.subr.mxu0 %v7357_v44  ;;  %2761 = vmatprep.subr.mxu1 %v7358_v24  ;;  %v7461_v44 = vld [vmem:[#allocation20_spill] sm:$0xff]  ;;  %v7462_v24 = vld [vmem:[#allocation103_spill] sm:$0xff] }
 0x6fd   :  { %2691 = vmatpush1.msra.mxu0 %v7359_v45  ;;  %2724 = vmatprep.mubr.f32.mxu0 %v7360_v47  ;;  %v7463_v45 = vld [vmem:[#allocation104_spill] sm:$0xff] }
 0x6fe   :  { %2762 = vmatpush1.msra.mxu1 %v7361_v20  ;;  %2795 = vmatprep.mubr.f32.mxu1 %v7360_v47  ;;  %v7464_v20 = vld [vmem:[#allocation101_spill] sm:$0xff] }
 0x6ff   :  { %2725 = vmatmul.mubr.f32.vlgmr.msra.gmra.mxu0 %v5964_v40  ;;  %2796 = vmatmul.mubr.f32.vlgmr.msra.gmra.mxu1 %v5964_v40  ;;  %v7465_v40 = vld [vmem:[#allocation21_spill] sm:$0xff] }
 0x700   :  { %2869 = vmatprep.subr.mxu0 %v5804_v11  ;;  %2940 = vmatprep.subr.mxu1 %v5807_v46 }
 0x701   :  { %2870 = vmatpush1.msra.mxu0 %v5810_v54  ;;  %2941 = vmatpush1.msra.mxu1 %v5813_v1 }
 0x702   :  { %2871 = vmatprep.subr.mxu0 %v5816_v22  ;;  %2942 = vmatprep.subr.mxu1 %v5819_v10 }
 0x703   :  { %2872 = vmatpush1.msra.mxu0 %v5822_v6  ;;  %2943 = vmatpush1.msra.mxu1 %v5825_v9 }
 0x704   :  { %2873 = vmatprep.subr.mxu0 %v5828_v3  ;;  %2944 = vmatprep.subr.mxu1 %v5831_v60 }
 0x705   :  { %2874 = vmatpush1.msra.mxu0 %v5834_v17  ;;  %2945 = vmatpush1.msra.mxu1 %v7437_v56 }
 0x706   :  { %2875 = vmatprep.subr.mxu0 %v7438_v55  ;;  %2946 = vmatprep.subr.mxu1 %v7439_v16 }
 0x707   :  { %2876 = vmatpush1.msra.mxu0 %v7440_v57  ;;  %2947 = vmatpush1.msra.mxu1 %v7441_v15 }
 0x708   :  { %2877 = vmatprep.subr.mxu0 %v7442_v53  ;;  %2948 = vmatprep.subr.mxu1 %v7443_v5 }
 0x709   :  { %2878 = vmatpush1.msra.mxu0 %v7444_v48  ;;  %2949 = vmatpush1.msra.mxu1 %v7445_v49 }
 0x70a   :  { %2879 = vmatprep.subr.mxu0 %v7446_v50  ;;  %2950 = vmatprep.subr.mxu1 %v7447_v51 }
 0x70b   :  { %2880 = vmatpush1.msra.mxu0 %v7448_v52  ;;  %2951 = vmatpush1.msra.mxu1 %v7449_v18 }
 0x70c   :  { %2881 = vmatprep.subr.mxu0 %v7450_v27  ;;  %2952 = vmatprep.subr.mxu1 %v7451_v19 }
 0x70d   :  { %2882 = vmatpush1.msra.mxu0 %v7452_v21  ;;  %2953 = vmatpush1.msra.mxu1 %v7453_v25 }
 0x70e   :  { %2883 = vmatprep.subr.mxu0 %v7454_v28  ;;  %2954 = vmatprep.subr.mxu1 %v7455_v23  ;;  %v6142_v23 = vld [vmem:[#allocation6 + $0x148] sm:$0xff]  ;;  %v7493_v28 = vld [vmem:[#allocation111_spill] sm:$0xff] }
 0x70f   :  { %2884 = vmatpush1.msra.mxu0 %v7456_v26  ;;  %2955 = vmatpush1.msra.mxu1 %v7457_v29  ;;  %7466 = vst [vmem:[#allocation63_spill] sm:$0xff] %v6142_v23  ;;  %v6145_v29 = vld [vmem:[#allocation6 + $0x158] sm:$0xff] }
 0x710   :  { %2885 = vmatprep.subr.mxu0 %v7458_v36  ;;  %2956 = vmatprep.subr.mxu1 %v7459_v39  ;;  %7467 = vst [vmem:[#allocation64_spill] sm:$0xff] %v6145_v29  ;;  %v6148_v39 = vld [vmem:[#allocation6 + $0x140] sm:$0xff] }
 0x711   :  { %2886 = vmatpush1.msra.mxu0 %v7460_v43  ;;  %2957 = vmatpush1.msra.mxu1 %v7461_v44  ;;  %7468 = vst [vmem:[#allocation65_spill] sm:$0xff] %v6148_v39  ;;  %v6151_v44 = vld [vmem:[#allocation6 + $0x150] sm:$0xff]  ;;  %v7492_v43 = vld [vmem:[#allocation82_spill] sm:$0xff] }
 0x712   :  { %2887 = vmatprep.subr.mxu0 %v7462_v24  ;;  %2958 = vmatprep.subr.mxu1 %v7463_v45  ;;  %7469 = vst [vmem:[#allocation66_spill] sm:$0xff] %v6151_v44  ;;  %v6154_v45 = vld [vmem:[#allocation6 + $0x108] sm:$0xff] }
 0x713   :  { %2888 = vmatpush1.msra.mxu0 %v7464_v20  ;;  %2959 = vmatpush1.msra.mxu1 %v7465_v40  ;;  %7470 = vst [vmem:[#allocation67_spill] sm:$0xff] %v6154_v45  ;;  %v6157_v40 = vld [vmem:[#allocation6 + $0x118] sm:$0xff] }
 0x714   :  { %2889 = vmatprep.subr.mxu0 %v6142_v23  ;;  %2960 = vmatprep.subr.mxu1 %v6145_v29  ;;  %7471 = vst [vmem:[#allocation68_spill] sm:$0xff] %v6157_v40  ;;  %v6160_v23 = vld [vmem:[#allocation6 + $0x100] sm:$0xff]  ;;  %v6163_v29 = vld [vmem:[#allocation6 + $0x110] sm:$0xff] }
 0x715   :  { %2890 = vmatpush1.msra.mxu0 %v6148_v39  ;;  %2961 = vmatpush1.msra.mxu1 %v6151_v44  ;;  %7472 = vst [vmem:[#allocation69_spill] sm:$0xff] %v6160_v23  ;;  %7473 = vst [vmem:[#allocation70_spill] sm:$0xff] %v6163_v29  ;;  %v6166_v39 = vld [vmem:[#allocation6 + $0xc8] sm:$0xff]  ;;  %v6169_v44 = vld [vmem:[#allocation6 + $0xd8] sm:$0xff] }
 0x716   :  { %2891 = vmatprep.subr.mxu0 %v6154_v45  ;;  %2962 = vmatprep.subr.mxu1 %v6157_v40  ;;  %7474 = vst [vmem:[#allocation71_spill] sm:$0xff] %v6166_v39  ;;  %7475 = vst [vmem:[#allocation72_spill] sm:$0xff] %v6169_v44  ;;  %v6172_v45 = vld [vmem:[#allocation6 + $0xc0] sm:$0xff]  ;;  %v6175_v40 = vld [vmem:[#allocation6 + $0xd0] sm:$0xff] }
 0x717   :  { %2892 = vmatpush1.msra.mxu0 %v6160_v23  ;;  %2963 = vmatpush1.msra.mxu1 %v6163_v29  ;;  %7476 = vst [vmem:[#allocation121_spill] sm:$0xff] %v6172_v45  ;;  %7477 = vst [vmem:[#allocation122_spill] sm:$0xff] %v6175_v40  ;;  %v6178_v23 = vld [vmem:[#allocation6 + $0x88] sm:$0xff]  ;;  %v6181_v29 = vld [vmem:[#allocation6 + $0x98] sm:$0xff] }
 0x718   :  { %2893 = vmatprep.subr.mxu0 %v6166_v39  ;;  %2964 = vmatprep.subr.mxu1 %v6169_v44  ;;  %7478 = vst [vmem:[#allocation123_spill] sm:$0xff] %v6178_v23  ;;  %7479 = vst [vmem:[#allocation73_spill] sm:$0xff] %v6181_v29  ;;  %v6184_v39 = vld [vmem:[#allocation6 + $0x80] sm:$0xff]  ;;  %v6187_v44 = vld [vmem:[#allocation6 + $0x90] sm:$0xff] }
 0x719   :  { %2894 = vmatpush1.msra.mxu0 %v6172_v45  ;;  %2965 = vmatpush1.msra.mxu1 %v6175_v40  ;;  %7480 = vst [vmem:[#allocation74_spill] sm:$0xff] %v6184_v39  ;;  %7481 = vst [vmem:[#allocation75_spill] sm:$0xff] %v6187_v44  ;;  %v6190_v45 = vld [vmem:[#allocation6 + $0x48] sm:$0xff]  ;;  %v6193_v40 = vld [vmem:[#allocation6 + $0x58] sm:$0xff] }
 0x71a   :  { %2895 = vmatprep.subr.mxu0 %v6178_v23  ;;  %2966 = vmatprep.subr.mxu1 %v6181_v29  ;;  %7482 = vst [vmem:[#allocation76_spill] sm:$0xff] %v6190_v45  ;;  %7483 = vst [vmem:[#allocation24_spill] sm:$0xff] %v6193_v40  ;;  %v6196_v23 = vld [vmem:[#allocation6 + $0x40] sm:$0xff]  ;;  %v6199_v29 = vld [vmem:[#allocation6 + $0x50] sm:$0xff] }
 0x71b   :  { %2896 = vmatpush1.msra.mxu0 %v6184_v39  ;;  %2967 = vmatpush1.msra.mxu1 %v6187_v44  ;;  %7484 = vst [vmem:[#allocation25_spill] sm:$0xff] %v6196_v23  ;;  %7485 = vst [vmem:[#allocation12_spill] sm:$0xff] %v6199_v29  ;;  %v6202_v39 = vld [vmem:[#allocation6 + $0x8] sm:$0xff]  ;;  %v6205_v44 = vld [vmem:[#allocation6 + $0x18] sm:$0xff] }
 0x71c   :  { %2897 = vmatprep.subr.mxu0 %v6190_v45  ;;  %2968 = vmatprep.subr.mxu1 %v6193_v40  ;;  %7486 = vst [vmem:[#allocation95_spill] sm:$0xff] %v6202_v39  ;;  %7487 = vst [vmem:[#allocation96_spill] sm:$0xff] %v6205_v44  ;;  %v6208_v45 = vld [vmem:[#allocation6] sm:$0xff]  ;;  %v6211_v40 = vld [vmem:[#allocation6 + $0x10] sm:$0xff] }
 0x71d   :  { %2898 = vmatpush1.msra.mxu0 %v6196_v23  ;;  %2969 = vmatpush1.msra.mxu1 %v6199_v29  ;;  %7488 = vst [vmem:[#allocation93_spill] sm:$0xff] %v6208_v45  ;;  %7489 = vst [vmem:[#allocation13_spill] sm:$0xff] %v6211_v40  ;;  %v6216_v29 = vld [vmem:[#allocation6 + $0x3e8] sm:$0xff] }
 0x71e   :  { %2899 = vmatprep.subr.mxu0 %v6202_v39  ;;  %2970 = vmatprep.subr.mxu1 %v6205_v44  ;;  %7490 = vst [vmem:[#allocation94_spill] sm:$0xff] %v6216_v29  ;;  %v6219_v39 = vld [vmem:[#allocation6 + $0x3f8] sm:$0xff] }
 0x71f   :  { %2900 = vmatpush1.msra.mxu0 %v6208_v45  ;;  %2971 = vmatpush1.msra.mxu1 %v6211_v40  ;;  %7491 = vst [vmem:[#allocation14_spill] sm:$0xff] %v6219_v39 }
 0x720   :  { %2933 = vmatprep.mubr.f32.mxu0 %v7360_v47  ;;  %3004 = vmatprep.mubr.f32.mxu1 %v7360_v47 }
 0x721   :  { %3011 = vmatprep.subr.mxu0 %v6216_v29  ;;  %3082 = vmatprep.subr.mxu1 %v6219_v39  ;;  %v7494_v29 = vld [vmem:[#allocation112_spill] sm:$0xff]  ;;  %v7495_v39 = vld [vmem:[#allocation109_spill] sm:$0xff] }
 0x79e   :  { %v2655_v44 = vpop.f32.mrf.mxu1  ;;  %v2584_v23 = vpop.f32.mrf.mxu0 }
 0x79f   :  { %v2802_v36 = vadd.f32 %v2584_v23, %v7492_v43  ;;  %v7496_v23 = vld [vmem:[#allocation81_spill] sm:$0xff] }
 0x7a0   :  { %v2657_v20 = vpop.f32.mrf.mxu1  ;;  %v2586_v45 = vpop.f32.mrf.mxu0  ;;  %v2804_v43 = vadd.f32 %v2655_v44, %v7496_v23 }
 0x7a1   :  { %v3642_v19 = vmul.f32 -1.442695, %v2802_v36 }
 0x7bf   :  { %v2797_v24 = vpop.f32.mrf.mxu1  ;;  %v2726_v40 = vpop.f32.mrf.mxu0 }
 0x7c0   :  { %v2808_v51 = vadd.f32 %v2797_v24, %v7495_v39 }
 0x7c1   :  { %v2799_v26 = vpop.f32.mrf.mxu1  ;;  %v2728_v27 = vpop.f32.mrf.mxu0 }
 0x7c2   :  { %v2809_v25 = vadd.f32 %v2799_v26, %v7493_v28  ;;  %v2807_v18 = vadd.f32 %v2728_v27, %v7494_v29  ;;  %v3643_v28 = vmul.f32 -1.442695, %v2804_v43  ;;  %v7497_v26 = vld [vmem:[#allocation110_spill] sm:$0xff]  ;;  %v7498_v29 = vld [vmem:[#allocation84_spill] sm:$0xff] }
 0x7c3   :  { %v2806_v27 = vadd.f32 %v2726_v40, %v7497_v26 }
 0x7c4   :  { %v3645_v21 = vmul.f32 -1.442695, %v2809_v25  ;;  %v3644_v52 = vmul.f32 -1.442695, %v2807_v18 }
 0x7c6   :  { %3843 = vpow2.f32 %v3645_v21 }
 0x7c7   :  { %3845 = vpow2.f32 %v3642_v19 }
 0x7c8   :  { %3847 = vpow2.f32 %v3644_v52 }
 0x7c9   :  { %3849 = vtanh.f32 %v2808_v51 }
 0x7d3   :  { %v3844_v50 = vpop.eup %3843 }
 0x7d4   :  { %v2835_v49 = vadd.f32 1.0, %v3844_v50  ;;  %v3846_v48 = vpop.eup %3845  ;;  %v2803_v50 = vadd.f32 %v2586_v45, %v7498_v29 }
 0x7d5   :  { %v2813_v5 = vadd.f32 1.0, %v3846_v48  ;;  %v3848_v25 = vpop.eup %3847 }
 0x7d6   :  { %3851 = vrcp.f32 %v2835_v49  ;;  %v2828_v21 = vadd.f32 1.0, %v3848_v25  ;;  %v3850_v19 = vpop.eup %3849  ;;  %v2816_v39 = vmax.f32 %v2803_v50, 0.0 }
 0x7d7   :  { %3853 = vrcp.f32 %v2813_v5 }
 0x7d8   :  { %3855 = vpow2.f32 %v3643_v28  ;;  %v7499_v28 = vld [vmem:[#allocation83_spill] sm:$0xff] }
 0x7d9   :  { %3857 = vrcp.f32 %v2828_v21  ;;  %v2805_v25 = vadd.f32 %v2657_v20, %v7499_v28  ;;  %v7508_v28 = vld [vmem:[#allocation98_spill] sm:$0xff] }
 0x7da   :  { %3859 = vtanh.f32 %v2806_v27 }
 0x7db   :  { %v2823_v27 = vmax.f32 %v2805_v25, 0.0  ;;  %v7509_v25 = vld [vmem:[#allocation18_spill] sm:$0xff] }
 0x7e3   :  { %v3852_v18 = vpop.eup %3851 }
 0x7e4   :  { %v2844_v52 = vadd.f32 %v3852_v18, %v3850_v19  ;;  %v3854_v51 = vpop.eup %3853 }
 0x7e5   :  { %v3856_v49 = vpop.eup %3855  ;;  %v2838_v48 = vmul.f32 %v3854_v51, %v2816_v39 }
 0x7e6   :  { %v3646_v36 = vmul.f32 -1.442695, %v2844_v52  ;;  %v2820_v44 = vadd.f32 1.0, %v3856_v49  ;;  %v3858_v24 = vpop.eup %3857 }
 0x7e7   :  { %v3860_v5 = vpop.eup %3859 }
 0x7e8   :  { %3861 = vpow2.f32 %v3646_v36  ;;  %v2842_v23 = vmul.f32 %v3860_v5, %v3858_v24  ;;  %v7503_v24 = vld [vmem:[#allocation16_spill] sm:$0xff]  ;;  %v7504_v5 = vld [vmem:[#allocation99_spill] sm:$0xff] }
 0x7e9   :  { %3863 = vtanh.f32 %v2838_v48  ;;  %v7501_v48 = vld [vmem:[#allocation22_spill] sm:$0xff] }
 0x7ea   :  { %3865 = vrcp.f32 %v2820_v44  ;;  %v7502_v44 = vld [vmem:[#allocation23_spill] sm:$0xff] }
 0x7eb   :  { %3867 = vtanh.f32 %v2842_v23  ;;  %v7505_v23 = vld [vmem:[#allocation100_spill] sm:$0xff] }
 0x7f5   :  { %v3862_v40 = vpop.eup %3861 }
 0x7f6   :  { %v2848_v43 = vadd.f32 1.0, %v3862_v40  ;;  %v3864_v21 = vpop.eup %3863  ;;  %v7506_v40 = vld [vmem:[#allocation97_spill] sm:$0xff] }
 0x7f7   :  { %v3866_v45 = vpop.eup %3865  ;;  %v2851_v26 = vadd.f32 %v3864_v21, %v5961_v13  ;;  %v7500_v13 = vld [vmem:[#allocation102_spill] sm:$0xff]  ;;  %v7510_v21 = vld [vmem:[#allocation19_spill] sm:$0xff] }
 0x7f8   :  { %3869 = vrcp.f32 %v2848_v43  ;;  %v2840_v19 = vadd.f32 %v3866_v45, %v2823_v27  ;;  %v3868_v18 = vpop.eup %3867  ;;  %v7507_v43 = vld [vmem:[#allocation17_spill] sm:$0xff]  ;;  %v7511_v45 = vld [vmem:[#allocation62_spill] sm:$0xff] }
 0x7f9   :  { %3871 = vtanh.f32 %v2851_v26  ;;  %v6272_v26 = vld [vmem:[#allocation6 + $0x1a8] sm:$0xff]  ;;  %v6275_v27 = vld [vmem:[#allocation6 + $0x1b8] sm:$0xff] }
 0x7fa   :  { %3873 = vtanh.f32 %v2840_v19  ;;  %v6278_v19 = vld [vmem:[#allocation6 + $0x1a0] sm:$0xff] }
 0x805   :  { %v3870_v52 = vpop.eup %3869 }
 0x806   :  { %v2854_v29 = vadd.f32 %v3870_v52, %v3868_v18  ;;  %v3872_v50 = vpop.eup %3871  ;;  %v6281_v18 = vld [vmem:[#allocation6 + $0x1b0] sm:$0xff]  ;;  %v6284_v52 = vld [vmem:[#allocation6 + $0x168] sm:$0xff] }
 0x807   :  { %v3874_v36 = vpop.eup %3873  ;;  %7512 = vst [vmem:[#allocation15_spill] sm:$0xff] %v6284_v52 }
 0x808   :  { %3875 = vtanh.f32 %v2854_v29  ;;  %v6231_v51 = vmul.f32 %v3874_v36, %v3872_v50  ;;  %v6287_v29 = vld [vmem:[#allocation6 + $0x178] sm:$0xff]  ;;  %v6290_v50 = vld [vmem:[#allocation6 + $0x160] sm:$0xff]  ;;  %v6293_v36 = vld [vmem:[#allocation6 + $0x170] sm:$0xff] }
 0x809   :  { %7513 = vst [vmem:[#allocation26_spill] sm:$0xff] %v6287_v29  ;;  %7514 = vst [vmem:[#allocation27_spill] sm:$0xff] %v6290_v50 }
 0x80a   :  { %7515 = vst [vmem:[#allocation28_spill] sm:$0xff] %v6293_v36 }
 0x815   :  { %v3876_v39 = vpop.eup %3875 }
 0x816   :  { %v2856_v49 = vmul.f32 %v3876_v39, %v6231_v51  ;;  %v6296_v39 = vld [vmem:[#allocation6 + $0x128] sm:$0xff] }
 0x817   :  { %7516 = vst [vmem:[#allocation29_spill] sm:$0xff] %v6296_v39 }
 0x818   :  { %3877 = vtanh.f32 %v2856_v49  ;;  %v6299_v49 = vld [vmem:[#allocation6 + $0x138] sm:$0xff] }
 0x819   :  { %7517 = vst [vmem:[#allocation30_spill] sm:$0xff] %v6299_v49 }
 0x825   :  { %v6234_v20 = vpop.eup %3877 }
 0x826   :  { %2934 = vmatmul.mubr.f32.vlgmr.msra.gmra.mxu0 %v6234_v20  ;;  %3005 = vmatmul.mubr.f32.vlgmr.msra.gmra.mxu1 %v6234_v20 }
 0x827   :  { %3012 = vmatpush1.msra.mxu0 %v5968_v42  ;;  %3083 = vmatpush1.msra.mxu1 %v5971_v7 }
 0x828   :  { %3013 = vmatprep.subr.mxu0 %v5974_v14  ;;  %3084 = vmatprep.subr.mxu1 %v5977_v63 }
 0x829   :  { %3014 = vmatpush1.msra.mxu0 %v5980_v12  ;;  %3085 = vmatpush1.msra.mxu1 %v5983_v33 }
 0x82a   :  { %3015 = vmatprep.subr.mxu0 %v5986_v0  ;;  %3086 = vmatprep.subr.mxu1 %v5989_v58 }
 0x82b   :  { %3016 = vmatpush1.msra.mxu0 %v5992_v38  ;;  %3087 = vmatpush1.msra.mxu1 %v5995_v35 }
 0x82c   :  { %3017 = vmatprep.subr.mxu0 %v5998_v59  ;;  %3088 = vmatprep.subr.mxu1 %v6001_v32 }
 0x82d   :  { %3018 = vmatpush1.msra.mxu0 %v6004_v61  ;;  %3089 = vmatpush1.msra.mxu1 %v6007_v2 }
 0x82e   :  { %3019 = vmatprep.subr.mxu0 %v6010_v8  ;;  %3090 = vmatprep.subr.mxu1 %v6013_v41 }
 0x82f   :  { %3020 = vmatpush1.msra.mxu0 %v7500_v13  ;;  %3091 = vmatpush1.msra.mxu1 %v7501_v48 }
 0x830   :  { %3021 = vmatprep.subr.mxu0 %v7502_v44  ;;  %3092 = vmatprep.subr.mxu1 %v7503_v24 }
 0x831   :  { %3022 = vmatpush1.msra.mxu0 %v7504_v5  ;;  %3093 = vmatpush1.msra.mxu1 %v7505_v23 }
 0x832   :  { %3023 = vmatprep.subr.mxu0 %v7506_v40  ;;  %3094 = vmatprep.subr.mxu1 %v7507_v43 }
 0x833   :  { %3024 = vmatpush1.msra.mxu0 %v7508_v28  ;;  %3095 = vmatpush1.msra.mxu1 %v7509_v25 }
 0x834   :  { %3025 = vmatprep.subr.mxu0 %v7510_v21  ;;  %3096 = vmatprep.subr.mxu1 %v7511_v45 }
 0x835   :  { %3026 = vmatpush1.msra.mxu0 %v6052_v37  ;;  %3097 = vmatpush1.msra.mxu1 %v6055_v4 }
 0x836   :  { %3027 = vmatprep.subr.mxu0 %v6058_v31  ;;  %3098 = vmatprep.subr.mxu1 %v6061_v34 }
 0x837   :  { %3028 = vmatpush1.msra.mxu0 %v6064_v62  ;;  %3099 = vmatpush1.msra.mxu1 %v6067_v30 }
 0x838   :  { %3029 = vmatprep.subr.mxu0 %v6272_v26  ;;  %3100 = vmatprep.subr.mxu1 %v6275_v27 }
 0x839   :  { %3030 = vmatpush1.msra.mxu0 %v6278_v19  ;;  %3101 = vmatpush1.msra.mxu1 %v6281_v18 }
 0x83a   :  { %3031 = vmatprep.subr.mxu0 %v6284_v52  ;;  %3102 = vmatprep.subr.mxu1 %v6287_v29  ;;  %v6302_v52 = vld [vmem:[#allocation6 + $0x120] sm:$0xff]  ;;  %v6305_v29 = vld [vmem:[#allocation6 + $0x130] sm:$0xff] }
 0x83b   :  { %3032 = vmatpush1.msra.mxu0 %v6290_v50  ;;  %3103 = vmatpush1.msra.mxu1 %v6293_v36  ;;  %7518 = vst [vmem:[#allocation31_spill] sm:$0xff] %v6302_v52  ;;  %7519 = vst [vmem:[#allocation32_spill] sm:$0xff] %v6305_v29  ;;  %v6308_v50 = vld [vmem:[#allocation6 + $0xe8] sm:$0xff]  ;;  %v6311_v36 = vld [vmem:[#allocation6 + $0xf8] sm:$0xff] }
 0x83c   :  { %3033 = vmatprep.subr.mxu0 %v6296_v39  ;;  %3104 = vmatprep.subr.mxu1 %v6299_v49  ;;  %7520 = vst [vmem:[#allocation33_spill] sm:$0xff] %v6308_v50  ;;  %7521 = vst [vmem:[#allocation34_spill] sm:$0xff] %v6311_v36  ;;  %v6314_v39 = vld [vmem:[#allocation6 + $0xe0] sm:$0xff]  ;;  %v6317_v49 = vld [vmem:[#allocation6 + $0xf0] sm:$0xff] }
 0x83d   :  { %3034 = vmatpush1.msra.mxu0 %v6302_v52  ;;  %3105 = vmatpush1.msra.mxu1 %v6305_v29  ;;  %7522 = vst [vmem:[#allocation35_spill] sm:$0xff] %v6314_v39  ;;  %7523 = vst [vmem:[#allocation36_spill] sm:$0xff] %v6317_v49  ;;  %v6320_v52 = vld [vmem:[#allocation6 + $0xa8] sm:$0xff]  ;;  %v6323_v29 = vld [vmem:[#allocation6 + $0xb8] sm:$0xff] }
 0x83e   :  { %3035 = vmatprep.subr.mxu0 %v6308_v50  ;;  %3106 = vmatprep.subr.mxu1 %v6311_v36  ;;  %7524 = vst [vmem:[#allocation37_spill] sm:$0xff] %v6320_v52  ;;  %7525 = vst [vmem:[#allocation77_spill] sm:$0xff] %v6323_v29  ;;  %v6326_v50 = vld [vmem:[#allocation6 + $0xa0] sm:$0xff]  ;;  %v6329_v36 = vld [vmem:[#allocation6 + $0xb0] sm:$0xff] }
 0x83f   :  { %3036 = vmatpush1.msra.mxu0 %v6314_v39  ;;  %3107 = vmatpush1.msra.mxu1 %v6317_v49  ;;  %7526 = vst [vmem:[#allocation107_spill] sm:$0xff] %v6326_v50  ;;  %7527 = vst [vmem:[#allocation108_spill] sm:$0xff] %v6329_v36  ;;  %v6332_v39 = vld [vmem:[#allocation6 + $0x68] sm:$0xff]  ;;  %v6335_v49 = vld [vmem:[#allocation6 + $0x78] sm:$0xff] }
 0x840   :  { %3037 = vmatprep.subr.mxu0 %v6320_v52  ;;  %3108 = vmatprep.subr.mxu1 %v6323_v29  ;;  %7528 = vst [vmem:[#allocation105_spill] sm:$0xff] %v6332_v39  ;;  %7529 = vst [vmem:[#allocation78_spill] sm:$0xff] %v6335_v49  ;;  %v6338_v52 = vld [vmem:[#allocation6 + $0x60] sm:$0xff]  ;;  %v6341_v29 = vld [vmem:[#allocation6 + $0x70] sm:$0xff] }
 0x841   :  { %3038 = vmatpush1.msra.mxu0 %v6326_v50  ;;  %3109 = vmatpush1.msra.mxu1 %v6329_v36  ;;  %v6344_v50 = vld [vmem:[#allocation6 + $0x28] sm:$0xff]  ;;  %v6347_v36 = vld [vmem:[#allocation6 + $0x38] sm:$0xff] }
 0x842   :  { %3039 = vmatprep.subr.mxu0 %v6332_v39  ;;  %3110 = vmatprep.subr.mxu1 %v6335_v49  ;;  %7530 = vst [vmem:[#allocation106_spill] sm:$0xff] %v6344_v50  ;;  %7531 = vst [vmem:[#allocation79_spill] sm:$0xff] %v6347_v36  ;;  %v6350_v39 = vld [vmem:[#allocation6 + $0x20] sm:$0xff]  ;;  %v6354_v49 = vld [vmem:[#allocation6 + $0x30] sm:$0xff] }
 0x843   :  { %3040 = vmatpush1.msra.mxu0 %v6338_v52  ;;  %3111 = vmatpush1.msra.mxu1 %v6341_v29  ;;  %7532 = vst [vmem:[#allocation80_spill] sm:$0xff] %v6350_v39  ;;  %7533 = vst [vmem:[#allocation38_spill] sm:$0xff] %v6354_v49 }
 0x844   :  { %3041 = vmatprep.subr.mxu0 %v6344_v50  ;;  %3112 = vmatprep.subr.mxu1 %v6347_v36 }
 0x845   :  { %3042 = vmatpush1.msra.mxu0 %v6350_v39  ;;  %3075 = vmatprep.mubr.f32.mxu0 %v7360_v47 }
 0x846   :  { %3113 = vmatpush1.msra.mxu1 %v6354_v49  ;;  %3146 = vmatprep.mubr.f32.mxu1 %v7360_v47 }
 0x847   :  { %3076 = vmatmul.mubr.f32.vlgmr.msra.gmra.mxu0 %v6234_v20  ;;  %3147 = vmatmul.mubr.f32.vlgmr.msra.gmra.mxu1 %v6234_v20  ;;  %v7551_v20 = vld [vmem:[#allocation61_spill] sm:$0xff] }
 0x848   :  { %3220 = vmatprep.subr.mxu0 %v5804_v11  ;;  %3291 = vmatprep.subr.mxu1 %v5807_v46  ;;  %v7534_v11 = vld [vmem:[#allocation44_spill] sm:$0xff]  ;;  %v7535_v46 = vld [vmem:[#allocation45_spill] sm:$0xff] }
 0x849   :  { %3221 = vmatpush1.msra.mxu0 %v5810_v54  ;;  %3292 = vmatpush1.msra.mxu1 %v5813_v1  ;;  %v7536_v54 = vld [vmem:[#allocation46_spill] sm:$0xff]  ;;  %v7537_v1 = vld [vmem:[#allocation47_spill] sm:$0xff] }
 0x84a   :  { %3222 = vmatprep.subr.mxu0 %v5816_v22  ;;  %3293 = vmatprep.subr.mxu1 %v5819_v10  ;;  %v7538_v22 = vld [vmem:[#allocation48_spill] sm:$0xff]  ;;  %v7539_v10 = vld [vmem:[#allocation49_spill] sm:$0xff] }
 0x84b   :  { %3223 = vmatpush1.msra.mxu0 %v5822_v6  ;;  %3294 = vmatpush1.msra.mxu1 %v5825_v9  ;;  %v7540_v6 = vld [vmem:[#allocation50_spill] sm:$0xff]  ;;  %v7541_v9 = vld [vmem:[#allocation51_spill] sm:$0xff] }
 0x84c   :  { %3224 = vmatprep.subr.mxu0 %v5828_v3  ;;  %3295 = vmatprep.subr.mxu1 %v5831_v60  ;;  %v7542_v3 = vld [vmem:[#allocation52_spill] sm:$0xff]  ;;  %v7543_v60 = vld [vmem:[#allocation53_spill] sm:$0xff] }
 0x84d   :  { %3225 = vmatpush1.msra.mxu0 %v5834_v17  ;;  %3296 = vmatpush1.msra.mxu1 %v7437_v56  ;;  %v7544_v17 = vld [vmem:[#allocation54_spill] sm:$0xff]  ;;  %v7545_v56 = vld [vmem:[#allocation55_spill] sm:$0xff] }
 0x84e   :  { %3226 = vmatprep.subr.mxu0 %v7438_v55  ;;  %3297 = vmatprep.subr.mxu1 %v7439_v16  ;;  %v7546_v55 = vld [vmem:[#allocation56_spill] sm:$0xff]  ;;  %v7547_v16 = vld [vmem:[#allocation57_spill] sm:$0xff] }
 0x84f   :  { %3227 = vmatpush1.msra.mxu0 %v7440_v57  ;;  %3298 = vmatpush1.msra.mxu1 %v7441_v15  ;;  %v7548_v57 = vld [vmem:[#allocation58_spill] sm:$0xff]  ;;  %v7549_v15 = vld [vmem:[#allocation59_spill] sm:$0xff] }
 0x850   :  { %3228 = vmatprep.subr.mxu0 %v7442_v53  ;;  %3299 = vmatprep.subr.mxu1 %v7534_v11  ;;  %v7550_v53 = vld [vmem:[#allocation60_spill] sm:$0xff] }
 0x851   :  { %3229 = vmatpush1.msra.mxu0 %v7535_v46  ;;  %3300 = vmatpush1.msra.mxu1 %v7536_v54  ;;  %v7552_v11 = vld [vmem:[#allocation20_spill] sm:$0xff]  ;;  %v7553_v46 = vld [vmem:[#allocation103_spill] sm:$0xff] }
 0x852   :  { %3230 = vmatprep.subr.mxu0 %v7537_v1  ;;  %3301 = vmatprep.subr.mxu1 %v7538_v22  ;;  %v7554_v54 = vld [vmem:[#allocation104_spill] sm:$0xff]  ;;  %v7555_v1 = vld [vmem:[#allocation101_spill] sm:$0xff] }
 0x853   :  { %3231 = vmatpush1.msra.mxu0 %v7539_v10  ;;  %3302 = vmatpush1.msra.mxu1 %v7540_v6  ;;  %v7556_v22 = vld [vmem:[#allocation21_spill] sm:$0xff]  ;;  %v7557_v10 = vld [vmem:[#allocation63_spill] sm:$0xff]  ;;  %v7558_v6 = vld [vmem:[#allocation64_spill] sm:$0xff] }
 0x854   :  { %3232 = vmatprep.subr.mxu0 %v7541_v9  ;;  %3303 = vmatprep.subr.mxu1 %v7542_v3  ;;  %v7559_v9 = vld [vmem:[#allocation65_spill] sm:$0xff]  ;;  %v7560_v3 = vld [vmem:[#allocation66_spill] sm:$0xff] }
 0x855   :  { %3233 = vmatpush1.msra.mxu0 %v7543_v60  ;;  %3304 = vmatpush1.msra.mxu1 %v7544_v17  ;;  %v7561_v60 = vld [vmem:[#allocation67_spill] sm:$0xff]  ;;  %v7562_v17 = vld [vmem:[#allocation68_spill] sm:$0xff] }
 0x856   :  { %3234 = vmatprep.subr.mxu0 %v7545_v56  ;;  %3305 = vmatprep.subr.mxu1 %v7546_v55  ;;  %v7563_v56 = vld [vmem:[#allocation69_spill] sm:$0xff]  ;;  %v7564_v55 = vld [vmem:[#allocation70_spill] sm:$0xff] }
 0x857   :  { %3235 = vmatpush1.msra.mxu0 %v7547_v16  ;;  %3306 = vmatpush1.msra.mxu1 %v7548_v57  ;;  %v7565_v16 = vld [vmem:[#allocation71_spill] sm:$0xff]  ;;  %v7566_v57 = vld [vmem:[#allocation72_spill] sm:$0xff] }
 0x858   :  { %3236 = vmatprep.subr.mxu0 %v7549_v15  ;;  %3307 = vmatprep.subr.mxu1 %v7550_v53  ;;  %v7567_v15 = vld [vmem:[#allocation121_spill] sm:$0xff]  ;;  %v7568_v53 = vld [vmem:[#allocation122_spill] sm:$0xff] }
 0x859   :  { %3237 = vmatpush1.msra.mxu0 %v7551_v20  ;;  %3308 = vmatpush1.msra.mxu1 %v7552_v11  ;;  %v7569_v20 = vld [vmem:[#allocation123_spill] sm:$0xff]  ;;  %v7570_v11 = vld [vmem:[#allocation73_spill] sm:$0xff] }
 0x85a   :  { %3238 = vmatprep.subr.mxu0 %v7553_v46  ;;  %3309 = vmatprep.subr.mxu1 %v7554_v54  ;;  %v7571_v46 = vld [vmem:[#allocation74_spill] sm:$0xff]  ;;  %v7572_v54 = vld [vmem:[#allocation75_spill] sm:$0xff] }
 0x85b   :  { %3239 = vmatpush1.msra.mxu0 %v7555_v1  ;;  %3310 = vmatpush1.msra.mxu1 %v7556_v22  ;;  %v7573_v1 = vld [vmem:[#allocation76_spill] sm:$0xff] }
 0x85c   :  { %3240 = vmatprep.subr.mxu0 %v7557_v10  ;;  %3311 = vmatprep.subr.mxu1 %v7558_v6  ;;  %v7574_v22 = vld [vmem:[#allocation24_spill] sm:$0xff]  ;;  %v7575_v10 = vld [vmem:[#allocation25_spill] sm:$0xff] }
 0x85d   :  { %3241 = vmatpush1.msra.mxu0 %v7559_v9  ;;  %3312 = vmatpush1.msra.mxu1 %v7560_v3  ;;  %v7576_v6 = vld [vmem:[#allocation12_spill] sm:$0xff]  ;;  %v7577_v9 = vld [vmem:[#allocation95_spill] sm:$0xff] }
 0x85e   :  { %3242 = vmatprep.subr.mxu0 %v7561_v60  ;;  %3313 = vmatprep.subr.mxu1 %v7562_v17  ;;  %v7578_v3 = vld [vmem:[#allocation96_spill] sm:$0xff]  ;;  %v7579_v60 = vld [vmem:[#allocation93_spill] sm:$0xff] }
 0x85f   :  { %3243 = vmatpush1.msra.mxu0 %v7563_v56  ;;  %3314 = vmatpush1.msra.mxu1 %v7564_v55  ;;  %v7580_v17 = vld [vmem:[#allocation13_spill] sm:$0xff]  ;;  %v7581_v56 = vld [vmem:[#allocation94_spill] sm:$0xff] }
 0x860   :  { %3244 = vmatprep.subr.mxu0 %v7565_v16  ;;  %3315 = vmatprep.subr.mxu1 %v7566_v57  ;;  %v7582_v55 = vld [vmem:[#allocation14_spill] sm:$0xff] }
 0x861   :  { %3245 = vmatpush1.msra.mxu0 %v7567_v15  ;;  %3316 = vmatpush1.msra.mxu1 %v7568_v53 }
 0x862   :  { %3246 = vmatprep.subr.mxu0 %v7569_v20  ;;  %3317 = vmatprep.subr.mxu1 %v7570_v11  ;;  %v7583_v11 = vld [vmem:[#allocation86_spill] sm:$0xff] }
 0x863   :  { %3247 = vmatpush1.msra.mxu0 %v7571_v46  ;;  %3318 = vmatpush1.msra.mxu1 %v7572_v54 }
 0x864   :  { %3248 = vmatprep.subr.mxu0 %v7573_v1  ;;  %3319 = vmatprep.subr.mxu1 %v7574_v22  ;;  %v7584_v22 = vld [vmem:[#allocation115_spill] sm:$0xff] }
 0x865   :  { %3249 = vmatpush1.msra.mxu0 %v7575_v10  ;;  %3320 = vmatpush1.msra.mxu1 %v7576_v6 }
 0x866   :  { %3250 = vmatprep.subr.mxu0 %v7577_v9  ;;  %3321 = vmatprep.subr.mxu1 %v7578_v3 }
 0x867   :  { %3251 = vmatpush1.msra.mxu0 %v7579_v60  ;;  %3322 = vmatpush1.msra.mxu1 %v7580_v17  ;;  %v7585_v60 = vld [vmem:[#allocation116_spill] sm:$0xff] }
 0x868   :  { %3284 = vmatprep.mubr.f32.mxu0 %v7360_v47  ;;  %3355 = vmatprep.mubr.f32.mxu1 %v7360_v47 }
 0x869   :  { %3362 = vmatprep.subr.mxu0 %v7581_v56  ;;  %3433 = vmatprep.subr.mxu1 %v7582_v55  ;;  %v7586_v55 = vld [vmem:[#allocation113_spill] sm:$0xff] }
 0x8e6   :  { %v3006_v16 = vpop.f32.mrf.mxu1  ;;  %v2935_v57 = vpop.f32.mrf.mxu0 }
 0x8e7   :  { %v3153_v46 = vadd.f32 %v2935_v57, %v7583_v11  ;;  %v7587_v57 = vld [vmem:[#allocation85_spill] sm:$0xff] }
 0x8e8   :  { %v3008_v15 = vpop.f32.mrf.mxu1  ;;  %v2937_v53 = vpop.f32.mrf.mxu0  ;;  %v3155_v11 = vadd.f32 %v3006_v16, %v7587_v57 }
 0x8e9   :  { %v3647_v9 = vmul.f32 -1.442695, %v3153_v46 }
 0x907   :  { %v3148_v20 = vpop.f32.mrf.mxu1  ;;  %v3077_v54 = vpop.f32.mrf.mxu0 }
 0x908   :  { %v3159_v49 = vadd.f32 %v3148_v20, %v7586_v55  ;;  %v7589_v20 = vld [vmem:[#allocation88_spill] sm:$0xff] }
 0x909   :  { %v3150_v1 = vpop.f32.mrf.mxu1  ;;  %v3079_v3 = vpop.f32.mrf.mxu0 }
 0x90a   :  { %v3160_v10 = vadd.f32 %v3150_v1, %v7584_v22  ;;  %v3158_v17 = vadd.f32 %v3079_v3, %v7585_v60  ;;  %v3648_v1 = vmul.f32 -1.442695, %v3155_v11 }
 0x90c   :  { %v3650_v6 = vmul.f32 -1.442695, %v3160_v10  ;;  %v3649_v56 = vmul.f32 -1.442695, %v3158_v17  ;;  %v7588_v10 = vld [vmem:[#allocation114_spill] sm:$0xff] }
 0x90e   :  { %3879 = vpow2.f32 %v3650_v6  ;;  %v3157_v6 = vadd.f32 %v3077_v54, %v7588_v10 }
 0x90f   :  { %3881 = vpow2.f32 %v3647_v9 }
 0x910   :  { %3883 = vpow2.f32 %v3649_v56 }
 0x911   :  { %3885 = vtanh.f32 %v3159_v49 }
 0x91b   :  { %v3880_v47 = vpop.eup %3879 }
 0x91c   :  { %v3186_v39 = vadd.f32 1.0, %v3880_v47  ;;  %v3882_v36 = vpop.eup %3881  ;;  %v3154_v47 = vadd.f32 %v2937_v53, %v7589_v20 }
 0x91d   :  { %v3164_v50 = vadd.f32 1.0, %v3882_v36  ;;  %v3884_v22 = vpop.eup %3883 }
 0x91e   :  { %3887 = vrcp.f32 %v3186_v39  ;;  %v3179_v46 = vadd.f32 1.0, %v3884_v22  ;;  %v3886_v9 = vpop.eup %3885  ;;  %v3167_v16 = vmax.f32 %v3154_v47, 0.0 }
 0x91f   :  { %3889 = vrcp.f32 %v3164_v50 }
 0x920   :  { %3891 = vpow2.f32 %v3648_v1  ;;  %v7590_v1 = vld [vmem:[#allocation87_spill] sm:$0xff] }
 0x921   :  { %3893 = vrcp.f32 %v3179_v46  ;;  %v3156_v22 = vadd.f32 %v3008_v15, %v7590_v1 }
 0x922   :  { %3895 = vtanh.f32 %v3157_v6 }
 0x923   :  { %v3174_v6 = vmax.f32 %v3156_v22, 0.0 }
 0x92b   :  { %v3888_v3 = vpop.eup %3887 }
 0x92c   :  { %v3195_v60 = vadd.f32 %v3888_v3, %v3886_v9  ;;  %v3890_v49 = vpop.eup %3889 }
 0x92d   :  { %v3892_v39 = vpop.eup %3891  ;;  %v3189_v36 = vmul.f32 %v3890_v49, %v3167_v16 }
 0x92e   :  { %v3651_v17 = vmul.f32 -1.442695, %v3195_v60  ;;  %v3171_v56 = vadd.f32 1.0, %v3892_v39  ;;  %v3894_v55 = vpop.eup %3893 }
 0x92f   :  { %v3896_v50 = vpop.eup %3895 }
 0x930   :  { %3897 = vpow2.f32 %v3651_v17  ;;  %v3193_v57 = vmul.f32 %v3896_v50, %v3894_v55 }
 0x931   :  { %3899 = vtanh.f32 %v3189_v36 }
 0x932   :  { %3901 = vrcp.f32 %v3171_v56 }
 0x933   :  { %3903 = vtanh.f32 %v3193_v57  ;;  %v7618_v57 = vld [vmem:[#allocation89_spill] sm:$0xff] }
 0x93d   :  { %v3898_v54 = vpop.eup %3897 }
 0x93e   :  { %v3199_v11 = vadd.f32 1.0, %v3898_v54  ;;  %v3900_v46 = vpop.eup %3899 }
 0x93f   :  { %v3902_v53 = vpop.eup %3901  ;;  %v3202_v10 = vadd.f32 %v3900_v46, %v6231_v51  ;;  %v7613_v51 = vld [vmem:[#allocation38_spill] sm:$0xff] }
 0x940   :  { %3905 = vrcp.f32 %v3199_v11  ;;  %v3191_v9 = vadd.f32 %v3902_v53, %v3174_v6  ;;  %v3904_v3 = vpop.eup %3903  ;;  %v7619_v53 = vld [vmem:[#allocation118_spill] sm:$0xff] }
 0x941   :  { %3907 = vtanh.f32 %v3202_v10 }
 0x942   :  { %3909 = vtanh.f32 %v3191_v9 }
 0x94d   :  { %v3906_v60 = vpop.eup %3905 }
 0x94e   :  { %v3205_v20 = vadd.f32 %v3906_v60, %v3904_v3  ;;  %v3908_v47 = vpop.eup %3907  ;;  %v7620_v60 = vld [vmem:[#allocation92_spill] sm:$0xff] }
 0x94f   :  { %v3910_v17 = vpop.eup %3909 }
 0x950   :  { %3911 = vtanh.f32 %v3205_v20  ;;  %v6437_v49 = vmul.f32 %v3910_v17, %v3908_v47 }
 0x95d   :  { %v3912_v16 = vpop.eup %3911 }
 0x95e   :  { %v3207_v39 = vmul.f32 %v3912_v16, %v6437_v49 }
 0x960   :  { %3913 = vtanh.f32 %v3207_v39 }
 0x96d   :  { %v6440_v15 = vpop.eup %3913 }
 0x96e   :  { %3285 = vmatmul.mubr.f32.vlgmr.msra.gmra.mxu0 %v6440_v15  ;;  %3356 = vmatmul.mubr.f32.vlgmr.msra.gmra.mxu1 %v6440_v15 }
 0x96f   :  { %3363 = vmatpush1.msra.mxu0 %v5968_v42  ;;  %3434 = vmatpush1.msra.mxu1 %v5971_v7  ;;  %v7591_v42 = vld [vmem:[#allocation15_spill] sm:$0xff]  ;;  %v7592_v7 = vld [vmem:[#allocation26_spill] sm:$0xff] }
 0x970   :  { %3364 = vmatprep.subr.mxu0 %v5974_v14  ;;  %3435 = vmatprep.subr.mxu1 %v5977_v63  ;;  %v7593_v14 = vld [vmem:[#allocation27_spill] sm:$0xff]  ;;  %v7594_v63 = vld [vmem:[#allocation28_spill] sm:$0xff] }
 0x971   :  { %3365 = vmatpush1.msra.mxu0 %v5980_v12  ;;  %3436 = vmatpush1.msra.mxu1 %v5983_v33  ;;  %v7595_v12 = vld [vmem:[#allocation29_spill] sm:$0xff]  ;;  %v7596_v33 = vld [vmem:[#allocation30_spill] sm:$0xff] }
 0x972   :  { %3366 = vmatprep.subr.mxu0 %v5986_v0  ;;  %3437 = vmatprep.subr.mxu1 %v5989_v58  ;;  %v7597_v0 = vld [vmem:[#allocation31_spill] sm:$0xff]  ;;  %v7598_v58 = vld [vmem:[#allocation32_spill] sm:$0xff] }
 0x973   :  { %3367 = vmatpush1.msra.mxu0 %v5992_v38  ;;  %3438 = vmatpush1.msra.mxu1 %v5995_v35  ;;  %v7599_v38 = vld [vmem:[#allocation33_spill] sm:$0xff]  ;;  %v7600_v35 = vld [vmem:[#allocation34_spill] sm:$0xff] }
 0x974   :  { %3368 = vmatprep.subr.mxu0 %v5998_v59  ;;  %3439 = vmatprep.subr.mxu1 %v6001_v32  ;;  %v7601_v59 = vld [vmem:[#allocation35_spill] sm:$0xff]  ;;  %v7602_v32 = vld [vmem:[#allocation36_spill] sm:$0xff] }
 0x975   :  { %3369 = vmatpush1.msra.mxu0 %v6004_v61  ;;  %3440 = vmatpush1.msra.mxu1 %v6007_v2  ;;  %v7603_v61 = vld [vmem:[#allocation37_spill] sm:$0xff] }
 0x976   :  { %3370 = vmatprep.subr.mxu0 %v6010_v8  ;;  %3441 = vmatprep.subr.mxu1 %v6013_v41  ;;  %v7604_v2 = vld [vmem:[#allocation77_spill] sm:$0xff]  ;;  %v7605_v8 = vld [vmem:[#allocation107_spill] sm:$0xff]  ;;  %v7606_v41 = vld [vmem:[#allocation108_spill] sm:$0xff] }
 0x977   :  { %3371 = vmatpush1.msra.mxu0 %v7500_v13  ;;  %3442 = vmatpush1.msra.mxu1 %v7501_v48 }
 0x978   :  { %3372 = vmatprep.subr.mxu0 %v7502_v44  ;;  %3443 = vmatprep.subr.mxu1 %v7503_v24 }
 0x979   :  { %3373 = vmatpush1.msra.mxu0 %v7504_v5  ;;  %3444 = vmatpush1.msra.mxu1 %v7505_v23  ;;  %v7614_v23 = vld [vmem:[#allocation90_spill] sm:$0xff] }
 0x97a   :  { %3374 = vmatprep.subr.mxu0 %v7506_v40  ;;  %3445 = vmatprep.subr.mxu1 %v7507_v43 }
 0x97b   :  { %3375 = vmatpush1.msra.mxu0 %v7508_v28  ;;  %3446 = vmatpush1.msra.mxu1 %v7509_v25  ;;  %v7615_v25 = vld [vmem:[#allocation119_spill] sm:$0xff] }
 0x97c   :  { %3376 = vmatprep.subr.mxu0 %v7510_v21  ;;  %3447 = vmatprep.subr.mxu1 %v7511_v45 }
 0x97d   :  { %3377 = vmatpush1.msra.mxu0 %v6052_v37  ;;  %3448 = vmatpush1.msra.mxu1 %v6055_v4  ;;  %v7607_v37 = vld [vmem:[#allocation105_spill] sm:$0xff]  ;;  %v7608_v4 = vld [vmem:[#allocation78_spill] sm:$0xff] }
 0x97e   :  { %3378 = vmatprep.subr.mxu0 %v6058_v31  ;;  %3449 = vmatprep.subr.mxu1 %v6061_v34  ;;  %v7609_v31 = vld [vmem:[#allocation106_spill] sm:$0xff]  ;;  %v7610_v34 = vld [vmem:[#allocation79_spill] sm:$0xff] }
 0x97f   :  { %3379 = vmatpush1.msra.mxu0 %v6064_v62  ;;  %3450 = vmatpush1.msra.mxu1 %v6067_v30  ;;  %v7611_v62 = vld [vmem:[#allocation80_spill] sm:$0xff]  ;;  %v7612_v30 = vmov 0.0  }
 0x980   :  { %3380 = vmatprep.subr.mxu0 %v6272_v26  ;;  %3451 = vmatprep.subr.mxu1 %v6275_v27 }
 0x981   :  { %3381 = vmatpush1.msra.mxu0 %v6278_v19  ;;  %3452 = vmatpush1.msra.mxu1 %v6281_v18  ;;  %v7616_v19 = vld [vmem:[#allocation120_spill] sm:$0xff] }
 0x982   :  { %3382 = vmatprep.subr.mxu0 %v7591_v42  ;;  %3453 = vmatprep.subr.mxu1 %v7592_v7 }
 0x983   :  { %3383 = vmatpush1.msra.mxu0 %v7593_v14  ;;  %3454 = vmatpush1.msra.mxu1 %v7594_v63 }
 0x984   :  { %3384 = vmatprep.subr.mxu0 %v7595_v12  ;;  %3455 = vmatprep.subr.mxu1 %v7596_v33 }
 0x985   :  { %3385 = vmatpush1.msra.mxu0 %v7597_v0  ;;  %3456 = vmatpush1.msra.mxu1 %v7598_v58  ;;  %v7621_v0 = vld [vmem:[#allocation91_spill] sm:$0xff] }
 0x986   :  { %3386 = vmatprep.subr.mxu0 %v7599_v38  ;;  %3457 = vmatprep.subr.mxu1 %v7600_v35 }
 0x987   :  { %3387 = vmatpush1.msra.mxu0 %v7601_v59  ;;  %3458 = vmatpush1.msra.mxu1 %v7602_v32 }
 0x988   :  { %3388 = vmatprep.subr.mxu0 %v7603_v61  ;;  %3459 = vmatprep.subr.mxu1 %v7604_v2 }
 0x989   :  { %3389 = vmatpush1.msra.mxu0 %v7605_v8  ;;  %3460 = vmatpush1.msra.mxu1 %v7606_v41 }
 0x98a   :  { %3390 = vmatprep.subr.mxu0 %v7607_v37  ;;  %3461 = vmatprep.subr.mxu1 %v7608_v4 }
 0x98b   :  { %3391 = vmatpush1.msra.mxu0 %v6338_v52  ;;  %3462 = vmatpush1.msra.mxu1 %v6341_v29  ;;  %v7617_v29 = vld [vmem:[#allocation117_spill] sm:$0xff] }
 0x98c   :  { %3392 = vmatprep.subr.mxu0 %v7609_v31  ;;  %3463 = vmatprep.subr.mxu1 %v7610_v34 }
 0x98d   :  { %3393 = vmatpush1.msra.mxu0 %v7611_v62  ;;  %3426 = vmatprep.mubr.f32.mxu0 %v7612_v30 }
 0x98e   :  { %3464 = vmatpush1.msra.mxu1 %v7613_v51  ;;  %3497 = vmatprep.mubr.f32.mxu1 %v7612_v30 }
 0x98f   :  { %3427 = vmatmul.mubr.f32.vlgmr.msra.gmra.mxu0 %v6440_v15  ;;  %3498 = vmatmul.mubr.f32.vlgmr.msra.gmra.mxu1 %v6440_v15 }
 0xa2e   :  { %v3357_v13 = vpop.f32.mrf.mxu1  ;;  %v3286_v48 = vpop.f32.mrf.mxu0 }
 0xa2f   :  { %v3504_v40 = vadd.f32 %v3286_v48, %v7614_v23  ;;  %v3506_v54 = vadd.f32 %v3357_v13, %v7618_v57 }
 0xa30   :  { %v3359_v44 = vpop.f32.mrf.mxu1  ;;  %v3288_v24 = vpop.f32.mrf.mxu0 }
 0xa31   :  { %v3652_v26 = vmul.f32 -1.442695, %v3504_v40  ;;  %v3653_v1 = vmul.f32 -1.442695, %v3506_v54  ;;  %v3505_v20 = vadd.f32 %v3288_v24, %v7620_v60  ;;  %v3507_v58 = vadd.f32 %v3359_v44, %v7621_v0 }
 0xa33   :  { %v3518_v16 = vmax.f32 %v3505_v20, 0.0  ;;  %v3525_v32 = vmax.f32 %v3507_v58, 0.0 }
 0xa4f   :  { %v3499_v5 = vpop.f32.mrf.mxu1  ;;  %v3428_v43 = vpop.f32.mrf.mxu0 }
 0xa50   :  { %v3510_v36 = vadd.f32 %v3499_v5, %v7617_v29  ;;  %v3508_v10 = vadd.f32 %v3428_v43, %v7619_v53 }
 0xa51   :  { %v3501_v28 = vpop.f32.mrf.mxu1  ;;  %v3430_v27 = vpop.f32.mrf.mxu0 }
 0xa52   :  { %v3511_v21 = vadd.f32 %v3501_v28, %v7615_v25  ;;  %v3509_v18 = vadd.f32 %v3430_v27, %v7616_v19 }
 0xa54   :  { %v3655_v45 = vmul.f32 -1.442695, %v3511_v21  ;;  %v3654_v52 = vmul.f32 -1.442695, %v3509_v18 }
 0xa56   :  { %3915 = vpow2.f32 %v3655_v45 }
 0xa57   :  { %3917 = vpow2.f32 %v3652_v26 }
 0xa58   :  { %3919 = vpow2.f32 %v3654_v52 }
 0xa59   :  { %3921 = vtanh.f32 %v3510_v36 }
 0xa63   :  { %v3916_v56 = vpop.eup %3915 }
 0xa64   :  { %v3537_v55 = vadd.f32 1.0, %v3916_v56  ;;  %v3918_v50 = vpop.eup %3917 }
 0xa65   :  { %v3515_v11 = vadd.f32 1.0, %v3918_v50  ;;  %v3920_v22 = vpop.eup %3919 }
 0xa66   :  { %3923 = vrcp.f32 %v3537_v55  ;;  %v3530_v46 = vadd.f32 1.0, %v3920_v22  ;;  %v3922_v6 = vpop.eup %3921 }
 0xa67   :  { %3925 = vrcp.f32 %v3515_v11 }
 0xa68   :  { %3927 = vpow2.f32 %v3653_v1 }
 0xa69   :  { %3929 = vrcp.f32 %v3530_v46 }
 0xa6a   :  { %3931 = vtanh.f32 %v3508_v10 }
 0xa73   :  { %v3924_v9 = vpop.eup %3923 }
 0xa74   :  { %v3546_v3 = vadd.f32 %v3924_v9, %v3922_v6  ;;  %v3926_v17 = vpop.eup %3925 }
 0xa75   :  { %v3928_v39 = vpop.eup %3927  ;;  %v3540_v15 = vmul.f32 %v3926_v17, %v3518_v16 }
 0xa76   :  { %v3656_v47 = vmul.f32 -1.442695, %v3546_v3  ;;  %v3522_v42 = vadd.f32 1.0, %v3928_v39  ;;  %v3930_v7 = vpop.eup %3929 }
 0xa77   :  { %v3932_v14 = vpop.eup %3931 }
 0xa78   :  { %3933 = vpow2.f32 %v3656_v47  ;;  %v3544_v63 = vmul.f32 %v3932_v14, %v3930_v7 }
 0xa79   :  { %3935 = vtanh.f32 %v3540_v15 }
 0xa7a   :  { %3937 = vrcp.f32 %v3522_v42 }
 0xa7b   :  { %3939 = vtanh.f32 %v3544_v63 }
 0xa85   :  { %v3934_v12 = vpop.eup %3933 }
 0xa86   :  { %v3550_v33 = vadd.f32 1.0, %v3934_v12  ;;  %v3936_v38 = vpop.eup %3935 }
 0xa87   :  { %v3938_v35 = vpop.eup %3937  ;;  %v3553_v59 = vadd.f32 %v3936_v38, %v6437_v49 }
 0xa88   :  { %3941 = vrcp.f32 %v3550_v33  ;;  %v3542_v61 = vadd.f32 %v3938_v35, %v3525_v32  ;;  %v3940_v2 = vpop.eup %3939 }
 0xa89   :  { %3943 = vtanh.f32 %v3553_v59 }
 0xa8a   :  { %3945 = vtanh.f32 %v3542_v61 }
 0xa95   :  { %v3942_v8 = vpop.eup %3941 }
 0xa96   :  { %v3556_v41 = vadd.f32 %v3942_v8, %v3940_v2  ;;  %v3944_v37 = vpop.eup %3943 }
 0xa97   :  { %v3946_v4 = vpop.eup %3945 }
 0xa98   :  { %3947 = vtanh.f32 %v3556_v41  ;;  %v3555_v31 = vmul.f32 %v3946_v4, %v3944_v37 }
 0xaa5   :  { %v3948_v34 = vpop.eup %3947 }
 0xaa6   :  { %v3558_v62 = vmul.f32 %v3948_v34, %v3555_v31 }
 0xaa8   :  { %3949 = vtanh.f32 %v3558_v62 }
 0xab5   :  { %v3950_v30 = vpop.eup %3949 }
 0xab6   :  { %v3560_v51 = vadd.f32 %v3950_v30, %v3555_v31 }
 0xab8   :  { %3561 = vst [vmem:[#allocation8] sm:$0xff] %v3560_v51 }
 0xab9   :  { %4258 = shalt.err (!%p4255_p0)
}
 0xaba   :  { %3571 = dma.vmem_to_hbm [thread:$0]  %s3569_s11, 128, %s6525_s3, [#allocation5]  }
 0xabb   :  { %4271 = dma.done.wait [#allocation5], 128  }
 0xabc   :  { %4272 = vsyncadd [#allocation5], 4294967168 }
 0xabd   :  { %3575 = vsyncpa [#allocation4], 1 }
 0xabe   :  { %3576 = vsyncpa [#allocation7], 1 }
 0xabf   :  { %3577 = vsyncpa [#allocation5], 1 }

</bundles_post_ra>
